<compile_context>
chip_gen: v7x
topology: tpu7x:2x2x1
jax: 0.10.0
libtpu: 0.0.40
codegen_flags: <defaults>
</compile_context>

<pallas_src>
import functools

import jax
import jax.numpy as jnp
from jax.experimental import pallas as pl
from jax.experimental.pallas import tpu as pltpu


# ---------------------------------------------------------------- kernels ---

def _feature_matrix(z):
    """F[(i,j), n] = zpad_i[n] * zpad_j[n], zpad = [1; z]  ->  ((D+1)^2, T)."""
    d, t = z.shape
    zpad = jnp.concatenate([jnp.ones((1, t), z.dtype), z], axis=0)     # (D+1, T)
    return (zpad[:, None, :] * zpad[None, :, :]).reshape((d + 1) * (d + 1), t)


def _stats_kernel(z_ref, g_ref, acc_ref):
    """acc[k, (i,j)] += sum_n gamma_k[n] * zpad_i[n] * zpad_j[n] (one matmul)."""
    @pl.when(pl.program_id(1) == 0)
    def _():
        acc_ref[...] = jnp.zeros_like(acc_ref)

    f = _feature_matrix(z_ref[...])                                    # (F, T)
    acc_ref[...] += jax.lax.dot_general(
        g_ref[...], f, (((1,), (1,)), ((), ())),                       # contract T
        preferred_element_type=jnp.float32)                            # (K, F)


def _energy_kernel(z_ref, pc_ref, esum_ref, *, nfeat, n_valid, cov_eps):
    """esum += sum_n -log( sum_k coef_k * exp(P_k . F_n) + cov_eps ).

    P_k . F_n == -0.5 (z_n - mu_k)^T Sigma_k^{-1} (z_n - mu_k), folded in glue.
    Like the torch reference there is no max-subtraction inside the log-sum.
    """
    @pl.when(pl.program_id(1) == 0)
    def _():
        esum_ref[...] = jnp.zeros_like(esum_ref)

    f = _feature_matrix(z_ref[...])                                    # (F, T)
    t = f.shape[-1]
    pc = pc_ref[...]                                                   # (K, F+1)
    expo = jnp.dot(pc[:, :nfeat], f,
                   preferred_element_type=jnp.float32)                 # (K, T)
    acc = jnp.sum(pc[:, nfeat:nfeat + 1] * jnp.exp(expo),
                  axis=0, keepdims=True)                               # (1, T)
    elog = -jnp.log(acc + cov_eps)                                     # (1, T)

    # Only tiles that actually contain padded lanes pay for the mask.
    tile_lin = pl.program_id(0) * pl.num_programs(1) + pl.program_id(1)
    tile_start = tile_lin * t
    has_pad = tile_start + t > n_valid

    @pl.when(jnp.logical_not(has_pad))
    def _():
        esum_ref[...] += jnp.sum(elog, axis=-1, keepdims=True)

    @pl.when(has_pad)
    def _():
        idx = tile_start + jax.lax.broadcasted_iota(jnp.int32, (1, t), 1)
        esum_ref[...] += jnp.sum(jnp.where(idx < n_valid, elog, 0.0),
                                 axis=-1, keepdims=True)


# ---------------------------------------------------------------- wrapper ---

def _round_up(x, m):
    return ((x + m - 1) // m) * m


def _chip_kind():
    try:
        return jax.devices()[0].device_kind.lower()
    except Exception:
        return ""


def gmm_loss(z, gamma, *, weight_energy, weight_cov, eps=1e-9, cov_eps=1e-6,
             tile=32768, n_cores=None):
    B, H, W, D = z.shape
    K = gamma.shape[-1]
    N = B * H * W
    nf1 = D + 1
    nfeat = nf1 * nf1                                   # (D+1)^2 stacked features

    kind = _chip_kind()
    is_v7 = "v7" in kind
    if n_cores is None:
        # v5e/v6e have a single TensorCore: a size-2 core axis is pure overhead.
        n_cores = 2 if is_v7 else 1

    # ---- lane-dense layout: samples on the lane axis ----
    zf = z.reshape(N, D).astype(jnp.float32).T          # (D, N)
    gf = gamma.reshape(N, K).astype(jnp.float32).T      # (K, N)

    tile = min(tile, _round_up(N, 128))                 # don't over-pad tiny inputs
    n_pad = _round_up(N, tile * n_cores)
    if n_pad != N:
        # zero padding: gamma = 0 => no contribution to the statistics; the
        # energy kernel masks padded lanes explicitly (gated on pl.when).
        zf = jnp.pad(zf, ((0, 0), (0, n_pad - N)))
        gf = jnp.pad(gf, ((0, 0), (0, n_pad - N)))
    npc = n_pad // (tile * n_cores)                     # N-tiles per core
    grid = (n_cores, npc)

    if n_cores > 1:
        dims = (pltpu.CORE_PARALLEL, pltpu.ARBITRARY)   # real TC sharding on v7x
    else:
        dims = ("arbitrary", "arbitrary")
    # v7x: 64 MiB physical VMEM -> keep default scoped limit (tile<=32768 fits);
    # v5e/v6e: 128 MiB physical -> raise the 16/32 MiB default for big tiles.
    vmem_limit = None if is_v7 else (64 << 20)
    cparams = pltpu.CompilerParams(dimension_semantics=dims,
                                   vmem_limit_bytes=vmem_limit)

    # --- pass 1: fused sufficient statistics (single matmul per tile) ---
    stats_cost = pl.CostEstimate(
        flops=int(n_pad * (nfeat + 2 * K * nfeat)),
        transcendentals=0,
        bytes_accessed=int(n_pad * (D + K) * 4))
    acc_p = pl.pallas_call(
        _stats_kernel,
        out_shape=jax.ShapeDtypeStruct((n_cores, K, nfeat), jnp.float32),
        grid=grid,
        in_specs=[pl.BlockSpec((D, tile), lambda c, i: (0, c * npc + i)),
                  pl.BlockSpec((K, tile), lambda c, i: (0, c * npc + i))],
        out_specs=pl.BlockSpec((None, K, nfeat), lambda c, i: (c, 0, 0)),
        compiler_params=cparams,
        cost_estimate=stats_cost,
    )(zf, gf)

    stats = jnp.sum(acc_p, axis=0).reshape(K, nf1, nf1)
    sgamma = stats[:, 0, 0]                             # (K,)   sum_n gamma
    szg = stats[:, 0, 1:]                               # (K,D)  sum_n gamma*z
    s2 = stats[:, 1:, 1:]                               # (K,D,D) sum_n gamma*z z^T
    s2 = 0.5 * (s2 + jnp.swapaxes(s2, -1, -2))          # enforce exact symmetry

    phi = sgamma / jnp.float32(N)                       # (K,)
    mu = szg / sgamma[:, None]                          # (K, D)
    # Covariance from uncentered moments (fused single pass).
    # TODO(synk): f32 cancellation if |mu| >> sigma; revalidate vs a centered
    # two-pass reference if that regime matters.
    cov = s2 / sgamma[:, None, None] - mu[:, :, None] * mu[:, None, :]

    eye = jnp.eye(D, dtype=jnp.float32)
    cov = cov + cov_eps * eye                           # compute_params regularizer
    cov_k = cov + eps * eye                             # compute_energy regularizer

    # tiny KxDxD linear algebra stays in JAX (no Pallas matrix-inverse/cholesky)
    cov_inv = jnp.linalg.inv(cov_k)                                   # (K, D, D)
    chol = jnp.linalg.cholesky(cov_k * (2.0 * jnp.pi))                # (K, D, D)
    # torch Cholesky fallback: non-PD input -> identity (JAX cholesky gives NaN)
    pd_ok = jnp.all(jnp.isfinite(chol), axis=(-2, -1), keepdims=True)
    chol = jnp.where(pd_ok, chol, eye)
    det_cov = jnp.prod(jnp.diagonal(chol, axis1=-2, axis2=-1), axis=-1)    # (K,)
    cov_diag = jnp.sum(1.0 / jnp.diagonal(cov_k, axis1=-2, axis2=-1))      # scalar
    # coef = phi / sqrt(prod(diag(chol(2*pi*cov)))) = phi * det(2*pi*cov)^(-1/4),
    # intentionally reproducing the reference torch code (known DAGMM quirk).
    coef = phi / jnp.sqrt(det_cov)                                    # (K,)

    # Fold all per-component constants into one lane-packed parameter array:
    # P_k . F_n = -0.5 (z-mu_k)^T A_k (z-mu_k), last column carries coef_k.
    amu = jnp.einsum('kde,ke->kd', cov_inv, mu)                       # A_k mu_k
    mu_amu = jnp.sum(amu * mu, axis=-1)                               # mu^T A mu
    p_full = jnp.zeros((K, nf1, nf1), jnp.float32)
    p_full = p_full.at[:, 1:, 1:].set(-0.5 * cov_inv)
    p_full = p_full.at[:, 0, 1:].set(amu)
    p_full = p_full.at[:, 0, 0].set(-0.5 * mu_amu)
    pc = jnp.concatenate([p_full.reshape(K, nfeat), coef[:, None]], axis=1)

    # --- pass 2: per-sample energy (single matmul + exp/log per tile) ---
    energy_cost = pl.CostEstimate(
        flops=int(n_pad * (nfeat + 2 * K * nfeat + 4 * K + 2)),
        transcendentals=int(n_pad * (K + 1)),
        bytes_accessed=int(n_pad * D * 4))
    esum_p = pl.pallas_call(
        functools.partial(_energy_kernel, nfeat=nfeat, n_valid=N,
                          cov_eps=cov_eps),
        out_shape=jax.ShapeDtypeStruct((n_cores, 1, 1), jnp.float32),
        grid=grid,
        in_specs=[pl.BlockSpec((D, tile), lambda c, i: (0, c * npc + i)),
                  pl.BlockSpec((K, nfeat + 1), lambda c, i: (0, 0))],
        out_specs=pl.BlockSpec((None, 1, 1), lambda c, i: (c, 0, 0)),
        compiler_params=cparams,
        cost_estimate=energy_cost,
    )(zf, pc)

    sample_energy = jnp.sum(esum_p) / jnp.float32(N)    # mean over real samples

    # isfinite guards (torch: replace non-finite scalars with zero)
    sample_energy = jnp.where(jnp.isfinite(sample_energy), sample_energy, 0.0)
    cov_diag = jnp.where(jnp.isfinite(cov_diag), cov_diag, 0.0)

    return weight_energy * sample_energy + weight_cov * cov_diag


# ------------------------------------------------------------------- main ---

if __name__ == "__main__":
    key = jax.random.PRNGKey(0)
    kz, kg = jax.random.split(key)

    B, H, W, D, K = 2, 16, 16, 8, 4                     # N = B*H*W = 512
    z = jax.random.normal(kz, (B, H, W, D), dtype=jnp.float32)
    gamma_logits = jax.random.normal(kg, (B, H, W, K), dtype=jnp.float32)
    gamma = jax.nn.softmax(gamma_logits, axis=-1)       # positive mixture weights

    loss_fn = jax.jit(functools.partial(gmm_loss,
                                        weight_energy=0.1, weight_cov=0.005))
    loss = jax.block_until_ready(loss_fn(z, gamma))
    assert jnp.isfinite(loss)
    print("KERNEL_OK")
</pallas_src>

<mosaic_0001>
module attributes {stable_mosaic.version = 11 : i64} {
  func.func @_stats_kernel(%arg0: i32, %arg1: i32, %arg2: memref<8x512xf32, #tpu.memory_space<vmem>>, %arg3: memref<4x512xf32, #tpu.memory_space<vmem>>, %arg4: memref<1x4x81xf32, #tpu.memory_space<vmem>>) attributes {dimension_semantics = [#tpu.dimension_semantics<arbitrary>, #tpu.dimension_semantics<arbitrary>], iteration_bounds = array<i64: 1, 1>, scalar_prefetch = 0 : i64, scratch_operands = 0 : i64, tpu.core_type = #tpu.core_type<tc>, window_params = [{transform_indices = @transform_0, window_bounds = array<i64: 8, 512>}, {transform_indices = @transform_1, window_bounds = array<i64: 4, 512>}, {transform_indices = @transform_2, window_bounds = array<i64: 1, 4, 81>}]} {
    %c0_i32 = arith.constant 0 : i32
    %0 = arith.cmpi eq, %arg1, %c0_i32 : i32
    %1 = arith.extui %0 : i1 to i32
    %c0_i32_0 = arith.constant 0 : i32
    %2 = arith.cmpi ne, %1, %c0_i32_0 : i32
    scf.if %2 {
      %cst_11 = arith.constant 0.000000e+00 : f32
      %20 = vector.broadcast %cst_11 : f32 to vector<4x81xf32>
      %c0_12 = arith.constant 0 : index
      %c0_13 = arith.constant 0 : index
      %c0_14 = arith.constant 0 : index
      %21 = vector.load %arg4[%c0_12, %c0_13, %c0_14] : memref<1x4x81xf32, #tpu.memory_space<vmem>>, vector<1x4x81xf32>
      %22 = vector.shape_cast %21 : vector<1x4x81xf32> to vector<4x81xf32>
      %23 = vector.shape_cast %20 : vector<4x81xf32> to vector<1x4x81xf32>
      tpu.vector_store %arg4[%c0_12, %c0_13, %c0_14], %23 {strides = array<i32>} : memref<1x4x81xf32, #tpu.memory_space<vmem>>, vector<1x4x81xf32>,
    } else {
    }
    %c0 = arith.constant 0 : index
    %c0_1 = arith.constant 0 : index
    %3 = vector.load %arg2[%c0, %c0_1] : memref<8x512xf32, #tpu.memory_space<vmem>>, vector<8x512xf32>
    %cst = arith.constant 1.000000e+00 : f32
    %4 = vector.broadcast %cst : f32 to vector<1x512xf32>
    %5 = tpu.concatenate %4, %3 in 0 : vector<1x512xf32>, vector<8x512xf32> -> vector<9x512xf32>
    %6 = vector.shape_cast %5 : vector<9x512xf32> to vector<9x1x512xf32>
    %7 = vector.shape_cast %5 : vector<9x512xf32> to vector<1x9x512xf32>
    %8 = vector.broadcast %6 : vector<9x1x512xf32> to vector<9x9x512xf32>
    %9 = vector.broadcast %7 : vector<1x9x512xf32> to vector<9x9x512xf32>
    %10 = arith.mulf %8, %9 : vector<9x9x512xf32>
    %11 = vector.shape_cast %10 : vector<9x9x512xf32> to vector<81x512xf32>
    %c0_2 = arith.constant 0 : index
    %c0_3 = arith.constant 0 : index
    %c0_4 = arith.constant 0 : index
    %12 = vector.load %arg4[%c0_2, %c0_3, %c0_4] : memref<1x4x81xf32, #tpu.memory_space<vmem>>, vector<1x4x81xf32>
    %13 = vector.shape_cast %12 : vector<1x4x81xf32> to vector<4x81xf32>
    %c0_5 = arith.constant 0 : index
    %c0_6 = arith.constant 0 : index
    %14 = vector.load %arg3[%c0_5, %c0_6] : memref<4x512xf32, #tpu.memory_space<vmem>>, vector<4x512xf32>
    %cst_7 = arith.constant dense<0.000000e+00> : vector<4x81xf32>
    %15 = tpu.matmul %14, %11, %cst_7 {dimension_numbers = #tpu.dot_dimension_numbers<[1], [1], [0], [0], [0, 0, 1, 0], [], []>} : vector<4x512xf32>, vector<81x512xf32>, vector<4x81xf32> -> vector<4x81xf32>
    %16 = arith.addf %13, %15 : vector<4x81xf32>
    %c0_8 = arith.constant 0 : index
    %c0_9 = arith.constant 0 : index
    %c0_10 = arith.constant 0 : index
    %17 = vector.load %arg4[%c0_8, %c0_9, %c0_10] : memref<1x4x81xf32, #tpu.memory_space<vmem>>, vector<1x4x81xf32>
    %18 = vector.shape_cast %17 : vector<1x4x81xf32> to vector<4x81xf32>
    %19 = vector.shape_cast %16 : vector<4x81xf32> to vector<1x4x81xf32>
    tpu.vector_store %arg4[%c0_8, %c0_9, %c0_10], %19 {strides = array<i32>} : memref<1x4x81xf32, #tpu.memory_space<vmem>>, vector<1x4x81xf32>,
    return
  }
  func.func @transform_0(%arg0: i32, %arg1: i32) -> (i32, i32) {
    %c1_i32 = arith.constant 1 : i32
    %0 = arith.muli %arg0, %c1_i32 : i32
    %1 = arith.addi %0, %arg1 : i32
    %c0_i32 = arith.constant 0 : i32
    %c0_i32_0 = arith.constant 0 : i32
    return %c0_i32, %1 : i32, i32
  }
  func.func @transform_1(%arg0: i32, %arg1: i32) -> (i32, i32) {
    %c1_i32 = arith.constant 1 : i32
    %0 = arith.muli %arg0, %c1_i32 : i32
    %1 = arith.addi %0, %arg1 : i32
    %c0_i32 = arith.constant 0 : i32
    %c0_i32_0 = arith.constant 0 : i32
    return %c0_i32, %1 : i32, i32
  }
  func.func @transform_2(%arg0: i32, %arg1: i32) -> (i32, i32, i32) {
    %c0_i32 = arith.constant 0 : i32
    %c0_i32_0 = arith.constant 0 : i32
    %c0_i32_1 = arith.constant 0 : i32
    return %arg0, %c0_i32, %c0_i32_0 : i32, i32, i32
  }
}

module attributes {stable_mosaic.version = 11 : i64} {
  func.func @_energy_kernel(%arg0: i32, %arg1: i32, %arg2: memref<8x512xf32, #tpu.memory_space<vmem>>, %arg3: memref<4x82xf32, #tpu.memory_space<vmem>>, %arg4: memref<1x1x1xf32, #tpu.memory_space<vmem>>) attributes {dimension_semantics = [#tpu.dimension_semantics<arbitrary>, #tpu.dimension_semantics<arbitrary>], iteration_bounds = array<i64: 1, 1>, scalar_prefetch = 0 : i64, scratch_operands = 0 : i64, tpu.core_type = #tpu.core_type<tc>, window_params = [{transform_indices = @transform_0, window_bounds = array<i64: 8, 512>}, {pipeline_mode = #tpu.pipeline_mode<synchronous>, transform_indices = @transform_1, window_bounds = array<i64: 4, 82>}, {transform_indices = @transform_2, window_bounds = array<i64: 1, 1, 1>}]} {
    %c0_i32 = arith.constant 0 : i32
    %0 = arith.cmpi eq, %arg1, %c0_i32 : i32
    %1 = arith.extui %0 : i1 to i32
    %c0_i32_0 = arith.constant 0 : i32
    %2 = arith.cmpi ne, %1, %c0_i32_0 : i32
    scf.if %2 {
      %cst_12 = arith.constant 0.000000e+00 : f32
      %36 = vector.broadcast %cst_12 : f32 to vector<1x1xf32>
      %c0_13 = arith.constant 0 : index
      %c0_14 = arith.constant 0 : index
      %c0_15 = arith.constant 0 : index
      %37 = vector.load %arg4[%c0_13, %c0_14, %c0_15] : memref<1x1x1xf32, #tpu.memory_space<vmem>>, vector<1x1x1xf32>
      %38 = vector.shape_cast %37 : vector<1x1x1xf32> to vector<1x1xf32>
      %39 = vector.shape_cast %36 : vector<1x1xf32> to vector<1x1x1xf32>
      tpu.vector_store %arg4[%c0_13, %c0_14, %c0_15], %39 {strides = array<i32>} : memref<1x1x1xf32, #tpu.memory_space<vmem>>, vector<1x1x1xf32>,
    } else {
    }
    %c0 = arith.constant 0 : index
    %c0_1 = arith.constant 0 : index
    %3 = vector.load %arg2[%c0, %c0_1] : memref<8x512xf32, #tpu.memory_space<vmem>>, vector<8x512xf32>
    %cst = arith.constant 1.000000e+00 : f32
    %4 = vector.broadcast %cst : f32 to vector<1x512xf32>
    %5 = tpu.concatenate %4, %3 in 0 : vector<1x512xf32>, vector<8x512xf32> -> vector<9x512xf32>
    %6 = vector.shape_cast %5 : vector<9x512xf32> to vector<9x1x512xf32>
    %7 = vector.shape_cast %5 : vector<9x512xf32> to vector<1x9x512xf32>
    %8 = vector.broadcast %6 : vector<9x1x512xf32> to vector<9x9x512xf32>
    %9 = vector.broadcast %7 : vector<1x9x512xf32> to vector<9x9x512xf32>
    %10 = arith.mulf %8, %9 : vector<9x9x512xf32>
    %11 = vector.shape_cast %10 : vector<9x9x512xf32> to vector<81x512xf32>
    %c0_2 = arith.constant 0 : index
    %c0_3 = arith.constant 0 : index
    %12 = vector.load %arg3[%c0_2, %c0_3] : memref<4x82xf32, #tpu.memory_space<vmem>>, vector<4x82xf32>
    %13 = vector.extract_strided_slice %12 {offsets = [0, 0], sizes = [4, 81], strides = [1, 1]} : vector<4x82xf32> to vector<4x81xf32>
    %cst_4 = arith.constant dense<0.000000e+00> : vector<4x512xf32>
    %14 = tpu.matmul %13, %11, %cst_4 {dimension_numbers = #tpu.dot_dimension_numbers<[1], [0], [0], [1], [0, 0, 1, 1], [], []>} : vector<4x81xf32>, vector<81x512xf32>, vector<4x512xf32> -> vector<4x512xf32>
    %15 = vector.extract_strided_slice %12 {offsets = [0, 81], sizes = [4, 1], strides = [1, 1]} : vector<4x82xf32> to vector<4x1xf32>
    %16 = math.exp %14 : vector<4x512xf32>
    %17 = vector.broadcast %15 : vector<4x1xf32> to vector<4x512xf32>
    %18 = arith.mulf %17, %16 : vector<4x512xf32>
    %cst_5 = arith.constant dense<0.000000e+00> : vector<512xf32>
    %19 = vector.multi_reduction <add>, %18, %cst_5 [0] : vector<4x512xf32> to vector<512xf32>
    %20 = vector.shape_cast %19 : vector<512xf32> to vector<1x512xf32>
    %cst_6 = arith.constant 9.99999997E-7 : f32
    %21 = vector.broadcast %cst_6 : f32 to vector<1x512xf32>
    %22 = arith.addf %20, %21 : vector<1x512xf32>
    %23 = math.log %22 : vector<1x512xf32>
    %cst_7 = arith.constant 0.000000e+00 : f32
    %24 = vector.broadcast %cst_7 : f32 to vector<1x512xf32>
    %25 = arith.subf %24, %23 : vector<1x512xf32>
    %c1_i32 = arith.constant 1 : i32
    %26 = arith.muli %arg0, %c1_i32 : i32
    %27 = arith.addi %26, %arg1 : i32
    %c512_i32 = arith.constant 512 : i32
    %28 = arith.muli %27, %c512_i32 : i32
    %c512_i32_8 = arith.constant 512 : i32
    %29 = arith.addi %28, %c512_i32_8 : i32
    %c512_i32_9 = arith.constant 512 : i32
    %30 = arith.cmpi sgt, %29, %c512_i32_9 : i32
    %true = arith.constant true
    %31 = arith.xori %30, %true : i1
    %32 = arith.extui %31 : i1 to i32
    %c0_i32_10 = arith.constant 0 : i32
    %33 = arith.cmpi ne, %32, %c0_i32_10 : i32
    scf.if %33 {
      %c0_12 = arith.constant 0 : index
      %c0_13 = arith.constant 0 : index
      %c0_14 = arith.constant 0 : index
      %36 = vector.load %arg4[%c0_12, %c0_13, %c0_14] : memref<1x1x1xf32, #tpu.memory_space<vmem>>, vector<1x1x1xf32>
      %37 = vector.shape_cast %36 : vector<1x1x1xf32> to vector<1x1xf32>
      %cst_15 = arith.constant dense<0.000000e+00> : vector<1xf32>
      %38 = vector.multi_reduction <add>, %25, %cst_15 [1] : vector<1x512xf32> to vector<1xf32>
      %39 = vector.shape_cast %38 : vector<1xf32> to vector<1x1xf32>
      %40 = arith.addf %37, %39 : vector<1x1xf32>
      %c0_16 = arith.constant 0 : index
      %c0_17 = arith.constant 0 : index
      %c0_18 = arith.constant 0 : index
      %41 = vector.load %arg4[%c0_16, %c0_17, %c0_18] : memref<1x1x1xf32, #tpu.memory_space<vmem>>, vector<1x1x1xf32>
      %42 = vector.shape_cast %41 : vector<1x1x1xf32> to vector<1x1xf32>
      %43 = vector.shape_cast %40 : vector<1x1xf32> to vector<1x1x1xf32>
      tpu.vector_store %arg4[%c0_16, %c0_17, %c0_18], %43 {strides = array<i32>} : memref<1x1x1xf32, #tpu.memory_space<vmem>>, vector<1x1x1xf32>,
    } else {
    }
    %34 = arith.extui %30 : i1 to i32
    %c0_i32_11 = arith.constant 0 : i32
    %35 = arith.cmpi ne, %34, %c0_i32_11 : i32
    scf.if %35 {
      %36 = tpu.iota {dimensions = array<i32: 1>} : vector<1x512xi32>
      %37 = vector.broadcast %28 : i32 to vector<1x512xi32>
      %38 = arith.addi %37, %36 : vector<1x512xi32>
      %c0_12 = arith.constant 0 : index
      %c0_13 = arith.constant 0 : index
      %c0_14 = arith.constant 0 : index
      %39 = vector.load %arg4[%c0_12, %c0_13, %c0_14] : memref<1x1x1xf32, #tpu.memory_space<vmem>>, vector<1x1x1xf32>
      %40 = vector.shape_cast %39 : vector<1x1x1xf32> to vector<1x1xf32>
      %c512_i32_15 = arith.constant 512 : i32
      %41 = vector.broadcast %c512_i32_15 : i32 to vector<1x512xi32>
      %42 = arith.cmpi slt, %38, %41 : vector<1x512xi32>
      %cst_16 = arith.constant 0.000000e+00 : f32
      %43 = vector.broadcast %cst_16 : f32 to vector<1x512xf32>
      %44 = arith.select %42, %25, %43 : vector<1x512xi1>, vector<1x512xf32>
      %cst_17 = arith.constant dense<0.000000e+00> : vector<1xf32>
      %45 = vector.multi_reduction <add>, %44, %cst_17 [1] : vector<1x512xf32> to vector<1xf32>
      %46 = vector.shape_cast %45 : vector<1xf32> to vector<1x1xf32>
      %47 = arith.addf %40, %46 : vector<1x1xf32>
      %c0_18 = arith.constant 0 : index
      %c0_19 = arith.constant 0 : index
      %c0_20 = arith.constant 0 : index
      %48 = vector.load %arg4[%c0_18, %c0_19, %c0_20] : memref<1x1x1xf32, #tpu.memory_space<vmem>>, vector<1x1x1xf32>
      %49 = vector.shape_cast %48 : vector<1x1x1xf32> to vector<1x1xf32>
      %50 = vector.shape_cast %47 : vector<1x1xf32> to vector<1x1x1xf32>
      tpu.vector_store %arg4[%c0_18, %c0_19, %c0_20], %50 {strides = array<i32>} : memref<1x1x1xf32, #tpu.memory_space<vmem>>, vector<1x1x1xf32>,
    } else {
    }
    return
  }
  func.func @transform_0(%arg0: i32, %arg1: i32) -> (i32, i32) {
    %c1_i32 = arith.constant 1 : i32
    %0 = arith.muli %arg0, %c1_i32 : i32
    %1 = arith.addi %0, %arg1 : i32
    %c0_i32 = arith.constant 0 : i32
    %c0_i32_0 = arith.constant 0 : i32
    return %c0_i32, %1 : i32, i32
  }
  func.func @transform_1(%arg0: i32, %arg1: i32) -> (i32, i32) {
    %c0_i32 = arith.constant 0 : i32
    %c0_i32_0 = arith.constant 0 : i32
    %c0_i32_1 = arith.constant 0 : i32
    return %c0_i32, %c0_i32_0 : i32, i32
  }
  func.func @transform_2(%arg0: i32, %arg1: i32) -> (i32, i32, i32) {
    %c0_i32 = arith.constant 0 : i32
    %c0_i32_0 = arith.constant 0 : i32
    %c0_i32_1 = arith.constant 0 : i32
    return %arg0, %c0_i32, %c0_i32_0 : i32, i32, i32
  }
}

</mosaic_0001>

<bundles_post_ra>
// kernel: custom-call.16
= control target key start
LH: loop header
LB: loop body
LE: loop exit
PB: predicated region body
PF: predicated region fallthrough
CT: control target
= control target key end

     0   :  { %s469_s6 = smov 0   ;;  %s471_s7 = smov 0   ;;  %s549_s0 = inlined_call_operand.vmem [shape: f32[4,8,8], index: 0, kind: input, shape index: {}]   ;;  %s550_s1 = inlined_call_operand.vmem [shape: f32[4,8,8], index: 1, kind: output, shape index: {}]  }
   0x1   :  { %s473_s8 = smov 0  }
   0x2 LB: > { %s367_s9 = sadd.s32 4294967295, %s456_s8   ;;  %s26_s10 = sadd.s32 1, %s452_s7  ;;  %s456_s8 = sphi %s473_s8, %s7_s8   ;;  %s452_s7 = sphi %s471_s7, %s552_s7   ;;  %s448_s6 = sphi %s469_s6, %s551_s6  }
   0x3   : > { %p28_p0 = scmp.ge.s32.totalorder %s26_s10, 4  ;;  %p369_p1 = scmp.ge.s32.totalorder %s456_s8, 4 }
   0x4   : > { %s42_s11 = sand.u32 (!%p369_p1), 1, %s456_s8   ;;  %s371_s12 = sshll.u32 (!%p369_p1), %s452_s7, 3 }
   0x5   : > { %s554_s10 = smov (%p28_p0, %s26_s10), 0  ;;  %40 = sbr.rel (%p369_p1) target bundleno = 12 (0xc), region = 16 }
   0x6   : > { %s370_s13 = sshll.u32 (!%p369_p1), %s42_s11, 3  ;;  %s48_s16 = scalar_lea.vmem (!%p369_p1), %s549_s0, %s371_s12 }
   0x7   : > { %v76_v0 = vld [vmem:[%s48_s16] sm:$0xff] (!%p369_p1)  ;;  %s44_s17 = scalar_lea.vmem (!%p369_p1), [#allocation0], %s370_s13 }
   0x8   : > { %77 = vst [vmem:[%s44_s17] sm:$0xff] (!%p369_p1), %v76_v0 }
   0xc PF: > { %p372_p2 = scmp.ge.s32.totalorder %s456_s8, 1  ;;  %p82_p3 = scmp.lt.s32.totalorder %s456_s8, 5 }
   0xe   : > { %p83_p4 = pnand %p372_p2, %p82_p3 }
   0xf   : > { %s89_s18 = sand.u32 (!%p83_p4), 1, %s367_s9   ;;  %v458_v1 = vmov (!%p83_p4), 0.0   ;;  %vm101_vm0 = vcmask (!%p83_p4), 7168   ;;  %vm119_vm1 = vcmask (!%p83_p4), 15368   ;;  %vm136_vm2 = vcmask (!%p83_p4), 1047553   ;;  %s390_s22 = sshll.u32 (!%p83_p4), %s448_s6, 3 }
  0x10   : > { %86 = sbr.rel (%p83_p4) target bundleno = 1377 (0x561), region = 54  ;;  %s373_s19 = sshll.u32 (!%p83_p4), %s89_s18, 3  ;;  %vm137_vm3 = vmand (!%p83_p4), %vm119_vm1, %vm136_vm2  ;;  %vm141_vm4 = vcmask (!%p83_p4), 23568   ;;  %vm158_vm5 = vcmask (!%p83_p4), 1047554   ;;  %vm163_vm7 = vcmask (!%p83_p4), 31768   ;;  %vm180_vm8 = vcmask (!%p83_p4), 1047555  }
  0x11   : > { %s496_s20 = scalar_lea.vmem (!%p83_p4), [#allocation1], %s373_s19  ;;  %s500_s21 = scalar_lea.vmem (!%p83_p4), [#allocation0], %s373_s19  ;;  %vm159_vm6 = vmand (!%p83_p4), %vm141_vm4, %vm158_vm5  ;;  %vm185_vm10 = vcmask (!%p83_p4), 39968   ;;  %vm202_vm11 = vcmask (!%p83_p4), 1047556   ;;  %vm207_vm13 = vcmask (!%p83_p4), 48168   ;;  %vm224_vm14 = vcmask (!%p83_p4), 1047557  }
  0x12   : > { %100 = vst [vmem:[%s496_s20] sm:$0xff] (!%p83_p4), %v458_v1  ;;  %v103_v5 = vld [vmem:[%s500_s21] ss:$0 sm:$0xff] (!%p83_p4)  ;;  %v376_v17 = vld [vmem:[%s500_s21 + $0x1] ss:$0 sm:$0xff] (!%p83_p4)  ;;  %v378_v29 = vld [vmem:[%s500_s21 + $0x2] ss:$0 sm:$0xff] (!%p83_p4)  ;;  %s280_s25 = scalar_lea.vmem (!%p83_p4), %s550_s1, %s390_s22 }
  0x13   : > { %v504_v9 = vld [vmem:[%s500_s21] sm:$0xff] (!%p83_p4)  ;;  %vm181_vm9 = vmand (!%p83_p4), %vm163_vm7, %vm180_vm8  ;;  %vm246_vm1 = vcmask (!%p83_p4), 1047558   ;;  %vm268_vm4 = vcmask (!%p83_p4), 1047559  }
  0x14   : > { %v380_v41 = vld [vmem:[%s500_s21 + $0x3] ss:$0 sm:$0xff] (!%p83_p4)  ;;  %v382_v53 = vld [vmem:[%s500_s21 + $0x4] ss:$0 sm:$0xff] (!%p83_p4)  ;;  %vm203_vm12 = vmand (!%p83_p4), %vm185_vm10, %vm202_vm11 }
  0x15   : > { %v384_v1 = vld [vmem:[%s500_s21 + $0x5] ss:$0 sm:$0xff] (!%p83_p4)  ;;  %vm225_vm15 = vmand (!%p83_p4), %vm207_vm13, %vm224_vm14 }
  0x19   : > { %v102_v2 = vld [vmem:[%s496_s20] ss:$0 sm:$0xff] }
  0x1a   : > { %v104_v3 = vmul.f32 %v102_v2, %v102_v2  ;;  %v111_v4 = vmul.f32 0.0, %v102_v2 }
  0x1c   : > { %105 = vadd.xlane.f32.xlu0 %v104_v3 }
  0x20   : > { %112 = vadd.xlane.f32.xlu0 %v111_v4 }
  0xa9   : > { %v106_v6 = vpop.xlane.xlu0 %105 }
  0xaa   : > { %v107_v7 = vsub.f32 %v103_v5, %v106_v6 }
  0xac   : > { %418 = vrsqrt.f32 %v107_v7 }
  0xad   : > { %v113_v8 = vpop.xlane.xlu0 %112 }
  0xae   : > { %v114_v10 = vsub.f32 %v504_v9, %v113_v8 }
  0xb6   : > { %v419_v11 = vpop.eup %418 }
  0xb7   : > { %v115_v12 = vmul.f32 %v419_v11, %v114_v10 }
  0xb9   : > { %v116_v13 = vsel %vm101_vm0, %v115_v12, 0.0  ;;  %vm229_vm0 = vcmask 56368  }
  0xba   : > { %118 = vst [vmem:[%s496_s20] sm:$0xff] %v116_v13  ;;  %vm247_vm2 = vmand %vm229_vm0, %vm246_vm1 }
  0xc1   : > { %v375_v14 = vld [vmem:[%s496_s20 + $0x1] ss:$0 sm:$0xff] }
  0xc2   : > { %v124_v15 = vmul.f32 %v375_v14, %v375_v14  ;;  %v131_v16 = vmul.f32 %v375_v14, %v116_v13  ;;  %v386_v14 = vld [vmem:[%s500_s21 + $0x6] ss:$0 sm:$0xff] }
  0xc4   : > { %125 = vadd.xlane.f32.xlu1 %v124_v15 }
  0xc8   : > { %132 = vadd.xlane.f32.xlu1 %v131_v16 }
 0x151   : > { %v126_v18 = vpop.xlane.xlu1 %125 }
 0x152   : > { %v127_v19 = vsub.f32 %v376_v17, %v126_v18 }
 0x154   : > { %420 = vrsqrt.f32 %v127_v19 }
 0x155   : > { %v133_v20 = vpop.xlane.xlu1 %132 }
 0x156   : > { %v134_v21 = vsub.f32 %v504_v9, %v133_v20 }
 0x15e   : > { %v421_v22 = vpop.eup %420 }
 0x15f   : > { %v135_v23 = vmul.f32 %v421_v22, %v134_v21 }
 0x161   : > { %v138_v24 = vsel %vm137_vm3, %v135_v23, 0.0  ;;  %vm251_vm3 = vcmask 64568  }
 0x162   : > { %v139_v25 = vadd.f32 %v138_v24, %v116_v13  ;;  %vm269_vm5 = vmand %vm251_vm3, %vm268_vm4 }
 0x164   : > { %140 = vst [vmem:[%s496_s20] sm:$0xff] %v139_v25 }
 0x16b   : > { %v377_v26 = vld [vmem:[%s496_s20 + $0x2] ss:$0 sm:$0xff] }
 0x16c   : > { %v153_v27 = vmul.f32 %v377_v26, %v139_v25  ;;  %v146_v28 = vmul.f32 %v377_v26, %v377_v26  ;;  %v388_v26 = vld [vmem:[%s500_s21 + $0x7] ss:$0 sm:$0xff] }
 0x16e   : > { %154 = vadd.xlane.f32.xlu1 %v153_v27  ;;  %147 = vadd.xlane.f32.xlu0 %v146_v28 }
 0x1fb   : > { %v148_v30 = vpop.xlane.xlu0 %147  ;;  %v155_v32 = vpop.xlane.xlu1 %154 }
 0x1fc   : > { %v149_v31 = vsub.f32 %v378_v29, %v148_v30  ;;  %v156_v33 = vsub.f32 %v504_v9, %v155_v32 }
 0x1fe   : > { %422 = vrsqrt.f32 %v149_v31 }
 0x208   : > { %v423_v34 = vpop.eup %422 }
 0x209   : > { %v157_v35 = vmul.f32 %v423_v34, %v156_v33 }
 0x20b   : > { %v160_v36 = vsel %vm159_vm6, %v157_v35, 0.0 }
 0x20c   : > { %v161_v37 = vadd.f32 %v160_v36, %v139_v25 }
 0x20e   : > { %162 = vst [vmem:[%s496_s20] sm:$0xff] %v161_v37 }
 0x215   : > { %v379_v38 = vld [vmem:[%s496_s20 + $0x3] ss:$0 sm:$0xff] }
 0x216   : > { %v175_v39 = vmul.f32 %v379_v38, %v161_v37  ;;  %v168_v40 = vmul.f32 %v379_v38, %v379_v38 }
 0x218   : > { %176 = vadd.xlane.f32.xlu1 %v175_v39  ;;  %169 = vadd.xlane.f32.xlu0 %v168_v40 }
 0x2a5   : > { %v170_v42 = vpop.xlane.xlu0 %169  ;;  %v177_v44 = vpop.xlane.xlu1 %176 }
 0x2a6   : > { %v171_v43 = vsub.f32 %v380_v41, %v170_v42  ;;  %v178_v45 = vsub.f32 %v504_v9, %v177_v44 }
 0x2a8   : > { %424 = vrsqrt.f32 %v171_v43 }
 0x2b2   : > { %v425_v46 = vpop.eup %424 }
 0x2b3   : > { %v179_v47 = vmul.f32 %v425_v46, %v178_v45 }
 0x2b5   : > { %v182_v48 = vsel %vm181_vm9, %v179_v47, 0.0 }
 0x2b6   : > { %v183_v49 = vadd.f32 %v182_v48, %v161_v37 }
 0x2b8   : > { %184 = vst [vmem:[%s496_s20] sm:$0xff] %v183_v49 }
 0x2bf   : > { %v381_v50 = vld [vmem:[%s496_s20 + $0x4] ss:$0 sm:$0xff] }
 0x2c0   : > { %v197_v51 = vmul.f32 %v381_v50, %v183_v49  ;;  %v190_v52 = vmul.f32 %v381_v50, %v381_v50 }
 0x2c2   : > { %198 = vadd.xlane.f32.xlu1 %v197_v51  ;;  %191 = vadd.xlane.f32.xlu0 %v190_v52 }
 0x34f   : > { %v192_v54 = vpop.xlane.xlu0 %191  ;;  %v199_v56 = vpop.xlane.xlu1 %198 }
 0x350   : > { %v193_v55 = vsub.f32 %v382_v53, %v192_v54  ;;  %v200_v57 = vsub.f32 %v504_v9, %v199_v56 }
 0x352   : > { %426 = vrsqrt.f32 %v193_v55 }
 0x35c   : > { %v427_v58 = vpop.eup %426 }
 0x35d   : > { %v201_v59 = vmul.f32 %v427_v58, %v200_v57 }
 0x35f   : > { %v204_v60 = vsel %vm203_vm12, %v201_v59, 0.0 }
 0x360   : > { %v205_v61 = vadd.f32 %v204_v60, %v183_v49 }
 0x362   : > { %206 = vst [vmem:[%s496_s20] sm:$0xff] %v205_v61 }
 0x369   : > { %v383_v62 = vld [vmem:[%s496_s20 + $0x5] ss:$0 sm:$0xff] }
 0x36a   : > { %v219_v63 = vmul.f32 %v383_v62, %v205_v61  ;;  %v212_v0 = vmul.f32 %v383_v62, %v383_v62 }
 0x36c   : > { %220 = vadd.xlane.f32.xlu1 %v219_v63  ;;  %213 = vadd.xlane.f32.xlu0 %v212_v0 }
 0x3f9   : > { %v214_v2 = vpop.xlane.xlu0 %213  ;;  %v221_v4 = vpop.xlane.xlu1 %220 }
 0x3fa   : > { %v215_v3 = vsub.f32 %v384_v1, %v214_v2  ;;  %v222_v5 = vsub.f32 %v504_v9, %v221_v4 }
 0x3fc   : > { %428 = vrsqrt.f32 %v215_v3 }
 0x406   : > { %v429_v6 = vpop.eup %428 }
 0x407   : > { %v223_v7 = vmul.f32 %v429_v6, %v222_v5 }
 0x409   : > { %v226_v8 = vsel %vm225_vm15, %v223_v7, 0.0 }
 0x40a   : > { %v227_v10 = vadd.f32 %v226_v8, %v205_v61 }
 0x40c   : > { %228 = vst [vmem:[%s496_s20] sm:$0xff] %v227_v10 }
 0x413   : > { %v385_v11 = vld [vmem:[%s496_s20 + $0x6] ss:$0 sm:$0xff] }
 0x414   : > { %v241_v12 = vmul.f32 %v385_v11, %v227_v10  ;;  %v234_v13 = vmul.f32 %v385_v11, %v385_v11 }
 0x416   : > { %242 = vadd.xlane.f32.xlu1 %v241_v12  ;;  %235 = vadd.xlane.f32.xlu0 %v234_v13 }
 0x4a3   : > { %v236_v15 = vpop.xlane.xlu0 %235  ;;  %v243_v17 = vpop.xlane.xlu1 %242 }
 0x4a4   : > { %v237_v16 = vsub.f32 %v386_v14, %v236_v15  ;;  %v244_v18 = vsub.f32 %v504_v9, %v243_v17 }
 0x4a6   : > { %430 = vrsqrt.f32 %v237_v16 }
 0x4b0   : > { %v431_v19 = vpop.eup %430 }
 0x4b1   : > { %v245_v20 = vmul.f32 %v431_v19, %v244_v18 }
 0x4b3   : > { %v248_v21 = vsel %vm247_vm2, %v245_v20, 0.0 }
 0x4b4   : > { %v249_v22 = vadd.f32 %v248_v21, %v227_v10 }
 0x4b6   : > { %250 = vst [vmem:[%s496_s20] sm:$0xff] %v249_v22 }
 0x4bd   : > { %v387_v23 = vld [vmem:[%s496_s20 + $0x7] ss:$0 sm:$0xff] }
 0x4be   : > { %v263_v24 = vmul.f32 %v387_v23, %v249_v22  ;;  %v256_v25 = vmul.f32 %v387_v23, %v387_v23 }
 0x4c0   : > { %264 = vadd.xlane.f32.xlu1 %v263_v24  ;;  %257 = vadd.xlane.f32.xlu0 %v256_v25 }
 0x54d   : > { %v258_v27 = vpop.xlane.xlu0 %257  ;;  %v265_v29 = vpop.xlane.xlu1 %264 }
 0x54e   : > { %v259_v28 = vsub.f32 %v388_v26, %v258_v27  ;;  %v266_v30 = vsub.f32 %v504_v9, %v265_v29 }
 0x550   : > { %432 = vrsqrt.f32 %v259_v28 }
 0x55a   : > { %v433_v31 = vpop.eup %432 }
 0x55b   : > { %v267_v32 = vmul.f32 %v433_v31, %v266_v30 }
 0x55d   : > { %v270_v33 = vsel %vm269_vm5, %v267_v32, 0.0 }
 0x55e   : > { %v271_v34 = vadd.f32 %v270_v33, %v249_v22 }
 0x560   : > { %272 = vst [vmem:[%s496_s20] sm:$0xff] %v271_v34  ;;  %309 = vst [vmem:[%s280_s25] sm:$0xff] %v271_v34 }
 0x561 PF: > { %s7_s8 = sadd.s32 1, %s456_s8   ;;  %s551_s6 = smov %s452_s7 }
 0x562   : > { %p4_p5 = scmp.ge.s32.totalorder %s7_s8, 6   ;;  %s552_s7 = smov %s554_s10 }
 0x564   :  { %6 = sbr.rel (!%p4_p5) target bundleno = 2 (0x2), region = 132 }

// kernel: custom-call.13
= control target key start
LH: loop header
LB: loop body
LE: loop exit
PB: predicated region body
PF: predicated region fallthrough
CT: control target
= control target key end

     0   :  { %5 = vsyncpa [#allocation4], 0  ;;  %s885_s0 = inlined_call_operand.vmem [shape: f32[4,8,8], index: 0, kind: input, shape index: {}]   ;;  %s886_s1 = inlined_call_operand.vmem [shape: f32[4,8,8], index: 1, kind: output, shape index: {0}]   ;;  %s887_s2 = inlined_call_operand.hbm [shape: s32[4,8], index: 2, kind: output, shape index: {1}]   ;;  %s888_s3 = inlined_call_operand.vmem [shape: s32[4,8], index: 3, kind: output, shape index: {2}]  }
   0x1   :  { %7 = vsyncpa [#allocation4 + $0x1], 0  ;;  %s707_s12 = smov 0   ;;  %s709_s13 = smov 0  }
   0x2   :  { %s711_s14 = smov 0   ;;  %s713_s15 = smov 0  }
   0x3 LB: > { %s728_s16 = sadd.s32 4294967295, %s679_s15   ;;  %s542_s17 = sadd.s32 4294967294, %s679_s15   ;;  %s679_s15 = sphi %s713_s15, %s896_s15   ;;  %s675_s14 = sphi %s711_s14, %s895_s14   ;;  %s671_s13 = sphi %s709_s13, %s894_s13   ;;  %s667_s12 = sphi %s707_s12, %s893_s12  }
   0x4   : > { %s732_s18 = sadd.s32 1, %s679_s15   ;;  %s17_s19 = sshrl.u32 %s679_s15, 3 }
   0x5   : > { %s18_s20 = sshrl.u32 %s732_s18, 3  ;;  %s22_s21 = sadd.s32 1, %s675_s14 }
   0x6   : > { %s19_s22 = ssub.s32 %s17_s19, %s18_s20  ;;  %p32_p0 = scmp.ne.s32.totalorder %s675_s14, %s671_s13 }
   0x7   : > { %p20_p1 = scmp.eq.s32.totalorder %s19_s22, 0  ;;  %p33_p2 = scmp.eq.s32.totalorder %s728_s16, 3 }
   0x8   : > { %p38_p3 = scmp.ne.s32.totalorder %s671_s13, %s667_s12  ;;  %p39_p4 = scmp.eq.s32.totalorder %s542_s17, 3 }
   0x9   : > { %s743_s23 = scalar_select %p20_p1, %s675_s14, %s22_s21  }
   0xa   : > { %p745_p5 = por %p33_p2, %p32_p0  ;;  %p749_p6 = por %p39_p4, %p38_p3 }
   0xb   : > { %p544_p7 = scmp.ge.s32.totalorder %s679_s15, 4 }
   0xc   : > { %s85_s26 = sand.u32 (!%p544_p7), 1, %s679_s15   ;;  %s546_s27 = sshll.u32 (!%p544_p7), %s679_s15, 3 }
   0xd   : > { %83 = sbr.rel (%p544_p7) target bundleno = 20 (0x14), region = 16  ;;  %s545_s28 = sshll.u32 (!%p544_p7), %s85_s26, 3 }
   0xe   : > { %s89_s4 = scalar_lea.vmem (!%p544_p7), %s885_s0, %s546_s27  ;;  %s87_s5 = scalar_lea.vmem (!%p544_p7), [#allocation0], %s545_s28 }
   0xf   : > { %v117_v0 = vld [vmem:[%s89_s4] sm:$0xff] (!%p544_p7) }
  0x10   : > { %118 = vst [vmem:[%s87_s5] sm:$0xff] (!%p544_p7), %v117_v0 }
  0x14 PF: > { %p547_p8 = scmp.ge.s32.totalorder %s679_s15, 1  ;;  %p123_p9 = scmp.lt.s32.totalorder %s679_s15, 5 }
  0x16   : > { %p124_p10 = pnand %p547_p8, %p123_p9 }
  0x18   : > { %127 = sbr.rel (%p124_p10) target bundleno = 441 (0x1b9), region = 54 }
  0x1f   : > { %s130_s6 = sand.u32 1, %s728_s16   ;;  %s145_s7 = sand.u32 1, %s671_s13   ;;  %v163_v1 = vlaneseq  ;;  %v685_v4 = vmov 0  }
  0x20   : > { %s548_s8 = sshll.u32 %s130_s6, 3  ;;  %s765_s9 = sshll.u32 %s145_s7, 2 }
  0x21   : > { %v768_v2 = vshrl.u32 %v163_v1, 7  ;;  %s132_s10 = scalar_lea.vmem [#allocation0], %s548_s8  ;;  %s770_s11 = scalar_lea.vmem [#allocation1], %s548_s8 }
  0x22   : > { %v156_v3 = vld [vmem:[%s132_s10] sm:$0xff]  ;;  %s158_s17 = sand.u32 7, %s728_s16   ;;  %s147_s20 = scalar_lea.vmem [#allocation3], %s765_s9 }
  0x23   : > { %157 = vst [vmem:[%s770_s11] sm:$0xff] %v156_v3  ;;  %167 = vst [vmem:[#allocation7] sm:$0xff] %v768_v2  ;;  %s775_s19 = scalar_lea.vmem [#allocation2], %s158_s17  ;;  %s153_s21 = scalar_lea.vmem [#allocation6], %s765_s9 }
  0x24   : > { %162 = vst [vmem:[%s775_s19] sm:$0x1] %v685_v4  ;;  %s780_s22 = scalar_lea.vmem [#allocation5], %s158_s17  ;;  %s782_s26 = smov 0  }
  0x25 LB: >> { %v789_v7 = vstv %s683_s26  ;;  %s224_s27 = ssub.s32 128, %s683_s26  ;;  %v230_v37 = vand.u32 127, %v163_v1  ;;  %s236_s28 = scalar_lea.vmem %s770_s11, %s683_s26 [#allocation1]  ;;  %s683_s26 = sphi %s782_s26, %s173_s26  }
  0x26   : >> { %vm182_vm0 = vcmp.ge.s32.totalorder %v768_v2, %v789_v7  ;;  %s242_s30 = scalar_lea.vmem [#allocation7], %s683_s26  ;;  %vm262_vm13 = vcmp.gt.s32.totalorder %v768_v2, %v789_v7  ;;  %s173_s26 = sadd.s32 1, %s683_s26  }
  0x27   : >> { %vm254_vm10 = vcmp.gt.s32.totalorder %v230_v37, %v789_v7  ;;  %vm231_vm11 = vcmp.eq.s32.totalorder %v230_v37, %v789_v7  ;;  %p170_p11 = scmp.ge.s32.totalorder %s173_s26, 8  }
  0x28   : >> { %vm266_vm15 = vmand %vm262_vm13, %vm231_vm11  ;;  %s889_s6 = sshrl.u32 (%p170_p11), %s728_s16, 3  ;;  %s556_s8 = sshll.u32 (%p170_p11), %s728_s16, 3 }
  0x29   : > { %s557_s10 = sshll.u32 (%p170_p11), %s889_s6, 6  ;;  %s686_s6 = smov (%p170_p11), [#allocation3]  }
  0x2a   : >> { %v178_v5 = vld [vmem:[%s770_s11] sm:$0xff]  ;;  %v238_v40 = vld [vmem:[%s236_s28] ss:$0 sm:$0xff]  ;;  %s617_s17 = sshll.u32 (%p170_p11), %s686_s6, 4  ;;  %s618_s17 = int_to_ptr.vmem [resolvable:$false] %s617_s17 }
  0x2b   : >> { %v179_v6 = vand.u32 2147483647, %v178_v5  ;;  %v233_v39 = vld [vmem:[%s775_s19] ss:$0 sm:$0xff] }
  0x2c   : >> { %v244_v41 = vld [vmem:[%s242_s30] ss:$0 sm:$0xff] }
  0x2d   : >> { %vm552_vm1 = vcmp.gt.f32.partialorder %v179_v6, -inf }
  0x2e   : >> { %vm186_vm2 = vmand %vm182_vm0, %vm552_vm1 }
  0x2f   : >> { %v187_v8 = vsel %vm186_vm2, %v768_v2, %v789_v7  ;;  %v188_v9 = vsel %vm186_vm2, %v179_v6, -inf }
  0x30   : >> { %v189_v10 = vrot.slane %v188_v9, 1  ;;  %v190_v11 = vrot.slane %v187_v8, 1 }
  0x32   : >> { %vm191_vm3 = vcmp.ge.f32.partialorder %v189_v10, %v188_v9  ;;  %v194_v12 = vrot.slane %v189_v10, 1  ;;  %v195_v13 = vrot.slane %v190_v11, 1 }
  0x33   : >> { %v192_v14 = vsel %vm191_vm3, %v189_v10, %v188_v9  ;;  %v193_v15 = vsel %vm191_vm3, %v190_v11, %v187_v8 }
  0x34   : >> { %vm196_vm4 = vcmp.ge.f32.partialorder %v194_v12, %v192_v14  ;;  %v199_v16 = vrot.slane %v194_v12, 1  ;;  %v200_v17 = vrot.slane %v195_v13, 1 }
  0x35   : >> { %v197_v18 = vsel %vm196_vm4, %v194_v12, %v192_v14  ;;  %v198_v19 = vsel %vm196_vm4, %v195_v13, %v193_v15 }
  0x36   : >> { %vm201_vm5 = vcmp.ge.f32.partialorder %v199_v16, %v197_v18  ;;  %v204_v20 = vrot.slane %v199_v16, 1  ;;  %v205_v21 = vrot.slane %v200_v17, 1 }
  0x37   : >> { %v202_v22 = vsel %vm201_vm5, %v199_v16, %v197_v18  ;;  %v203_v23 = vsel %vm201_vm5, %v200_v17, %v198_v19 }
  0x38   : >> { %vm206_vm6 = vcmp.ge.f32.partialorder %v204_v20, %v202_v22  ;;  %v209_v24 = vrot.slane %v204_v20, 1  ;;  %v210_v25 = vrot.slane %v205_v21, 1 }
  0x39   : >> { %v207_v26 = vsel %vm206_vm6, %v204_v20, %v202_v22  ;;  %v208_v27 = vsel %vm206_vm6, %v205_v21, %v203_v23 }
  0x3a   : >> { %vm211_vm7 = vcmp.ge.f32.partialorder %v209_v24, %v207_v26  ;;  %v214_v28 = vrot.slane %v209_v24, 1  ;;  %v215_v29 = vrot.slane %v210_v25, 1 }
  0x3b   : >> { %v212_v30 = vsel %vm211_vm7, %v209_v24, %v207_v26  ;;  %v213_v31 = vsel %vm211_vm7, %v210_v25, %v208_v27 }
  0x3c   : >> { %vm216_vm8 = vcmp.ge.f32.partialorder %v214_v28, %v212_v30  ;;  %v219_v32 = vrot.slane %v214_v28, 1  ;;  %v220_v33 = vrot.slane %v215_v29, 1 }
  0x3d   : >> { %v217_v34 = vsel %vm216_vm8, %v214_v28, %v212_v30  ;;  %v218_v35 = vsel %vm216_vm8, %v215_v29, %v213_v31 }
  0x3e   : >> { %vm221_vm9 = vcmp.ge.f32.partialorder %v219_v32, %v217_v34 }
  0x3f   : >> { %v223_v36 = vsel %vm221_vm9, %v220_v33, %v218_v35 }
  0x40   : >> { %225 = vrot.lane.b32.xlu0 %v223_v36, %s224_s27 }
  0xb2   : >> { %v226_v38 = vpop.permute.xlu0 %225 }
  0xb3   : >> { %561 = vpush %v226_v38 }
  0xe4   : >> { %s562_s29 = spop %561 }
  0xe5   : >> { %v232_v42 = vstv %s562_s29  ;;  %s237_s4 = scalar_lea.vmem %s770_s11, %s562_s29 [#allocation1]  ;;  %s243_s5 = scalar_lea.vmem [#allocation7], %s562_s29 }
  0xe6   : >> { %v239_v43 = vld [vmem:[%s237_s4] ss:$0 sm:$0xff]  ;;  %v234_v45 = vsel %vm231_vm11, %v232_v42, %v233_v39  ;;  %s833_s29 = scalar_lea.hbm (%p170_p11), %s887_s2, %s557_s10 }
  0xe7   : >> { %v245_v44 = vld [vmem:[%s243_s5] ss:$0 sm:$0xff]  ;;  %240 = vst [vmem:[%s237_s4] sm:$0x1] %v238_v40  ;;  %vm248_vm12 = vcmp.ne.f32.partialorder %v239_v43, 0.0  ;;  %235 = vst [vmem:[%s775_s19] sm:$0x1] %v234_v45  ;;  %v255_v52 = vsel %vm254_vm10, %v239_v43, 0.0  ;;  %s348_s19 = scalar_lea.vmem (%p170_p11), %s886_s1, %s556_s8 }
  0xe8   : >> { %246 = vst [vmem:[%s243_s5] sm:$0x1] %v244_v41  ;;  %241 = vst [vmem:[%s236_s28] sm:$0x1] %v239_v43  ;;  %s339_s4 = scalar_lea.sflag (%p170_p11), [#allocation4], %s145_s7 }
  0xe9   : >> { %247 = vst [vmem:[%s242_s30] sm:$0x1] %v245_v44  ;;  %vm249_vm14 = vmand %vm231_vm11, %vm248_vm12  ;;  %s391_s30 = sshll.u32 (%p170_p11), %s147_s20, 4  ;;  %s392_s30 = int_to_ptr.vmem [resolvable:$true] %s391_s30 }
  0xea   : >> { %v250_v46 = vsel %vm249_vm14, %v239_v43, 1.0  ;;  %s613_s5 = scalar_lea.vmem (%p170_p11), %s392_s30, 64  ;;  %p620_p1 = scmp.lt.s32.totalorder (%p170_p11), %s392_s30, %s618_s17 }
  0xeb   : >> { %v263_v47 = vsel %vm262_vm13, %v250_v46, 1.0  ;;  %p614_p12 = scmp.ne.s32.totalorder (%p170_p11), %s392_s30, %s613_s5 }
  0xec   : >> { %611 = vrcp.f32 %v263_v47 }
  0xed   : > { %p615_p13 = pnand (%p170_p11), %p614_p12, %p745_p5 }
  0xee   : > { %v325_v57 = vld [vmem:[#allocation2] sm:$0xf] (%p170_p11) }
  0xef   : >> { %v259_v49 = vld [vmem:[%s770_s11] sm:$0xff]  ;;  %327 = vst [vmem:[%s147_s20] sm:$0xf] (%p170_p11), %v325_v57  ;;  %p616_p0 = pneg (%p170_p11), %p615_p13 }
  0xf0   : > { %v273_v56 = vld [vmem:[#allocation7] sm:$0xff] (%p170_p11) }
  0xf6   : >> { %v612_v48 = vpop.eup %611 }
  0xf7   : >> { %v265_v50 = vmul.f32 %v612_v48, %v259_v49 }
  0xf9   : >> { %v267_v51 = vsel %vm266_vm15, %v265_v50, 0.0 }
  0xfa   : >> { %268 = vadd.xlane.f32.xlu0 %v267_v51 }
 0x127   : > { %289 = vxpose.xlu0.b32.start.end [1/1] (short) (narrow) (%p170_p11), %v273_v56, 8 }
 0x186   : > { %172 = sbr.rel (!%p170_p11) target bundleno = 37 (0x25), region = 210 }
 0x187   : >> { %v269_v53 = vpop.xlane.xlu0 %268 }
 0x188   : >> { %v270_v54 = vmul.f32 %v269_v53, %v255_v52 }
 0x18a   : >> { %v271_v55 = vsub.f32 %v265_v50, %v270_v54 }
 0x18c   : >> { %272 = vst [vmem:[%s770_s11] sm:$0xff] %v271_v55 }
 0x193   : > { %v376_v58 = vld [vmem:[%s770_s11] sm:$0xff]  ;;  %s619_s11 = scalar_lea.vmem %s618_s17, 128 }
 0x194   : > { %377 = vst [vmem:[%s348_s19] sm:$0xff] %v376_v58  ;;  %p621_p2 = scmp.lt.s32.totalorder %s619_s11, %s613_s5 }
 0x196   : > { %p622_p3 = por %p621_p2, %p620_p1 }
 0x198   : > { %p623_p4 = pnand %p622_p3, %p616_p0 }
 0x19a   : > { %626 = shalt.err (!%p623_p4)
}
 0x19b   : > { %s627_s7 = scalar_lea.hbm %s833_s29, 64  ;;  %s631_s6 = scalar_lea.hbm %s887_s2, 64 }
 0x19c   : > { %p628_p7 = scmp.ne.s32.totalorder %s833_s29, %s627_s7  ;;  %p632_p10 = scmp.lt.u32.totalorder %s833_s29, %s887_s2 }
 0x19d   : > { %p633_p11 = scmp.lt.u32.totalorder %s631_s6, %s627_s7  ;;  %p635_p13 = scmp.lt.u32.totalorder %s627_s7, %s833_s29 }
 0x19e   : > { %p629_p8 = pnand %p628_p7, %p745_p5 }
 0x19f   : > { %p634_p12 = por %p633_p11, %p632_p10 }
 0x1a0   : > { %p630_p9 = pneg %p629_p8 }
 0x1a1   : > { %p636_p0 = por %p635_p13, %p634_p12 }
 0x1a3   : > { %p637_p1 = pnand %p636_p0, %p630_p9 }
 0x1a5   : > { %640 = shalt.err (!%p637_p1)
}
 0x1a6   : > { %563 = dma.vmem_to_hbm [thread:$0]  (%p745_p5), %s392_s30, 64, %s833_s29, %s339_s4  }
 0x1a7   : > { %v305_v59 = vpop.trf.xlu0  ;;  %s892_s19 = sshrl.u32 (%p745_p5), %s728_s16, 3 }
 0x1a8   : > { %321 = vst [vmem:[%s780_s22] sm:$0x1] %v305_v59  ;;  %s558_s27 = sshll.u32 (%p745_p5), %s892_s19, 2 }
 0x1a9   : > { %s400_s17 = scalar_lea.vmem (%p745_p5), %s888_s3, %s558_s27 }
 0x1aa   : > { %397 = sbr.rel (!%p745_p5) target bundleno = 441 (0x1b9), region = 104 }
 0x1af   : > { %v331_v60 = vld [vmem:[#allocation5] sm:$0xf] }
 0x1b0   : > { %333 = vst [vmem:[%s153_s21] sm:$0xf] %v331_v60 }
 0x1b7   : > { %v416_v61 = vld [vmem:[%s153_s21] sm:$0xf] }
 0x1b8   : > { %417 = vst [vmem:[%s400_s17] sm:$0xf] %v416_v61 }
 0x1b9 PF: > { %p569_p2 = scmp.ge.s32.totalorder %s679_s15, 2  ;;  %s444_s22 = sand.u32 1, %s667_s12  }
 0x1ba   : > { %s445_s24 = scalar_lea.sflag [#allocation4], %s444_s22 }
 0x1bb   : > { %p566_p5 = pnand %p569_p2, %p749_p6 }
 0x1bd   : > { %662 = dma.done.wait (!%p566_p5), %s445_s24, 64  }
 0x1be   : > { %664 = vsyncadd (!%p566_p5), %s445_s24, 4294967232  ;;  %p10_p3 = scmp.ge.s32.totalorder %s732_s18, 6   ;;  %s893_s12 = smov %s671_s13 }
 0x1bf   : > { %s894_s13 = smov %s675_s14  ;;  %s895_s14 = smov %s743_s23 }
 0x1c0   : > { %s896_s15 = smov %s732_s18  ;;  %12 = sbr.rel (!%p10_p3) target bundleno = 3 (0x3), region = 221 }
 0x1c7   :  { %457 = vsyncpa [#allocation4], 1 }
 0x1c8   :  { %459 = vsyncpa [#allocation4 + $0x1], 1 }

// kernel: custom-call.15
= control target key start
LH: loop header
LB: loop body
LE: loop exit
PB: predicated region body
PF: predicated region fallthrough
CT: control target
= control target key end

     0   :  { %s385_s6 = smov 0   ;;  %s387_s7 = smov 0   ;;  %s443_s0 = inlined_call_operand.vmem [shape: f32[4,1,8,8], index: 0, kind: input, shape index: {}]   ;;  %s444_s1 = inlined_call_operand.vmem [shape: f32[4,1,8,8], index: 1, kind: output, shape index: {}]  }
   0x1   :  { %s389_s8 = smov 0  }
   0x2 LB: > { %s311_s9 = sadd.s32 4294967295, %s372_s8   ;;  %s33_s10 = sadd.s32 1, %s368_s7  ;;  %s372_s8 = sphi %s389_s8, %s7_s8   ;;  %s368_s7 = sphi %s387_s7, %s446_s7   ;;  %s364_s6 = sphi %s385_s6, %s445_s6  }
   0x3   : > { %p35_p0 = scmp.ge.s32.totalorder %s33_s10, 4  ;;  %p313_p1 = scmp.ge.s32.totalorder %s372_s8, 4 }
   0x4   : > { %s49_s11 = sand.u32 (!%p313_p1), 1, %s372_s8   ;;  %s315_s12 = sshll.u32 (!%p313_p1), %s368_s7, 3 }
   0x5   : > { %s448_s10 = smov (%p35_p0, %s33_s10), 0  ;;  %47 = sbr.rel (%p313_p1) target bundleno = 12 (0xc), region = 16 }
   0x6   : > { %s314_s13 = sshll.u32 (!%p313_p1), %s49_s11, 3  ;;  %s56_s16 = scalar_lea.vmem (!%p313_p1), %s443_s0, %s315_s12 }
   0x7   : > { %v84_v0 = vld [vmem:[%s56_s16] sm:$0xff] (!%p313_p1)  ;;  %s51_s17 = scalar_lea.vmem (!%p313_p1), [#allocation0], %s314_s13 }
   0x8   : > { %85 = vst [vmem:[%s51_s17] sm:$0xff] (!%p313_p1), %v84_v0 }
   0xc PF: > { %p316_p2 = scmp.ge.s32.totalorder %s372_s8, 1  ;;  %p90_p3 = scmp.lt.s32.totalorder %s372_s8, 5 }
   0xe   : > { %p91_p4 = pnand %p316_p2, %p90_p3 }
  0x10   : > { %94 = sbr.rel (%p91_p4) target bundleno = 1213 (0x4bd), region = 54 }
  0x17   : > { %s97_s18 = sand.u32 1, %s311_s9   ;;  %v108_v1 = vlaneseq  ;;  %v374_v10 = vmov -1.0   ;;  %s320_s21 = sshll.u32 %s364_s6, 3 }
  0x18   : > { %s317_s19 = sshll.u32 %s97_s18, 3  ;;  %s219_s24 = scalar_lea.vmem %s444_s1, %s320_s21 }
  0x19   : > { %v412_v2 = vand.u32 127, %v108_v1  ;;  %v112_v3 = vshrl.u32 %v108_v1, 7  ;;  %s99_s20 = scalar_lea.vmem [#allocation0], %s317_s19 }
  0x1a   : > { %v115_v4 = vld [vmem:[%s99_s20] sm:$0xff] }
  0x1b   : > { %vm110_vm0 = vcmp.lt.s32.totalorder %v412_v2, 8  ;;  %vm114_vm1 = vcmp.eq.s32.totalorder %v112_v3, %v412_v2  ;;  %vm119_vm2 = vcmp.ge.s32.totalorder %v112_v3, %v412_v2  ;;  %vm133_vm4 = vcmp.eq.s32.totalorder %v412_v2, 0 }
  0x1c   : > { %v116_v5 = vsel %vm114_vm1, %v115_v4, 0.0  ;;  %vm120_vm3 = vmand %vm119_vm2, %vm110_vm0  ;;  %vm130_vm5 = vcmp.eq.s32.totalorder %v412_v2, %v112_v3  ;;  %v134_v11 = vsel %vm133_vm4, 1.0, %v374_v10  ;;  %vm141_vm6 = vcmp.eq.s32.totalorder %v412_v2, 1 }
  0x1d   : > { %v121_v6 = vsel %vm120_vm3, %v115_v4, 0.0  ;;  %117 = vadd.xlane.f32.xlu0 %v116_v5  ;;  %v135_v12 = vsel %vm130_vm5, %v134_v11, 0.0  ;;  %vm151_vm7 = vcmp.eq.s32.totalorder %v412_v2, 2  ;;  %vm161_vm8 = vcmp.eq.s32.totalorder %v412_v2, 3 }
  0x1e   : > { %vm171_vm9 = vcmp.eq.s32.totalorder %v412_v2, 4  ;;  %vm181_vm10 = vcmp.eq.s32.totalorder %v412_v2, 5  ;;  %vm191_vm11 = vcmp.eq.s32.totalorder %v412_v2, 6  ;;  %vm201_vm12 = vcmp.eq.s32.totalorder %v412_v2, 7 }
  0xaa   : > { %v417_v7 = vpop.xlane.xlu0 %117 }
  0xab   : > { %348 = vrcp.f32 %v417_v7  ;;  %vm208_vm13 = vweird.f32 %v417_v7 }
  0xb5   : > { %v349_v8 = vpop.eup %348 }
  0xb6   : > { %v123_v9 = vmul.f32 %v349_v8, %v121_v6 }
  0xb8   : > { %124 = vst [vmem:[#allocation2] sm:$0xff] %v123_v9 }
  0xbf   : > { %v137_v13 = vld [vmem:[#allocation2 + $0x1] ss:$0 sm:$0xff]  ;;  %v147_v16 = vld [vmem:[#allocation2 + $0x2] ss:$0 sm:$0xff]  ;;  %v157_v21 = vld [vmem:[#allocation2 + $0x3] ss:$0 sm:$0xff] }
  0xc0   : > { %v138_v14 = vxor.u32 2147483648, %v137_v13  ;;  %v148_v18 = vxor.u32 2147483648, %v147_v16  ;;  %v158_v23 = vxor.u32 2147483648, %v157_v21  ;;  %v167_v26 = vld [vmem:[#allocation2 + $0x4] ss:$0 sm:$0xff] }
  0xc1   : > { %v168_v28 = vxor.u32 2147483648, %v167_v26  ;;  %v177_v31 = vld [vmem:[#allocation2 + $0x5] ss:$0 sm:$0xff]  ;;  %v187_v36 = vld [vmem:[#allocation2 + $0x6] ss:$0 sm:$0xff] }
  0xc2   : > { %v142_v15 = vmul.f32 %v138_v14, %v135_v12  ;;  %v178_v33 = vxor.u32 2147483648, %v177_v31  ;;  %v188_v38 = vxor.u32 2147483648, %v187_v36  ;;  %v197_v41 = vld [vmem:[#allocation2 + $0x7] ss:$0 sm:$0xff] }
  0xc3   : > { %v198_v43 = vxor.u32 2147483648, %v197_v41 }
  0xc4   : > { %143 = vadd.xlane.f32.xlu0 %v142_v15 }
 0x151   : > { %v144_v17 = vpop.xlane.xlu0 %143 }
 0x152   : > { %v145_v19 = vsel %vm141_vm6, %v144_v17, %v135_v12 }
 0x153   : > { %v152_v20 = vmul.f32 %v148_v18, %v145_v19 }
 0x155   : > { %153 = vadd.xlane.f32.xlu1 %v152_v20 }
 0x1e2   : > { %v154_v22 = vpop.xlane.xlu1 %153 }
 0x1e3   : > { %v155_v24 = vsel %vm151_vm7, %v154_v22, %v145_v19 }
 0x1e4   : > { %v162_v25 = vmul.f32 %v158_v23, %v155_v24 }
 0x1e6   : > { %163 = vadd.xlane.f32.xlu1 %v162_v25 }
 0x273   : > { %v164_v27 = vpop.xlane.xlu1 %163 }
 0x274   : > { %v165_v29 = vsel %vm161_vm8, %v164_v27, %v155_v24 }
 0x275   : > { %v172_v30 = vmul.f32 %v168_v28, %v165_v29 }
 0x277   : > { %173 = vadd.xlane.f32.xlu0 %v172_v30 }
 0x304   : > { %v174_v32 = vpop.xlane.xlu0 %173 }
 0x305   : > { %v175_v34 = vsel %vm171_vm9, %v174_v32, %v165_v29 }
 0x306   : > { %v182_v35 = vmul.f32 %v178_v33, %v175_v34 }
 0x308   : > { %183 = vadd.xlane.f32.xlu1 %v182_v35 }
 0x395   : > { %v184_v37 = vpop.xlane.xlu1 %183 }
 0x396   : > { %v185_v39 = vsel %vm181_vm10, %v184_v37, %v175_v34 }
 0x397   : > { %v192_v40 = vmul.f32 %v188_v38, %v185_v39 }
 0x399   : > { %193 = vadd.xlane.f32.xlu0 %v192_v40 }
 0x426   : > { %v194_v42 = vpop.xlane.xlu0 %193 }
 0x427   : > { %v195_v44 = vsel %vm191_vm11, %v194_v42, %v185_v39 }
 0x428   : > { %v202_v45 = vmul.f32 %v198_v43, %v195_v44 }
 0x42a   : > { %203 = vadd.xlane.f32.xlu1 %v202_v45 }
 0x4b7   : > { %v204_v46 = vpop.xlane.xlu1 %203 }
 0x4b8   : > { %v205_v47 = vsel %vm201_vm12, %v204_v46, %v195_v44 }
 0x4b9   : > { %v207_v48 = vmul.f32 %v349_v8, %v205_v47 }
 0x4bb   : > { %v209_v49 = vsel %vm208_vm13, %v205_v47, %v207_v48 }
 0x4bc   : > { %248 = vst [vmem:[%s219_s24] sm:$0xff] %v209_v49 }
 0x4bd PF: > { %s7_s8 = sadd.s32 1, %s372_s8   ;;  %s445_s6 = smov %s368_s7 }
 0x4be   : > { %p4_p5 = scmp.ge.s32.totalorder %s7_s8, 6   ;;  %s446_s7 = smov %s448_s10 }
 0x4c0   :  { %6 = sbr.rel (!%p4_p5) target bundleno = 2 (0x2), region = 125 }

// kernel: custom-call.14
= control target key start
LH: loop header
LB: loop body
LE: loop exit
PB: predicated region body
PF: predicated region fallthrough
CT: control target
= control target key end

     0   :  { %s384_s6 = smov 0   ;;  %s386_s7 = smov 0   ;;  %s442_s0 = inlined_call_operand.vmem [shape: f32[4,1,8,8], index: 0, kind: input, shape index: {}]   ;;  %s443_s1 = inlined_call_operand.vmem [shape: f32[4,1,8,8], index: 1, kind: output, shape index: {}]  }
   0x1   :  { %s388_s8 = smov 0  }
   0x2 LB: > { %s310_s9 = sadd.s32 4294967295, %s371_s8   ;;  %s33_s10 = sadd.s32 1, %s367_s7  ;;  %s371_s8 = sphi %s388_s8, %s7_s8   ;;  %s367_s7 = sphi %s386_s7, %s445_s7   ;;  %s363_s6 = sphi %s384_s6, %s444_s6  }
   0x3   : > { %p35_p0 = scmp.ge.s32.totalorder %s33_s10, 4  ;;  %p312_p1 = scmp.ge.s32.totalorder %s371_s8, 4 }
   0x4   : > { %s49_s11 = sand.u32 (!%p312_p1), 1, %s371_s8   ;;  %s314_s12 = sshll.u32 (!%p312_p1), %s367_s7, 3 }
   0x5   : > { %s447_s10 = smov (%p35_p0, %s33_s10), 0  ;;  %47 = sbr.rel (%p312_p1) target bundleno = 12 (0xc), region = 16 }
   0x6   : > { %s313_s13 = sshll.u32 (!%p312_p1), %s49_s11, 3  ;;  %s56_s16 = scalar_lea.vmem (!%p312_p1), %s442_s0, %s314_s12 }
   0x7   : > { %v84_v0 = vld [vmem:[%s56_s16] sm:$0xff] (!%p312_p1)  ;;  %s51_s17 = scalar_lea.vmem (!%p312_p1), [#allocation0], %s313_s13 }
   0x8   : > { %85 = vst [vmem:[%s51_s17] sm:$0xff] (!%p312_p1), %v84_v0 }
   0xc PF: > { %p315_p2 = scmp.ge.s32.totalorder %s371_s8, 1  ;;  %p90_p3 = scmp.lt.s32.totalorder %s371_s8, 5 }
   0xe   : > { %p91_p4 = pnand %p315_p2, %p90_p3 }
  0x10   : > { %94 = sbr.rel (%p91_p4) target bundleno = 1213 (0x4bd), region = 54 }
  0x17   : > { %s97_s18 = sand.u32 1, %s310_s9   ;;  %v108_v1 = vlaneseq  ;;  %v373_v10 = vmov -1.0   ;;  %s319_s21 = sshll.u32 %s363_s6, 3 }
  0x18   : > { %s316_s19 = sshll.u32 %s97_s18, 3  ;;  %s218_s24 = scalar_lea.vmem %s443_s1, %s319_s21 }
  0x19   : > { %v411_v2 = vand.u32 127, %v108_v1  ;;  %v112_v3 = vshrl.u32 %v108_v1, 7  ;;  %s99_s20 = scalar_lea.vmem [#allocation0], %s316_s19 }
  0x1a   : > { %v115_v4 = vld [vmem:[%s99_s20] sm:$0xff] }
  0x1b   : > { %vm110_vm0 = vcmp.lt.s32.totalorder %v411_v2, 8  ;;  %vm114_vm1 = vcmp.eq.s32.totalorder %v112_v3, %v411_v2  ;;  %vm119_vm2 = vcmp.le.s32.totalorder %v112_v3, %v411_v2  ;;  %vm133_vm4 = vcmp.eq.s32.totalorder %v411_v2, 7 }
  0x1c   : > { %v116_v5 = vsel %vm114_vm1, %v115_v4, 0.0  ;;  %vm120_vm3 = vmand %vm119_vm2, %vm110_vm0  ;;  %vm130_vm5 = vcmp.eq.s32.totalorder %v411_v2, %v112_v3  ;;  %v134_v11 = vsel %vm133_vm4, 1.0, %v373_v10  ;;  %vm141_vm6 = vcmp.eq.s32.totalorder %v411_v2, 6 }
  0x1d   : > { %v121_v6 = vsel %vm120_vm3, %v115_v4, 0.0  ;;  %117 = vadd.xlane.f32.xlu0 %v116_v5  ;;  %v135_v12 = vsel %vm130_vm5, %v134_v11, 0.0  ;;  %vm151_vm7 = vcmp.eq.s32.totalorder %v411_v2, 5  ;;  %vm161_vm8 = vcmp.eq.s32.totalorder %v411_v2, 4 }
  0x1e   : > { %vm171_vm9 = vcmp.eq.s32.totalorder %v411_v2, 3  ;;  %vm181_vm10 = vcmp.eq.s32.totalorder %v411_v2, 2  ;;  %vm191_vm11 = vcmp.eq.s32.totalorder %v411_v2, 1  ;;  %vm200_vm12 = vcmp.eq.s32.totalorder %v411_v2, 0 }
  0xaa   : > { %v416_v7 = vpop.xlane.xlu0 %117 }
  0xab   : > { %347 = vrcp.f32 %v416_v7  ;;  %vm207_vm13 = vweird.f32 %v416_v7 }
  0xb5   : > { %v348_v8 = vpop.eup %347 }
  0xb6   : > { %v123_v9 = vmul.f32 %v348_v8, %v121_v6 }
  0xb8   : > { %124 = vst [vmem:[#allocation2] sm:$0xff] %v123_v9 }
  0xbf   : > { %v137_v13 = vld [vmem:[#allocation2 + $0x6] ss:$0 sm:$0xff]  ;;  %v147_v16 = vld [vmem:[#allocation2 + $0x5] ss:$0 sm:$0xff]  ;;  %v157_v21 = vld [vmem:[#allocation2 + $0x4] ss:$0 sm:$0xff] }
  0xc0   : > { %v138_v14 = vxor.u32 2147483648, %v137_v13  ;;  %v148_v18 = vxor.u32 2147483648, %v147_v16  ;;  %v158_v23 = vxor.u32 2147483648, %v157_v21  ;;  %v167_v26 = vld [vmem:[#allocation2 + $0x3] ss:$0 sm:$0xff] }
  0xc1   : > { %v168_v28 = vxor.u32 2147483648, %v167_v26  ;;  %v177_v31 = vld [vmem:[#allocation2 + $0x2] ss:$0 sm:$0xff]  ;;  %v187_v36 = vld [vmem:[#allocation2 + $0x1] ss:$0 sm:$0xff] }
  0xc2   : > { %v142_v15 = vmul.f32 %v138_v14, %v135_v12  ;;  %v178_v33 = vxor.u32 2147483648, %v177_v31  ;;  %v188_v38 = vxor.u32 2147483648, %v187_v36  ;;  %v196_v41 = vld [vmem:[#allocation2] ss:$0 sm:$0xff] }
  0xc3   : > { %v197_v43 = vxor.u32 2147483648, %v196_v41 }
  0xc4   : > { %143 = vadd.xlane.f32.xlu0 %v142_v15 }
 0x151   : > { %v144_v17 = vpop.xlane.xlu0 %143 }
 0x152   : > { %v145_v19 = vsel %vm141_vm6, %v144_v17, %v135_v12 }
 0x153   : > { %v152_v20 = vmul.f32 %v148_v18, %v145_v19 }
 0x155   : > { %153 = vadd.xlane.f32.xlu1 %v152_v20 }
 0x1e2   : > { %v154_v22 = vpop.xlane.xlu1 %153 }
 0x1e3   : > { %v155_v24 = vsel %vm151_vm7, %v154_v22, %v145_v19 }
 0x1e4   : > { %v162_v25 = vmul.f32 %v158_v23, %v155_v24 }
 0x1e6   : > { %163 = vadd.xlane.f32.xlu1 %v162_v25 }
 0x273   : > { %v164_v27 = vpop.xlane.xlu1 %163 }
 0x274   : > { %v165_v29 = vsel %vm161_vm8, %v164_v27, %v155_v24 }
 0x275   : > { %v172_v30 = vmul.f32 %v168_v28, %v165_v29 }
 0x277   : > { %173 = vadd.xlane.f32.xlu0 %v172_v30 }
 0x304   : > { %v174_v32 = vpop.xlane.xlu0 %173 }
 0x305   : > { %v175_v34 = vsel %vm171_vm9, %v174_v32, %v165_v29 }
 0x306   : > { %v182_v35 = vmul.f32 %v178_v33, %v175_v34 }
 0x308   : > { %183 = vadd.xlane.f32.xlu1 %v182_v35 }
 0x395   : > { %v184_v37 = vpop.xlane.xlu1 %183 }
 0x396   : > { %v185_v39 = vsel %vm181_vm10, %v184_v37, %v175_v34 }
 0x397   : > { %v192_v40 = vmul.f32 %v188_v38, %v185_v39 }
 0x399   : > { %193 = vadd.xlane.f32.xlu0 %v192_v40 }
 0x426   : > { %v194_v42 = vpop.xlane.xlu0 %193 }
 0x427   : > { %v195_v44 = vsel %vm191_vm11, %v194_v42, %v185_v39 }
 0x428   : > { %v201_v45 = vmul.f32 %v197_v43, %v195_v44 }
 0x42a   : > { %202 = vadd.xlane.f32.xlu1 %v201_v45 }
 0x4b7   : > { %v203_v46 = vpop.xlane.xlu1 %202 }
 0x4b8   : > { %v204_v47 = vsel %vm200_vm12, %v203_v46, %v195_v44 }
 0x4b9   : > { %v206_v48 = vmul.f32 %v348_v8, %v204_v47 }
 0x4bb   : > { %v208_v49 = vsel %vm207_vm13, %v204_v47, %v206_v48 }
 0x4bc   : > { %247 = vst [vmem:[%s218_s24] sm:$0xff] %v208_v49 }
 0x4bd PF: > { %s7_s8 = sadd.s32 1, %s371_s8   ;;  %s444_s6 = smov %s367_s7 }
 0x4be   : > { %p4_p5 = scmp.ge.s32.totalorder %s7_s8, 6   ;;  %s445_s7 = smov %s447_s10 }
 0x4c0   :  { %6 = sbr.rel (!%p4_p5) target bundleno = 2 (0x2), region = 124 }

// kernel: gmm_loss.2
= control target key start
LH: loop header
LB: loop body
LE: loop exit
PB: predicated region body
PF: predicated region fallthrough
CT: control target
= control target key end

     0   :  { %7 = vsyncpa [#allocation3], 0  ;;  %s2944_s0 = inlined_call_operand.hbm [shape: f32[8,512], index: 0, kind: input, shape index: {}]   ;;  %s2945_s1 = inlined_call_operand.hbm [shape: f32[4,512], index: 1, kind: input, shape index: {}]   ;;  %s2946_s2 = inlined_call_operand.hbm [shape: f32[1,4,81], index: 2, kind: output, shape index: {}]  }
   0x1   :  { %8 = vsyncpa [#allocation6], 0 }
   0x2   :  { %9 = vsyncpa [#allocation4], 0  ;;  %s2368_s9 = smov [#allocation2]   ;;  %s2369_s11 = smov [#allocation5]  }
   0x3   :  { %s20_s10 = sshll.u32 %s2368_s9, 4  ;;  %s34_s12 = sshll.u32 %s2369_s11, 4  ;;  %s21_s10 = int_to_ptr.vmem [resolvable:$true] %s20_s10  ;;  %s35_s12 = int_to_ptr.vmem [resolvable:$true] %s34_s12 }
   0x4   :  { %s2296_s15 = scalar_lea.hbm %s2944_s0, 512 }
   0x5   :  { %p2297_p0 = scmp.ne.s32.totalorder %s2944_s0, %s2296_s15  ;;  %p2300_p1 = scmp.lt.u32.totalorder %s2296_s15, %s2944_s0 }
   0x7   :  { %p2302_p2 = pnand %p2300_p1, %p2297_p0 }
   0x9   :  { %2305 = shalt.err (!%p2302_p2)
}
   0xa   :  { %s2306_s20 = scalar_lea.vmem %s21_s10, 512  ;;  %p2311_p4 = scmp.lt.s32.totalorder %s21_s10, %s21_s10 }
   0xb   :  { %p2307_p3 = scmp.ne.s32.totalorder %s21_s10, %s2306_s20  ;;  %p2312_p5 = scmp.lt.s32.totalorder %s2306_s20, %s2306_s20 }
   0xd   :  { %p2313_p6 = por %p2312_p5, %p2311_p4 }
   0xf   :  { %p2314_p7 = pnand %p2313_p6, %p2307_p3 }
  0x11   :  { %2317 = shalt.err (!%p2314_p7)
}
  0x12   :  { %23 = dma.hbm_to_vmem [thread:$0]  %s2944_s0, 512, %s21_s10, [#allocation3]  }
  0x13   :  { %s2318_s25 = scalar_lea.hbm %s2945_s1, 256 }
  0x14   :  { %p2319_p8 = scmp.ne.s32.totalorder %s2945_s1, %s2318_s25  ;;  %p2322_p9 = scmp.lt.u32.totalorder %s2318_s25, %s2945_s1 }
  0x16   :  { %p2324_p10 = pnand %p2322_p9, %p2319_p8 }
  0x18   :  { %2327 = shalt.err (!%p2324_p10)
}
  0x19   :  { %s2328_s30 = scalar_lea.vmem %s35_s12, 256  ;;  %p2333_p12 = scmp.lt.s32.totalorder %s35_s12, %s35_s12 }
  0x1a   :  { %p2329_p11 = scmp.ne.s32.totalorder %s35_s12, %s2328_s30  ;;  %p2334_p13 = scmp.lt.s32.totalorder %s2328_s30, %s2328_s30 }
  0x1c   :  { %p2335_p0 = por %p2334_p13, %p2333_p12 }
  0x1e   :  { %p2336_p1 = pnand %p2335_p0, %p2329_p11 }
  0x20   :  { %2339 = shalt.err (!%p2336_p1)
}
  0x21   :  { %37 = dma.hbm_to_vmem [thread:$0]  %s2945_s1, 256, %s35_s12, [#allocation6]  }
  0x22   :  { %2362 = dma.done.wait [#allocation3], 512  }
  0x23   :  { %2363 = vsyncadd [#allocation3], 4294966784 }
  0x24   :  { %2364 = dma.done.wait [#allocation6], 256  }
  0x25   :  { %2365 = vsyncadd [#allocation6], 4294967040  ;;  %vm52_vm0 = vcmask 658432   ;;  %v2370_v0 = vmov 0.0   ;;  %v86_v1 = vlaneseq  ;;  %v2371_v2 = vmov 1966171168  }
  0x26   :  { %53 = vst.msk [vmem:[#allocation7] sm:$0xf] %vm52_vm0, %v2370_v0  ;;  %v84_v3 = vunpack.c.l.s4 %v2371_v2  ;;  %v54_v6 = vld [vmem:[#allocation2] sm:$0xff]  ;;  %v55_v7 = vld [vmem:[#allocation2 + $0x8] sm:$0xff]  ;;  %v56_v8 = vld [vmem:[#allocation2 + $0x10] sm:$0xff]  ;;  %vm70_vm1 = vcmask 1040384  }
  0x27   :  { %v87_v5 = vshrl.u32 %v86_v1, 7  ;;  %v57_v9 = vld [vmem:[#allocation2 + $0x18] sm:$0xff]  ;;  %v2413_v10 = vrot.slane %v54_v6, 7  ;;  %v2415_v11 = vrot.slane %v55_v7, 7  ;;  %v2417_v12 = vrot.slane %v56_v8, 7  ;;  %s2372_s1 = smov [#allocation7]  }
  0x28   :  { %v85_v4 = vunpack.c.0.s8 %v84_v3  ;;  %v2419_v13 = vrot.slane %v57_v9, 7  ;;  %s2229_s4 = sshll.u32 %s2372_s1, 4  ;;  %s2230_s4 = int_to_ptr.vmem [resolvable:$true] %s2229_s4 }
  0x29   :  { %v2424_v15 = vsel %vm70_vm1, 1.0, %v2413_v10  ;;  %v2427_v16 = vsel %vm70_vm1, 1.0, %v2415_v11  ;;  %v2430_v17 = vsel %vm70_vm1, 1.0, %v2417_v12  ;;  %v147_v18 = vcombine.low %v2413_v10, %v2415_v11  ;;  %s2340_s5 = scalar_lea.vmem %s2230_s4, 64  ;;  %p2345_p3 = scmp.lt.s32.totalorder %s2230_s4, %s2230_s4 }
  0x2a   :  { %v2421_v14 = vsub.s32 %v85_v4, %v87_v5  ;;  %v2435_v19 = vsel %vm70_vm1, 1.0, %v2419_v13  ;;  %v79_v20 = vcombine.low %v2424_v15, %v2427_v16  ;;  %v80_v21 = vcombine.high %v2424_v15, %v2427_v16  ;;  %p2341_p2 = scmp.ne.s32.totalorder %s2230_s4, %s2340_s5  ;;  %p2346_p4 = scmp.lt.s32.totalorder %s2340_s5, %s2340_s5 }
  0x2b   :  { %v148_v22 = vcombine.low %v2417_v12, %v2419_v13  ;;  %v81_v23 = vcombine.low %v2430_v17, %v2435_v19  ;;  %v82_v24 = vcombine.high %v2430_v17, %v2435_v19  ;;  %v2453_v31 = vsub.s32 0, %v87_v5 }
  0x2c   :  { %v155_v25 = vrot.slane %v147_v18, %v2421_v14  ;;  %v89_v26 = vrot.slane %v79_v20, %v2421_v14  ;;  %v96_v27 = vrot.slane %v80_v21, %v2421_v14  ;;  %v2455_v37 = vsub.s32 1, %v87_v5  ;;  %p2347_p5 = por %p2346_p4, %p2345_p3 }
  0x2d   :  { %v162_v28 = vrot.slane %v148_v22, %v2421_v14  ;;  %v103_v29 = vrot.slane %v81_v23, %v2421_v14  ;;  %v110_v30 = vrot.slane %v82_v24, %v2421_v14  ;;  %v2457_v38 = vsub.s32 2, %v87_v5 }
  0x2e   :  { %v2459_v39 = vsub.s32 3, %v87_v5  ;;  %p2348_p6 = pnand %p2347_p5, %p2341_p2 }
  0x2f   :  { %v163_v32 = vcombine.low %v155_v25, %v162_v28  ;;  %v111_v33 = vcombine.low %v89_v26, %v103_v29  ;;  %v112_v34 = vcombine.high %v89_v26, %v103_v29  ;;  %v113_v35 = vcombine.low %v96_v27, %v110_v30 }
  0x30   :  { %v114_v36 = vcombine.high %v96_v27, %v110_v30 }
  0x31   :  { %v170_v40 = vrot.slane %v163_v32, %v2421_v14  ;;  %v2463_v41 = vrot.slane %v111_v33, %v2421_v14  ;;  %v2466_v42 = vrot.slane %v112_v34, %v2421_v14  ;;  %v2469_v43 = vrot.slane %v113_v35, %v2421_v14 }
  0x32   :  { %v2472_v44 = vrot.slane %v114_v36, %v2421_v14 }
  0x33   :  { %v2475_v45 = vrot.slane %v170_v40, %v2453_v31  ;;  %v2478_v46 = vrot.slane %v170_v40, %v2455_v37  ;;  %v2481_v47 = vrot.slane %v170_v40, %v2457_v38  ;;  %v2484_v48 = vrot.slane %v170_v40, %v2459_v39 }
  0x34   :  { %v174_v49 = vrot.slane %v2463_v41, %v2453_v31  ;;  %v178_v50 = vrot.slane %v2463_v41, %v2455_v37  ;;  %v182_v51 = vrot.slane %v2463_v41, %v2457_v38  ;;  %v186_v52 = vrot.slane %v2463_v41, %v2459_v39 }
  0x35   :  { %v2496_v53 = vrot.slane %v2466_v42, %v2453_v31  ;;  %v2500_v54 = vrot.slane %v2466_v42, %v2455_v37  ;;  %v2504_v55 = vrot.slane %v2466_v42, %v2457_v38  ;;  %v2508_v56 = vrot.slane %v2466_v42, %v2459_v39 }
  0x36   :  { %v351_v57 = vmul.f32 %v174_v49, %v2424_v15  ;;  %v352_v58 = vmul.f32 %v178_v50, %v2427_v16  ;;  %v353_v59 = vmul.f32 %v182_v51, %v2430_v17  ;;  %v354_v60 = vmul.f32 %v186_v52, %v2435_v19 }
  0x37   :  { %v355_v61 = vmul.f32 %v174_v49, %v2413_v10  ;;  %v356_v62 = vmul.f32 %v178_v50, %v2415_v11  ;;  %v357_v63 = vmul.f32 %v182_v51, %v2417_v12  ;;  %v358_v0 = vmul.f32 %v186_v52, %v2419_v13 }
  0x38   :  { %v359_v1 = vmul.f32 %v2496_v53, %v2424_v15  ;;  %v360_v2 = vmul.f32 %v2500_v54, %v2427_v16  ;;  %v361_v3 = vmul.f32 %v2504_v55, %v2430_v17  ;;  %v362_v4 = vmul.f32 %v2508_v56, %v2435_v19 }
  0x39   :  { %v495_v5 = vcombine.low %v351_v57, %v352_v58  ;;  %v496_v6 = vcombine.high %v351_v57, %v352_v58  ;;  %v497_v7 = vcombine.low %v353_v59, %v354_v60  ;;  %v498_v8 = vcombine.high %v353_v59, %v354_v60 }
  0x3a   :  { %v563_v9 = vcombine.low %v355_v61, %v356_v62  ;;  %v564_v18 = vcombine.low %v357_v63, %v358_v0  ;;  %v587_v20 = vcombine.low %v359_v1, %v360_v2  ;;  %v588_v21 = vcombine.high %v359_v1, %v360_v2 }
  0x3b   :  { %v505_v22 = vrot.slane %v495_v5, %v2421_v14  ;;  %v512_v23 = vrot.slane %v496_v6, %v2421_v14  ;;  %v519_v24 = vrot.slane %v497_v7, %v2421_v14  ;;  %v526_v25 = vrot.slane %v498_v8, %v2421_v14 }
  0x3c   :  { %v571_v26 = vrot.slane %v563_v9, %v2421_v14  ;;  %v578_v27 = vrot.slane %v564_v18, %v2421_v14  ;;  %v589_v28 = vcombine.low %v361_v3, %v362_v4  ;;  %v590_v29 = vcombine.high %v361_v3, %v362_v4 }
  0x3d   :  { %v527_v30 = vcombine.low %v505_v22, %v519_v24  ;;  %v528_v32 = vcombine.high %v505_v22, %v519_v24  ;;  %v529_v33 = vcombine.low %v512_v23, %v526_v25  ;;  %v530_v34 = vcombine.high %v512_v23, %v526_v25 }
  0x3e   :  { %v579_v35 = vcombine.low %v571_v26, %v578_v27  ;;  %v597_v36 = vrot.slane %v587_v20, %v2421_v14  ;;  %v604_v40 = vrot.slane %v588_v21, %v2421_v14  ;;  %v611_v49 = vrot.slane %v589_v28, %v2421_v14 }
  0x3f   :  { %v537_v50 = vrot.slane %v527_v30, %v2421_v14  ;;  %v544_v51 = vrot.slane %v529_v33, %v2421_v14  ;;  %v551_v52 = vrot.slane %v528_v32, %v2421_v14  ;;  %v558_v57 = vrot.slane %v530_v34, %v2421_v14 }
  0x40   :  { %v586_v58 = vrot.slane %v579_v35, %v2421_v14  ;;  %v618_v59 = vrot.slane %v590_v29, %v2421_v14  ;;  %v619_v60 = vcombine.low %v597_v36, %v611_v49  ;;  %v620_v61 = vcombine.high %v597_v36, %v611_v49 }
  0x41   :  { %v1332_v62 = vcombine.low %v537_v50, %v551_v52  ;;  %v2239_v63 = vcombine.high %v537_v50, %v551_v52  ;;  %v1334_v0 = vcombine.low %v544_v51, %v558_v57  ;;  %v2240_v1 = vcombine.high %v544_v51, %v558_v57 }
  0x42   :  { %v621_v2 = vcombine.low %v604_v40, %v618_v59  ;;  %v622_v3 = vcombine.high %v604_v40, %v618_v59  ;;  %v629_v4 = vrot.slane %v619_v60, %v2421_v14  ;;  %v643_v5 = vrot.slane %v620_v61, %v2421_v14 }
  0x43   :  { %v1342_v6 = vrot.slane %v1332_v62, %v2421_v14  ;;  %v1349_v7 = vrot.slane %v2239_v63, %v2421_v14  ;;  %v1356_v8 = vrot.slane %v1334_v0, %v2421_v14  ;;  %v1363_v9 = vrot.slane %v2240_v1, %v2421_v14 }
  0x44   :  { %v636_v18 = vrot.slane %v621_v2, %v2421_v14  ;;  %v2549_v20 = vrot.slane %v622_v3, %v2421_v14  ;;  %v651_v21 = vcombine.high %v629_v4, %v629_v4  ;;  %v653_v22 = vcombine.high %v643_v5, %v643_v5 }
  0x45   :  { %v1365_v23 = vcombine.high %v1342_v6, %v1349_v7  ;;  %v1367_v24 = vcombine.high %v1356_v8, %v1363_v9  ;;  %v1400_v25 = vcombine.low %v586_v58, %v629_v4  ;;  %v1364_v26 = vcombine.low %v1342_v6, %v1349_v7 }
  0x46   :  { %v652_v27 = vcombine.high %v636_v18, %v636_v18  ;;  %v654_v28 = vcombine.high %v2549_v20, %v2549_v20  ;;  %v1401_v29 = vcombine.low %v643_v5, %v651_v21  ;;  %v1402_v30 = vcombine.low %v653_v22, %v636_v18 }
  0x47   :  { %v1381_v32 = vrot.slane %v1365_v23, %v2421_v14  ;;  %v1395_v33 = vrot.slane %v1367_v24, %v2421_v14  ;;  %v1410_v34 = vrot.slane %v1400_v25, %v2421_v14  ;;  %v1366_v35 = vcombine.low %v1356_v8, %v1363_v9 }
  0x48   :  { %v1403_v36 = vcombine.low %v2549_v20, %v652_v27  ;;  %v1417_v40 = vrot.slane %v1401_v29, %v2421_v14  ;;  %v1424_v49 = vrot.slane %v1402_v30, %v2421_v14  ;;  %v1374_v50 = vrot.slane %v1364_v26, %v2421_v14 }
  0x49   :  { %v1398_v51 = vcombine.low %v1381_v32, %v1395_v33  ;;  %v1399_v52 = vcombine.high %v1381_v32, %v1395_v33  ;;  %v1388_v57 = vrot.slane %v1366_v35, %v2421_v14  ;;  %v143_v58 = vcombine.high %v2463_v41, %v2463_v41 }
  0x4a   :  { %v1431_v59 = vrot.slane %v1403_v36, %v2421_v14  ;;  %v1433_v60 = vcombine.high %v1410_v34, %v1417_v40  ;;  %v1432_v61 = vcombine.low %v1410_v34, %v1417_v40  ;;  %v145_v62 = vcombine.high %v2466_v42, %v2466_v42 }
  0x4b   :  { %v1396_v63 = vcombine.low %v1374_v50, %v1388_v57  ;;  %v1397_v0 = vcombine.high %v1374_v50, %v1388_v57  ;;  %v206_v1 = vrot.slane %v143_v58, %v2453_v31  ;;  %v210_v2 = vrot.slane %v143_v58, %v2455_v37 }
  0x4c   :  { %v1435_v3 = vcombine.high %v1424_v49, %v1431_v59  ;;  %v1449_v4 = vrot.slane %v1433_v60, %v2421_v14  ;;  %v1434_v5 = vcombine.low %v1424_v49, %v1431_v59  ;;  %v1442_v6 = vrot.slane %v1432_v61, %v2421_v14 }
  0x4d   :  { %v214_v41 = vrot.slane %v143_v58, %v2457_v38  ;;  %v218_v7 = vrot.slane %v143_v58, %v2459_v39  ;;  %v2573_v8 = vrot.slane %v145_v62, %v2453_v31  ;;  %v2576_v42 = vrot.slane %v145_v62, %v2455_v37 }
  0x4e   :  { %v1463_v9 = vrot.slane %v1435_v3, %v2421_v14  ;;  %v1456_v18 = vrot.slane %v1434_v5, %v2421_v14  ;;  %v2581_v21 = vrot.slane %v145_v62, %v2457_v38  ;;  %v2584_v22 = vrot.slane %v145_v62, %v2459_v39 }
  0x4f   :  { %v363_v23 = vmul.f32 %v2496_v53, %v2413_v10  ;;  %v364_v24 = vmul.f32 %v2500_v54, %v2415_v11  ;;  %v365_v25 = vmul.f32 %v2504_v55, %v2417_v12  ;;  %v366_v26 = vmul.f32 %v2508_v56, %v2419_v13 }
  0x50   :  { %v1466_v27 = vcombine.low %v1449_v4, %v1463_v9  ;;  %v1467_v29 = vcombine.high %v1449_v4, %v1463_v9  ;;  %v1464_v30 = vcombine.low %v1442_v6, %v1456_v18  ;;  %v1465_v32 = vcombine.high %v1442_v6, %v1456_v18 }
  0x51   :  { %v367_v33 = vmul.f32 %v206_v1, %v2424_v15  ;;  %v368_v34 = vmul.f32 %v210_v2, %v2427_v16  ;;  %v369_v35 = vmul.f32 %v214_v41, %v2430_v17  ;;  %v370_v53 = vmul.f32 %v218_v7, %v2435_v19 }
  0x52   :  { %v2249_v36 = vpack.c.bf16 %v1466_v27, %v1398_v51  ;;  %v2269_v54 = vpack.c.bf16 %v1467_v29, %v1399_v52  ;;  %v2251_v40 = vpack.c.bf16 %v1464_v30, %v1396_v63  ;;  %v2271_v49 = vpack.c.bf16 %v1465_v32, %v1397_v0 }
  0x53   :  { %v371_v55 = vmul.f32 %v206_v1, %v2413_v10  ;;  %v372_v56 = vmul.f32 %v210_v2, %v2415_v11  ;;  %v373_v50 = vmul.f32 %v214_v41, %v2417_v12  ;;  %v374_v57 = vmul.f32 %v218_v7, %v2419_v13 }
  0x54   :  { %2250 = vmatprep.subr.bf16.mxu0 %v2249_v36  ;;  %2270 = vmatprep.subr.bf16.mxu1 %v2269_v54  ;;  %v375_v58 = vmul.f32 %v2573_v8, %v2424_v15  ;;  %v376_v59 = vmul.f32 %v2576_v42, %v2427_v16  ;;  %v377_v51 = vmul.f32 %v2581_v21, %v2430_v17 }
  0x55   :  { %2252 = vmatpush1.bf16.xpose.msra.mxu0 %v2251_v40  ;;  %2272 = vmatpush1.bf16.xpose.msra.mxu1 %v2271_v49  ;;  %v378_v52 = vmul.f32 %v2584_v22, %v2435_v19  ;;  %v655_v60 = vcombine.low %v363_v23, %v364_v24  ;;  %v656_v61 = vcombine.low %v365_v25, %v366_v26 }
  0x56   :  { %v679_v62 = vcombine.low %v367_v33, %v368_v34  ;;  %v680_v63 = vcombine.high %v367_v33, %v368_v34  ;;  %v681_v0 = vcombine.low %v369_v35, %v370_v53  ;;  %v682_v1 = vcombine.high %v369_v35, %v370_v53 }
  0x57   :  { %v663_v2 = vrot.slane %v655_v60, %v2421_v14  ;;  %v670_v3 = vrot.slane %v656_v61, %v2421_v14  ;;  %v747_v4 = vcombine.low %v371_v55, %v372_v56  ;;  %v748_v5 = vcombine.low %v373_v50, %v374_v57 }
  0x58   :  { %v689_v6 = vrot.slane %v679_v62, %v2421_v14  ;;  %v696_v41 = vrot.slane %v680_v63, %v2421_v14  ;;  %v703_v7 = vrot.slane %v681_v0, %v2421_v14  ;;  %v710_v9 = vrot.slane %v682_v1, %v2421_v14 }
  0x59   :  { %v671_v18 = vcombine.low %v663_v2, %v670_v3  ;;  %v755_v23 = vrot.slane %v747_v4, %v2421_v14  ;;  %v762_v24 = vrot.slane %v748_v5, %v2421_v14  ;;  %v771_v25 = vcombine.low %v375_v58, %v376_v59 }
  0x5a   :  { %v711_v26 = vcombine.low %v689_v6, %v703_v7  ;;  %v712_v27 = vcombine.high %v689_v6, %v703_v7  ;;  %v713_v29 = vcombine.low %v696_v41, %v710_v9  ;;  %v714_v30 = vcombine.high %v696_v41, %v710_v9 }
  0x5b   :  { %v678_v32 = vrot.slane %v671_v18, %v2421_v14  ;;  %v763_v33 = vcombine.low %v755_v23, %v762_v24  ;;  %v772_v34 = vcombine.high %v375_v58, %v376_v59  ;;  %v773_v35 = vcombine.low %v377_v51, %v378_v52 }
  0x5c   :  { %v721_v53 = vrot.slane %v711_v26, %v2421_v14  ;;  %v728_v36 = vrot.slane %v713_v29, %v2421_v14  ;;  %v735_v54 = vrot.slane %v712_v27, %v2421_v14  ;;  %v742_v40 = vrot.slane %v714_v30, %v2421_v14 }
  0x5d   :  { %v770_v49 = vrot.slane %v763_v33, %v2421_v14  ;;  %v774_v55 = vcombine.high %v377_v51, %v378_v52  ;;  %v781_v56 = vrot.slane %v771_v25, %v2421_v14  ;;  %v2626_v50 = vrot.slane %v772_v34, %v2421_v14 }
  0x5e   :  { %v795_v57 = vrot.slane %v773_v35, %v2421_v14  ;;  %v1468_v58 = vcombine.low %v654_v28, %v678_v32  ;;  %v1469_v59 = vcombine.low %v721_v53, %v735_v54  ;;  %v2241_v60 = vcombine.high %v721_v53, %v735_v54 }
  0x5f   :  { %v2633_v61 = vrot.slane %v774_v55, %v2421_v14  ;;  %v1471_v62 = vcombine.low %v728_v36, %v742_v40  ;;  %v2242_v63 = vcombine.high %v728_v36, %v742_v40  ;;  %v238_v51 = vrot.slane %v2469_v43, %v2453_v31 }
  0x60   :  { %v803_v52 = vcombine.low %v781_v56, %v795_v57  ;;  %v804_v0 = vcombine.high %v781_v56, %v795_v57  ;;  %v1478_v1 = vrot.slane %v1468_v58, %v2421_v14  ;;  %v1485_v2 = vrot.slane %v1469_v59, %v2421_v14 }
  0x61   :  { %v805_v20 = vcombine.low %v2626_v50, %v2633_v61  ;;  %v1492_v28 = vrot.slane %v2241_v60, %v2421_v14  ;;  %v1499_v3 = vrot.slane %v1471_v62, %v2421_v14  ;;  %v1546_v4 = vrot.slane %v2242_v63, %v2421_v14 }
  0x62   :  { %v813_v5 = vrot.slane %v803_v52, %v2421_v14  ;;  %v827_v6 = vrot.slane %v804_v0, %v2421_v14  ;;  %v1501_v41 = vcombine.high %v1478_v1, %v1485_v2  ;;  %v1500_v7 = vcombine.low %v1478_v1, %v1485_v2 }
  0x63   :  { %v2647_v9 = vrot.slane %v805_v20, %v2421_v14  ;;  %v1503_v18 = vcombine.high %v1492_v28, %v1499_v3  ;;  %v1502_v23 = vcombine.low %v1492_v28, %v1499_v3  ;;  %v242_v24 = vrot.slane %v2469_v43, %v2455_v37 }
  0x64   :  { %v835_v25 = vcombine.high %v813_v5, %v813_v5  ;;  %v837_v26 = vcombine.high %v827_v6, %v827_v6  ;;  %v1517_v27 = vrot.slane %v1501_v41, %v2421_v14  ;;  %v1537_v29 = vcombine.low %v770_v49, %v813_v5 }
  0x65   :  { %v1531_v30 = vrot.slane %v1503_v18, %v2421_v14  ;;  %v1510_v32 = vrot.slane %v1500_v7, %v2421_v14  ;;  %v1524_v33 = vrot.slane %v1502_v23, %v2421_v14  ;;  %v246_v34 = vrot.slane %v2469_v43, %v2457_v38 }
  0x66   :  { %v1538_v35 = vcombine.low %v827_v6, %v835_v25  ;;  %v1539_v53 = vcombine.low %v837_v26, %v2647_v9  ;;  %v1553_v36 = vrot.slane %v1537_v29, %v2421_v14  ;;  %v250_v54 = vrot.slane %v2469_v43, %v2459_v39 }
  0x67   :  { %v1534_v40 = vcombine.low %v1517_v27, %v1531_v30  ;;  %v1535_v55 = vcombine.high %v1517_v27, %v1531_v30  ;;  %v1532_v49 = vcombine.low %v1510_v32, %v1524_v33  ;;  %v1533_v56 = vcombine.high %v1510_v32, %v1524_v33 }
  0x68   :  { %v1560_v57 = vrot.slane %v1538_v35, %v2421_v14  ;;  %v1567_v58 = vrot.slane %v1539_v53, %v2421_v14  ;;  %v1569_v59 = vcombine.high %v1546_v4, %v1553_v36  ;;  %v1568_v60 = vcombine.low %v1546_v4, %v1553_v36 }
  0x69   :  { %v2665_v62 = vrot.slane %v2472_v44, %v2453_v31  ;;  %v2669_v63 = vrot.slane %v2472_v44, %v2455_v37  ;;  %v2673_v52 = vrot.slane %v2472_v44, %v2457_v38  ;;  %v2677_v0 = vrot.slane %v2472_v44, %v2459_v39 }
  0x6a   :  { %v1571_v1 = vcombine.high %v1560_v57, %v1567_v58  ;;  %v1585_v2 = vrot.slane %v1569_v59, %v2421_v14  ;;  %v1570_v20 = vcombine.low %v1560_v57, %v1567_v58  ;;  %v1578_v28 = vrot.slane %v1568_v60, %v2421_v14 }
  0x6b   :  { %v379_v3 = vmul.f32 %v2573_v8, %v2413_v10  ;;  %v380_v4 = vmul.f32 %v2576_v42, %v2415_v11  ;;  %v381_v5 = vmul.f32 %v2581_v21, %v2417_v12  ;;  %v382_v6 = vmul.f32 %v2584_v22, %v2419_v13 }
  0x6c   :  { %v1599_v41 = vrot.slane %v1571_v1, %v2421_v14  ;;  %v1592_v7 = vrot.slane %v1570_v20, %v2421_v14  ;;  %v383_v18 = vmul.f32 %v238_v51, %v2424_v15  ;;  %v384_v23 = vmul.f32 %v242_v24, %v2427_v16 }
  0x6d   :  { %v385_v25 = vmul.f32 %v246_v34, %v2430_v17  ;;  %v386_v8 = vmul.f32 %v250_v54, %v2435_v19  ;;  %v387_v42 = vmul.f32 %v238_v51, %v2413_v10  ;;  %v388_v26 = vmul.f32 %v242_v24, %v2415_v11 }
  0x6e   :  { %v1602_v21 = vcombine.low %v1585_v2, %v1599_v41  ;;  %v1603_v27 = vcombine.high %v1585_v2, %v1599_v41  ;;  %v1600_v29 = vcombine.low %v1578_v28, %v1592_v7  ;;  %v1601_v22 = vcombine.high %v1578_v28, %v1592_v7 }
  0x6f   :  { %v389_v30 = vmul.f32 %v246_v34, %v2417_v12  ;;  %v390_v32 = vmul.f32 %v250_v54, %v2419_v13  ;;  %v2701_v33 = vmul.f32 %v2665_v62, %v2424_v15  ;;  %v2705_v35 = vmul.f32 %v2669_v63, %v2427_v16 }
  0x70   :  { %v2253_v53 = vpack.c.bf16 %v1602_v21, %v1534_v40  ;;  %v2273_v51 = vpack.c.bf16 %v1603_v27, %v1535_v55  ;;  %v2255_v36 = vpack.c.bf16 %v1600_v29, %v1532_v49  ;;  %v2275_v24 = vpack.c.bf16 %v1601_v22, %v1533_v56 }
  0x71   :  { %v2709_v57 = vmul.f32 %v2673_v52, %v2430_v17  ;;  %v2713_v34 = vmul.f32 %v2677_v0, %v2435_v19  ;;  %v806_v54 = vcombine.high %v2626_v50, %v2633_v61  ;;  %v836_v58 = vcombine.high %v2647_v9, %v2647_v9 }
  0x72   :  { %2254 = vmatprep.subr.bf16.mxu0 %v2253_v53  ;;  %2274 = vmatprep.subr.bf16.mxu1 %v2273_v51  ;;  %v839_v40 = vcombine.low %v379_v3, %v380_v4  ;;  %v840_v55 = vcombine.low %v381_v5, %v382_v6  ;;  %v863_v49 = vcombine.low %v383_v18, %v384_v23 }
  0x73   :  { %2256 = vmatpush1.bf16.xpose.msra.mxu0 %v2255_v36  ;;  %2276 = vmatpush1.bf16.xpose.msra.mxu1 %v2275_v24  ;;  %v834_v56 = vrot.slane %v806_v54, %v2421_v14  ;;  %v864_v59 = vcombine.high %v383_v18, %v384_v23  ;;  %v865_v60 = vcombine.low %v385_v25, %v386_v8 }
  0x74   :  { %v847_v1 = vrot.slane %v839_v40, %v2421_v14  ;;  %v854_v2 = vrot.slane %v840_v55, %v2421_v14  ;;  %v866_v20 = vcombine.high %v385_v25, %v386_v8  ;;  %v873_v50 = vrot.slane %v863_v49, %v2421_v14 }
  0x75   :  { %v838_v61 = vcombine.high %v834_v56, %v834_v56  ;;  %v880_v9 = vrot.slane %v864_v59, %v2421_v14  ;;  %v887_v28 = vrot.slane %v865_v60, %v2421_v14  ;;  %v931_v3 = vcombine.low %v387_v42, %v388_v26 }
  0x76   :  { %v855_v4 = vcombine.low %v847_v1, %v854_v2  ;;  %v894_v5 = vrot.slane %v866_v20, %v2421_v14  ;;  %v932_v6 = vcombine.low %v389_v30, %v390_v32  ;;  %v955_v41 = vcombine.low %v2701_v33, %v2705_v35 }
  0x77   :  { %v895_v7 = vcombine.low %v873_v50, %v887_v28  ;;  %v896_v18 = vcombine.high %v873_v50, %v887_v28  ;;  %v939_v23 = vrot.slane %v931_v3, %v2421_v14  ;;  %v957_v25 = vcombine.low %v2709_v57, %v2713_v34 }
  0x78   :  { %v862_v8 = vrot.slane %v855_v4, %v2421_v14  ;;  %v897_v21 = vcombine.low %v880_v9, %v894_v5  ;;  %v898_v27 = vcombine.high %v880_v9, %v894_v5  ;;  %v946_v42 = vrot.slane %v932_v6, %v2421_v14 }
  0x79   :  { %v905_v26 = vrot.slane %v895_v7, %v2421_v14  ;;  %v919_v29 = vrot.slane %v896_v18, %v2421_v14  ;;  %v965_v22 = vrot.slane %v955_v41, %v2421_v14  ;;  %v979_v30 = vrot.slane %v957_v25, %v2421_v14 }
  0x7a   :  { %v912_v32 = vrot.slane %v897_v21, %v2421_v14  ;;  %v926_v53 = vrot.slane %v898_v27, %v2421_v14  ;;  %v947_v51 = vcombine.low %v939_v23, %v946_v42  ;;  %v1604_v36 = vcombine.low %v834_v56, %v836_v58 }
  0x7b   :  { %v987_v24 = vcombine.low %v965_v22, %v979_v30  ;;  %v988_v54 = vcombine.high %v965_v22, %v979_v30  ;;  %v1605_v40 = vcombine.low %v838_v61, %v862_v8  ;;  %v1606_v55 = vcombine.low %v905_v26, %v919_v29 }
  0x7c   :  { %v954_v49 = vrot.slane %v947_v51, %v2421_v14  ;;  %v2243_v59 = vcombine.high %v905_v26, %v919_v29  ;;  %v1614_v60 = vrot.slane %v1604_v36, %v2421_v14  ;;  %v1672_v1 = vcombine.low %v912_v32, %v926_v53 }
  0x7d   :  { %v997_v2 = vrot.slane %v987_v24, %v2421_v14  ;;  %v2743_v20 = vrot.slane %v988_v54, %v2421_v14  ;;  %v1621_v50 = vrot.slane %v1605_v40, %v2421_v14  ;;  %v1628_v9 = vrot.slane %v1606_v55, %v2421_v14 }
  0x7e   :  { %v1635_v58 = vrot.slane %v2243_v59, %v2421_v14  ;;  %v2244_v56 = vcombine.high %v912_v32, %v926_v53  ;;  %v1682_v61 = vrot.slane %v1672_v1, %v2421_v14  ;;  %v144_v28 = vcombine.high %v2469_v43, %v2469_v43 }
  0x7f   :  { %v1019_v3 = vcombine.high %v997_v2, %v997_v2  ;;  %v1637_v4 = vcombine.high %v1614_v60, %v1621_v50  ;;  %v1674_v5 = vcombine.low %v954_v49, %v997_v2  ;;  %v1636_v6 = vcombine.low %v1614_v60, %v1621_v50 }
  0x80   :  { %v1639_v41 = vcombine.high %v1628_v9, %v1635_v58  ;;  %v1689_v7 = vrot.slane %v2244_v56, %v2421_v14  ;;  %v1638_v18 = vcombine.low %v1628_v9, %v1635_v58  ;;  %v146_v23 = vcombine.high %v2472_v44, %v2472_v44 }
  0x81   :  { %v1653_v25 = vrot.slane %v1637_v4, %v2421_v14  ;;  %v1675_v8 = vcombine.low %v2743_v20, %v1019_v3  ;;  %v1696_v21 = vrot.slane %v1674_v5, %v2421_v14  ;;  %v1646_v27 = vrot.slane %v1636_v6, %v2421_v14 }
  0x82   :  { %v1667_v43 = vrot.slane %v1639_v41, %v2421_v14  ;;  %v1705_v42 = vcombine.high %v1682_v61, %v1689_v7  ;;  %v1660_v26 = vrot.slane %v1638_v18, %v2421_v14  ;;  %v1704_v29 = vcombine.low %v1682_v61, %v1689_v7 }
  0x83   :  { %v1703_v22 = vrot.slane %v1675_v8, %v2421_v14  ;;  %v270_v30 = vrot.slane %v144_v28, %v2453_v31  ;;  %v274_v44 = vrot.slane %v144_v28, %v2455_v37  ;;  %v278_v32 = vrot.slane %v144_v28, %v2457_v38 }
  0x84   :  { %v1670_v53 = vcombine.low %v1653_v25, %v1667_v43  ;;  %v1721_v51 = vrot.slane %v1705_v42, %v2421_v14  ;;  %v1671_v36 = vcombine.high %v1653_v25, %v1667_v43  ;;  %v1668_v24 = vcombine.low %v1646_v27, %v1660_v26 }
  0x85   :  { %v1707_v54 = vcombine.high %v1696_v21, %v1703_v22  ;;  %v1706_v40 = vcombine.low %v1696_v21, %v1703_v22  ;;  %v1714_v55 = vrot.slane %v1704_v29, %v2421_v14  ;;  %v1669_v49 = vcombine.high %v1646_v27, %v1660_v26 }
  0x86   :  { %v282_v59 = vrot.slane %v144_v28, %v2459_v39  ;;  %v2768_v60 = vrot.slane %v146_v23, %v2453_v31  ;;  %v2771_v1 = vrot.slane %v146_v23, %v2455_v37  ;;  %v2774_v2 = vrot.slane %v146_v23, %v2457_v38 }
  0x87   :  { %v1735_v50 = vrot.slane %v1707_v54, %v2421_v14  ;;  %v1728_v9 = vrot.slane %v1706_v40, %v2421_v14  ;;  %v2779_v58 = vrot.slane %v146_v23, %v2459_v39  ;;  %v395_v56 = vmul.f32 %v2665_v62, %v2413_v10 }
  0x88   :  { %v396_v31 = vmul.f32 %v2669_v63, %v2415_v11  ;;  %v397_v37 = vmul.f32 %v2673_v52, %v2417_v12  ;;  %v398_v38 = vmul.f32 %v2677_v0, %v2419_v13  ;;  %v399_v61 = vmul.f32 %v270_v30, %v2424_v15 }
  0x89   :  { %v1738_v28 = vcombine.low %v1721_v51, %v1735_v50  ;;  %v1739_v3 = vcombine.high %v1721_v51, %v1735_v50  ;;  %v1736_v4 = vcombine.low %v1714_v55, %v1728_v9  ;;  %v1737_v5 = vcombine.high %v1714_v55, %v1728_v9 }
  0x8a   :  { %v400_v39 = vmul.f32 %v274_v44, %v2427_v16  ;;  %v401_v6 = vmul.f32 %v278_v32, %v2430_v17  ;;  %v402_v62 = vmul.f32 %v282_v59, %v2435_v19  ;;  %v403_v63 = vmul.f32 %v270_v30, %v2413_v10 }
  0x8b   :  { %v2257_v41 = vpack.c.bf16 %v1738_v28, %v1670_v53  ;;  %v2277_v7 = vpack.c.bf16 %v1739_v3, %v1671_v36  ;;  %v2259_v52 = vpack.c.bf16 %v1736_v4, %v1668_v24  ;;  %v2279_v18 = vpack.c.bf16 %v1737_v5, %v1669_v49 }
  0x8c   :  { %v404_v0 = vmul.f32 %v274_v44, %v2415_v11  ;;  %v405_v23 = vmul.f32 %v278_v32, %v2417_v12  ;;  %v406_v25 = vmul.f32 %v282_v59, %v2419_v13  ;;  %v2799_v8 = vmul.f32 %v2768_v60, %v2424_v15 }
  0x8d   :  { %2258 = vmatprep.subr.bf16.mxu0 %v2257_v41  ;;  %2278 = vmatprep.subr.bf16.mxu1 %v2277_v7  ;;  %v2803_v21 = vmul.f32 %v2771_v1, %v2427_v16  ;;  %v2807_v27 = vmul.f32 %v2774_v2, %v2430_v17  ;;  %v2811_v43 = vmul.f32 %v2779_v58, %v2435_v19 }
  0x8e   :  { %2260 = vmatpush1.bf16.xpose.msra.mxu0 %v2259_v52  ;;  %2280 = vmatpush1.bf16.xpose.msra.mxu1 %v2279_v18  ;;  %v956_v42 = vcombine.high %v2701_v33, %v2705_v35  ;;  %v958_v26 = vcombine.high %v2709_v57, %v2713_v34  ;;  %v1021_v29 = vcombine.high %v2743_v20, %v2743_v20 }
  0x8f   :  { %v1023_v22 = vcombine.low %v395_v56, %v396_v31  ;;  %v1024_v30 = vcombine.low %v397_v37, %v398_v38  ;;  %v1047_v44 = vcombine.low %v399_v61, %v400_v39  ;;  %v1048_v32 = vcombine.high %v399_v61, %v400_v39 }
  0x90   :  { %v972_v53 = vrot.slane %v956_v42, %v2421_v14  ;;  %v986_v51 = vrot.slane %v958_v26, %v2421_v14  ;;  %v1049_v36 = vcombine.low %v401_v6, %v402_v62  ;;  %v1050_v24 = vcombine.high %v401_v6, %v402_v62 }
  0x91   :  { %v1031_v54 = vrot.slane %v1023_v22, %v2421_v14  ;;  %v1038_v33 = vrot.slane %v1024_v30, %v2421_v14  ;;  %v1057_v35 = vrot.slane %v1047_v44, %v2421_v14  ;;  %v1064_v57 = vrot.slane %v1048_v32, %v2421_v14 }
  0x92   :  { %v989_v34 = vcombine.low %v972_v53, %v986_v51  ;;  %v990_v20 = vcombine.high %v972_v53, %v986_v51  ;;  %v1071_v40 = vrot.slane %v1049_v36, %v2421_v14  ;;  %v1078_v55 = vrot.slane %v1050_v24, %v2421_v14 }
  0x93   :  { %v1039_v49 = vcombine.low %v1031_v54, %v1038_v33  ;;  %v1115_v59 = vcombine.low %v403_v63, %v404_v0  ;;  %v1116_v50 = vcombine.low %v405_v23, %v406_v25  ;;  %v1139_v9 = vcombine.low %v2799_v8, %v2803_v21 }
  0x94   :  { %v1004_v56 = vrot.slane %v989_v34, %v2421_v14  ;;  %v1018_v31 = vrot.slane %v990_v20, %v2421_v14  ;;  %v1079_v37 = vcombine.low %v1057_v35, %v1071_v40  ;;  %v1080_v38 = vcombine.high %v1057_v35, %v1071_v40 }
  0x95   :  { %v1046_v61 = vrot.slane %v1039_v49, %v2421_v14  ;;  %v1081_v28 = vcombine.low %v1064_v57, %v1078_v55  ;;  %v1082_v3 = vcombine.high %v1064_v57, %v1078_v55  ;;  %v1123_v4 = vrot.slane %v1115_v59, %v2421_v14 }
  0x96   :  { %v1020_v5 = vcombine.high %v1004_v56, %v1004_v56  ;;  %v1022_v39 = vcombine.high %v1018_v31, %v1018_v31  ;;  %v1089_v6 = vrot.slane %v1079_v37, %v2421_v14  ;;  %v1103_v62 = vrot.slane %v1080_v38, %v2421_v14 }
  0x97   :  { %v1096_v63 = vrot.slane %v1081_v28, %v2421_v14  ;;  %v1110_v41 = vrot.slane %v1082_v3, %v2421_v14  ;;  %v1130_v7 = vrot.slane %v1116_v50, %v2421_v14  ;;  %v1141_v52 = vcombine.low %v2807_v27, %v2811_v43 }
  0x98   :  { %v1149_v18 = vrot.slane %v1139_v9, %v2421_v14  ;;  %v1740_v0 = vcombine.low %v1021_v29, %v1004_v56  ;;  %v1741_v23 = vcombine.low %v1018_v31, %v1020_v5  ;;  %v1742_v25 = vcombine.low %v1022_v39, %v1046_v61 }
  0x99   :  { %v1131_v42 = vcombine.low %v1123_v4, %v1130_v7  ;;  %v1163_v26 = vrot.slane %v1141_v52, %v2421_v14  ;;  %v1743_v22 = vcombine.low %v1089_v6, %v1103_v62  ;;  %v2245_v30 = vcombine.high %v1089_v6, %v1103_v62 }
  0x9a   :  { %v1750_v44 = vrot.slane %v1740_v0, %v2421_v14  ;;  %v1757_v32 = vrot.slane %v1741_v23, %v2421_v14  ;;  %v1764_v53 = vrot.slane %v1742_v25, %v2421_v14  ;;  %v1809_v51 = vcombine.low %v1096_v63, %v1110_v41 }
  0x9b   :  { %v1138_v36 = vrot.slane %v1131_v42, %v2421_v14  ;;  %v1171_v24 = vcombine.low %v1149_v18, %v1163_v26  ;;  %v1771_v54 = vrot.slane %v1743_v22, %v2421_v14  ;;  %v2246_v29 = vcombine.high %v1096_v63, %v1110_v41 }
  0x9c   :  { %v1773_v33 = vcombine.high %v1750_v44, %v1757_v32  ;;  %v1818_v35 = vrot.slane %v2245_v30, %v2421_v14  ;;  %v1825_v57 = vrot.slane %v1809_v51, %v2421_v14  ;;  %v1772_v34 = vcombine.low %v1750_v44, %v1757_v32 }
  0x9d   :  { %v2850_v20 = vrot.slane %v1171_v24, %v2421_v14  ;;  %v1775_v40 = vcombine.high %v1764_v53, %v1771_v54  ;;  %v1832_v55 = vrot.slane %v2246_v29, %v2421_v14  ;;  %v1774_v49 = vcombine.low %v1764_v53, %v1771_v54 }
  0x9e   :  { %v1789_v59 = vrot.slane %v1773_v33, %v2421_v14  ;;  %v1841_v50 = vcombine.high %v1818_v35, %v1825_v57  ;;  %v1782_v9 = vrot.slane %v1772_v34, %v2421_v14  ;;  %v1840_v56 = vcombine.low %v1818_v35, %v1825_v57 }
  0x9f   :  { %v1803_v31 = vrot.slane %v1775_v40, %v2421_v14  ;;  %v1811_v37 = vcombine.low %v1138_v36, %v2850_v20  ;;  %v1796_v38 = vrot.slane %v1774_v49, %v2421_v14  ;;  %v411_v61 = vmul.f32 %v2768_v60, %v2413_v10 }
  0xa0   :  { %v1857_v28 = vrot.slane %v1841_v50, %v2421_v14  ;;  %v1850_v3 = vrot.slane %v1840_v56, %v2421_v14  ;;  %v412_v4 = vmul.f32 %v2771_v1, %v2415_v11  ;;  %v413_v5 = vmul.f32 %v2774_v2, %v2417_v12 }
  0xa1   :  { %v1806_v39 = vcombine.low %v1789_v59, %v1803_v31  ;;  %v1839_v6 = vrot.slane %v1811_v37, %v2421_v14  ;;  %v1807_v62 = vcombine.high %v1789_v59, %v1803_v31  ;;  %v1804_v63 = vcombine.low %v1782_v9, %v1796_v38 }
  0xa2   :  { %v1805_v41 = vcombine.high %v1782_v9, %v1796_v38  ;;  %v414_v7 = vmul.f32 %v2779_v58, %v2419_v13  ;;  %v415_v60 = vmul.f32 %v2475_v45, %v2424_v15  ;;  %v416_v52 = vmul.f32 %v2478_v46, %v2427_v16 }
  0xa3   :  { %v1843_v0 = vcombine.high %v1832_v55, %v1839_v6  ;;  %v1842_v1 = vcombine.low %v1832_v55, %v1839_v6  ;;  %v417_v2 = vmul.f32 %v2481_v47, %v2430_v17  ;;  %v418_v23 = vmul.f32 %v2484_v48, %v2435_v19 }
  0xa4   :  { %v1140_v25 = vcombine.high %v2799_v8, %v2803_v21  ;;  %v1142_v58 = vcombine.high %v2807_v27, %v2811_v43  ;;  %v1172_v42 = vcombine.high %v1149_v18, %v1163_v26  ;;  %v1203_v15 = vcombine.high %v2850_v20, %v2850_v20 }
  0xa5   :  { %v1871_v16 = vrot.slane %v1843_v0, %v2421_v14  ;;  %v1864_v22 = vrot.slane %v1842_v1, %v2421_v14  ;;  %v1207_v30 = vcombine.low %v411_v61, %v412_v4  ;;  %v1208_v44 = vcombine.low %v413_v5, %v414_v7 }
  0xa6   :  { %v1156_v17 = vrot.slane %v1140_v25, %v2421_v14  ;;  %v1170_v19 = vrot.slane %v1142_v58, %v2421_v14  ;;  %v1195_v32 = vrot.slane %v1172_v42, %v2421_v14  ;;  %v1231_v8 = vcombine.low %v415_v60, %v416_v52 }
  0xa7   :  { %v1874_v21 = vcombine.low %v1857_v28, %v1871_v16  ;;  %v1875_v53 = vcombine.high %v1857_v28, %v1871_v16  ;;  %v1872_v27 = vcombine.low %v1850_v3, %v1864_v22  ;;  %v1873_v43 = vcombine.high %v1850_v3, %v1864_v22 }
  0xa8   :  { %v1173_v18 = vcombine.low %v1156_v17, %v1170_v19  ;;  %v1174_v26 = vcombine.high %v1156_v17, %v1170_v19  ;;  %v1205_v51 = vcombine.high %v1195_v32, %v1195_v32  ;;  %v1215_v36 = vrot.slane %v1207_v30, %v2421_v14 }
  0xa9   :  { %v2261_v24 = vpack.c.bf16 %v1874_v21, %v1806_v39  ;;  %v2281_v54 = vpack.c.bf16 %v1875_v53, %v1807_v62  ;;  %v2263_v29 = vpack.c.bf16 %v1872_v27, %v1804_v63  ;;  %v2283_v33 = vpack.c.bf16 %v1873_v43, %v1805_v41 }
  0xaa   :  { %v1188_v35 = vrot.slane %v1173_v18, %v2421_v14  ;;  %v1202_v57 = vrot.slane %v1174_v26, %v2421_v14  ;;  %v1222_v34 = vrot.slane %v1208_v44, %v2421_v14  ;;  %v1232_v20 = vcombine.high %v415_v60, %v416_v52 }
  0xab   :  { %2262 = vmatprep.subr.bf16.mxu0 %v2261_v24  ;;  %2282 = vmatprep.subr.bf16.mxu1 %v2281_v54  ;;  %v1233_v40 = vcombine.low %v417_v2, %v418_v23  ;;  %v1234_v55 = vcombine.high %v417_v2, %v418_v23  ;;  %v1241_v49 = vrot.slane %v1231_v8, %v2421_v14  ;;  %v1325_v24 = vld [vmem:[#allocation5 + $0x8] sm:$0xff] }
  0xac   :  { %2264 = vmatpush1.bf16.xpose.msra.mxu0 %v2263_v29  ;;  %2284 = vmatpush1.bf16.xpose.msra.mxu1 %v2283_v33  ;;  %v1204_v59 = vcombine.high %v1188_v35, %v1188_v35  ;;  %v1206_v50 = vcombine.high %v1202_v57, %v1202_v57  ;;  %v1223_v9 = vcombine.low %v1215_v36, %v1222_v34  ;;  %v1324_v36 = vld [vmem:[#allocation5] sm:$0xff] }
  0xad   :  { %v1248_v56 = vrot.slane %v1232_v20, %v2421_v14  ;;  %v1255_v31 = vrot.slane %v1233_v40, %v2421_v14  ;;  %v1262_v37 = vrot.slane %v1234_v55, %v2421_v14  ;;  %v1876_v38 = vcombine.low %v1195_v32, %v1203_v15 }
  0xae   :  { %v1230_v61 = vrot.slane %v1223_v9, %v2421_v14  ;;  %v1877_v28 = vcombine.low %v1205_v51, %v1188_v35  ;;  %v1878_v3 = vcombine.low %v1202_v57, %v1204_v59  ;;  %v419_v4 = vmul.f32 %v2475_v45, %v2413_v10 }
  0xaf   :  { %v1263_v5 = vcombine.low %v1241_v49, %v1255_v31  ;;  %v1264_v39 = vcombine.high %v1241_v49, %v1255_v31  ;;  %v1265_v6 = vcombine.low %v1248_v56, %v1262_v37  ;;  %v1266_v62 = vcombine.high %v1248_v56, %v1262_v37 }
  0xb0   :  { %v1879_v63 = vcombine.low %v1206_v50, %v1230_v61  ;;  %v1886_v41 = vrot.slane %v1876_v38, %v2421_v14  ;;  %v1893_v7 = vrot.slane %v1877_v28, %v2421_v14  ;;  %v1900_v60 = vrot.slane %v1878_v3, %v2421_v14 }
  0xb1   :  { %v1273_v52 = vrot.slane %v1263_v5, %v2421_v14  ;;  %v1280_v0 = vrot.slane %v1265_v6, %v2421_v14  ;;  %v1287_v1 = vrot.slane %v1264_v39, %v2421_v14  ;;  %v1294_v2 = vrot.slane %v1266_v62, %v2421_v14 }
  0xb2   :  { %v1907_v10 = vrot.slane %v1879_v63, %v2421_v14  ;;  %v1909_v45 = vcombine.high %v1886_v41, %v1893_v7  ;;  %v1908_v23 = vcombine.low %v1886_v41, %v1893_v7  ;;  %v420_v25 = vmul.f32 %v2478_v46, %v2415_v11 }
  0xb3   :  { %v1944_v58 = vcombine.low %v1273_v52, %v1287_v1  ;;  %v2247_v42 = vcombine.high %v1273_v52, %v1287_v1  ;;  %v1946_v15 = vcombine.low %v1280_v0, %v1294_v2  ;;  %v2248_v16 = vcombine.high %v1280_v0, %v1294_v2 }
  0xb4   :  { %v1911_v22 = vcombine.high %v1900_v60, %v1907_v10  ;;  %v1925_v30 = vrot.slane %v1909_v45, %v2421_v14  ;;  %v1910_v44 = vcombine.low %v1900_v60, %v1907_v10  ;;  %v1918_v17 = vrot.slane %v1908_v23, %v2421_v14  ;;  %v1323_v60 = vld [vmem:[#allocation7] sm:$0xf] }
  0xb5   :  { %v1954_v19 = vrot.slane %v1944_v58, %v2421_v14  ;;  %v1961_v32 = vrot.slane %v2247_v42, %v2421_v14  ;;  %v1968_v8 = vrot.slane %v1946_v15, %v2421_v14  ;;  %v1975_v21 = vrot.slane %v2248_v16, %v2421_v14 }
  0xb6   :  { %v1939_v11 = vrot.slane %v1911_v22, %v2421_v14  ;;  %v1932_v46 = vrot.slane %v1910_v44, %v2421_v14  ;;  %v421_v53 = vmul.f32 %v2481_v47, %v2417_v12  ;;  %v422_v27 = vmul.f32 %v2484_v48, %v2419_v13 }
  0xb7   :  { %v1977_v43 = vcombine.high %v1954_v19, %v1961_v32  ;;  %v1979_v18 = vcombine.high %v1968_v8, %v1975_v21  ;;  %v1976_v26 = vcombine.low %v1954_v19, %v1961_v32  ;;  %v1978_v51 = vcombine.low %v1968_v8, %v1975_v21 }
  0xb8   :  { %v1942_v54 = vcombine.low %v1925_v30, %v1939_v11  ;;  %v1943_v29 = vcombine.high %v1925_v30, %v1939_v11  ;;  %v1940_v33 = vcombine.low %v1918_v17, %v1932_v46  ;;  %v1941_v35 = vcombine.high %v1918_v17, %v1932_v46 }
  0xb9   :  { %v1993_v57 = vrot.slane %v1977_v43, %v2421_v14  ;;  %v2007_v34 = vrot.slane %v1979_v18, %v2421_v14  ;;  %v1986_v20 = vrot.slane %v1976_v26, %v2421_v14  ;;  %v2000_v12 = vrot.slane %v1978_v51, %v2421_v14 }
  0xba   :  { %v1299_v47 = vcombine.low %v419_v4, %v420_v25  ;;  %v1300_v13 = vcombine.low %v421_v53, %v422_v27  ;;  %v1328_v48 = vcombine.high %v1324_v36, %v1324_v36  ;;  %v1329_v40 = vcombine.high %v1325_v24, %v1325_v24 }
  0xbb   :  { %v2010_v55 = vcombine.low %v1993_v57, %v2007_v34  ;;  %v2011_v49 = vcombine.high %v1993_v57, %v2007_v34  ;;  %v2008_v59 = vcombine.low %v1986_v20, %v2000_v12  ;;  %v2009_v50 = vcombine.high %v1986_v20, %v2000_v12 }
  0xbc   :  { %v1307_v9 = vrot.slane %v1299_v47, %v2421_v14  ;;  %v1314_v56 = vrot.slane %v1300_v13, %v2421_v14  ;;  %2144 = vmatprep.mubr.f32.mxu0 %v1328_v48  ;;  %2214 = vmatprep.mubr.f32.mxu1 %v1329_v40 }
  0xbd   :  { %v2265_v31 = vpack.c.bf16 %v2010_v55, %v1942_v54  ;;  %v2285_v37 = vpack.c.bf16 %v2011_v49, %v1943_v29  ;;  %v2267_v38 = vpack.c.bf16 %v2008_v59, %v1940_v33  ;;  %v2287_v61 = vpack.c.bf16 %v2009_v50, %v1941_v35 }
  0xbe   :  { %v1315_v28 = vcombine.low %v1307_v9, %v1314_v56 }
  0xbf   :  { %2266 = vmatprep.subr.bf16.mxu0 %v2265_v31  ;;  %2286 = vmatprep.subr.bf16.mxu1 %v2285_v37 }
  0xc0   :  { %2268 = vmatpush1.bf16.xpose.msra.mxu0 %v2267_v38  ;;  %2288 = vmatpush1.bf16.xpose.msra.mxu1 %v2287_v61  ;;  %v1322_v3 = vrot.slane %v1315_v28, %v2421_v14 }
  0xc2   :  { %v2018_v4 = vrot.slane %v1322_v3, %v2421_v14 }
  0xc4   :  { %v2019_v5 = vcombine.high %v2018_v4, %v2018_v4  ;;  %v2026_v39 = vrot.slane %v2018_v4, %v2421_v14 }
  0xc6   :  { %v2033_v6 = vrot.slane %v2019_v5, %v2421_v14  ;;  %v2034_v62 = vcombine.high %v2026_v39, %v2026_v39 }
  0xc8   :  { %2100 = vmatprep.subr.mxu0 %v2033_v6  ;;  %v2035_v63 = vcombine.high %v2033_v6, %v2033_v6 }
  0xc9   :  { %2101 = vmatpush1.xpose.msra.mxu0 %v2026_v39 }
  0xca   :  { %2170 = vmatprep.subr.mxu1 %v2035_v63 }
  0xcb   :  { %2171 = vmatpush1.xpose.msra.mxu1 %v2034_v62 }
  0xcc   :  { %2145 = vmatmul.mubr.f32.vlgmr.msra.gmra.mrb[0].mxu0 %v1324_v36 }
  0xce   :  { %2215 = vmatmul.mubr.f32.vlgmr.msra.gmra.mrb[0].mxu1 %v1325_v24 }
 0x19f   :  { %v2146_v41 = vpop.f32.mrb[0].mxu0 }
 0x1a0   :  { %v2148_v7 = vpop.f32.mrb[1].mxu0 }
 0x1a1   :  { %v2216_v52 = vpop.f32.mrb[0].mxu1 }
 0x1a2   :  { %v2217_v0 = vadd.f32 %v2216_v52, %v2146_v41  ;;  %v2218_v1 = vpop.f32.mrb[1].mxu1 }
 0x1a4   :  { %v2220_v2 = vadd.f32 %v2217_v0, %v1323_v60 }
 0x1a6   :  { %2222 = vst.msk [vmem:[#allocation7] sm:$0xf] %vm52_vm0, %v2220_v2 }
 0x1a7   :  { %2351 = shalt.err (!%p2348_p6)
}
 0x1a8   :  { %s2352_s8 = scalar_lea.hbm %s2946_s2, 64 }
 0x1a9   :  { %p2353_p7 = scmp.ne.s32.totalorder %s2946_s2, %s2352_s8  ;;  %p2356_p8 = scmp.lt.u32.totalorder %s2352_s8, %s2946_s2 }
 0x1ab   :  { %p2358_p9 = pnand %p2356_p8, %p2353_p7 }
 0x1ad   :  { %2361 = shalt.err (!%p2358_p9)
}
 0x1ae   :  { %2232 = dma.vmem_to_hbm [thread:$0]  %s2230_s4, 64, %s2946_s2, [#allocation4]  }
 0x1af   :  { %2366 = dma.done.wait [#allocation4], 64  }
 0x1b0   :  { %2367 = vsyncadd [#allocation4], 4294967232 }
 0x1b1   :  { %2236 = vsyncpa [#allocation3], 1 }
 0x1b2   :  { %2237 = vsyncpa [#allocation6], 1 }
 0x1b3   :  { %2238 = vsyncpa [#allocation4], 1 }

// kernel: gmm_loss.3
= control target key start
LH: loop header
LB: loop body
LE: loop exit
PB: predicated region body
PF: predicated region fallthrough
CT: control target
= control target key end

     0   :  { %7 = vsyncpa [#allocation3], 0  ;;  %s3081_s0 = inlined_call_operand.hbm [shape: f32[8,512], index: 0, kind: input, shape index: {}]   ;;  %s3082_s1 = inlined_call_operand.hbm [shape: f32[4,82], index: 1, kind: input, shape index: {}]   ;;  %s3083_s2 = inlined_call_operand.hbm [shape: f32[1,1,1], index: 2, kind: output, shape index: {}]  }
   0x1   :  { %8 = vsyncpa [#allocation6], 0 }
   0x2   :  { %9 = vsyncpa [#allocation4], 0  ;;  %s2491_s9 = smov [#allocation2]   ;;  %s2492_s11 = smov [#allocation5]  }
   0x3   :  { %s20_s10 = sshll.u32 %s2491_s9, 4  ;;  %s30_s12 = sshll.u32 %s2492_s11, 4  ;;  %s21_s10 = int_to_ptr.vmem [resolvable:$true] %s20_s10  ;;  %s31_s12 = int_to_ptr.vmem [resolvable:$true] %s30_s12 }
   0x4   :  { %s2419_s15 = scalar_lea.hbm %s3081_s0, 512 }
   0x5   :  { %p2420_p0 = scmp.ne.s32.totalorder %s3081_s0, %s2419_s15  ;;  %p2423_p1 = scmp.lt.u32.totalorder %s2419_s15, %s3081_s0 }
   0x7   :  { %p2425_p2 = pnand %p2423_p1, %p2420_p0 }
   0x9   :  { %2428 = shalt.err (!%p2425_p2)
}
   0xa   :  { %s2429_s20 = scalar_lea.vmem %s21_s10, 512  ;;  %p2434_p4 = scmp.lt.s32.totalorder %s21_s10, %s21_s10 }
   0xb   :  { %p2430_p3 = scmp.ne.s32.totalorder %s21_s10, %s2429_s20  ;;  %p2435_p5 = scmp.lt.s32.totalorder %s2429_s20, %s2429_s20 }
   0xd   :  { %p2436_p6 = por %p2435_p5, %p2434_p4 }
   0xf   :  { %p2437_p7 = pnand %p2436_p6, %p2430_p3 }
  0x11   :  { %2440 = shalt.err (!%p2437_p7)
}
  0x12   :  { %23 = dma.hbm_to_vmem [thread:$0]  %s3081_s0, 512, %s21_s10, [#allocation3]  }
  0x13   :  { %s2441_s25 = scalar_lea.hbm %s3082_s1, 64 }
  0x14   :  { %p2442_p8 = scmp.ne.s32.totalorder %s3082_s1, %s2441_s25  ;;  %p2445_p9 = scmp.lt.u32.totalorder %s2441_s25, %s3082_s1 }
  0x16   :  { %p2447_p10 = pnand %p2445_p9, %p2442_p8 }
  0x18   :  { %2450 = shalt.err (!%p2447_p10)
}
  0x19   :  { %s2451_s30 = scalar_lea.vmem %s31_s12, 64  ;;  %p2456_p12 = scmp.lt.s32.totalorder %s31_s12, %s31_s12 }
  0x1a   :  { %p2452_p11 = scmp.ne.s32.totalorder %s31_s12, %s2451_s30  ;;  %p2457_p13 = scmp.lt.s32.totalorder %s2451_s30, %s2451_s30 }
  0x1c   :  { %p2458_p0 = por %p2457_p13, %p2456_p12 }
  0x1e   :  { %p2459_p1 = pnand %p2458_p0, %p2452_p11 }
  0x20   :  { %2462 = shalt.err (!%p2459_p1)
}
  0x21   :  { %33 = dma.hbm_to_vmem [thread:$0]  %s3082_s1, 64, %s31_s12, [#allocation6]  }
  0x22   :  { %2485 = dma.done.wait [#allocation3], 512  }
  0x23   :  { %2486 = vsyncadd [#allocation3], 4294966784 }
  0x24   :  { %2487 = dma.done.wait [#allocation6], 64  }
  0x25   :  { %2488 = vsyncadd [#allocation6], 4294967232  ;;  %v2493_v0 = vmov 1966171168   ;;  %v80_v2 = vlaneseq  ;;  %v48_v5 = vld [vmem:[#allocation2] sm:$0xff]  ;;  %v49_v6 = vld [vmem:[#allocation2 + $0x8] sm:$0xff] }
  0x26   :  { %v78_v1 = vunpack.c.l.s4 %v2493_v0  ;;  %v50_v7 = vld [vmem:[#allocation2 + $0x10] sm:$0xff]  ;;  %vm64_vm0 = vcmask 1040384   ;;  %v51_v8 = vld [vmem:[#allocation2 + $0x18] sm:$0xff]  ;;  %v2536_v9 = vrot.slane %v48_v5, 7  ;;  %v2538_v10 = vrot.slane %v49_v6, 7  ;;  %s2496_s1 = smov [#allocation7]  }
  0x27   :  { %v81_v4 = vshrl.u32 %v80_v2, 7  ;;  %v2540_v11 = vrot.slane %v50_v7, 7  ;;  %v2542_v12 = vrot.slane %v51_v8, 7  ;;  %vm46_vm1 = vcmask 0   ;;  %s2330_s4 = sshll.u32 %s2496_s1, 4  ;;  %s2331_s4 = int_to_ptr.vmem [resolvable:$true] %s2330_s4 }
  0x28   :  { %v79_v3 = vunpack.c.0.s8 %v78_v1  ;;  %v2548_v14 = vsel %vm64_vm0, 1.0, %v2536_v9  ;;  %v2552_v15 = vsel %vm64_vm0, 1.0, %v2538_v10  ;;  %v141_v17 = vcombine.low %v2536_v9, %v2538_v10  ;;  %s2463_s5 = scalar_lea.vmem %s2331_s4, 16  ;;  %s2467_s6 = scalar_lea.vmem %s2331_s4, 32 }
  0x29   :  { %v2556_v16 = vsel %vm64_vm0, 1.0, %v2540_v11  ;;  %v2562_v18 = vsel %vm64_vm0, 1.0, %v2542_v12  ;;  %v73_v19 = vcombine.low %v2548_v14, %v2552_v15  ;;  %v74_v20 = vcombine.high %v2548_v14, %v2552_v15  ;;  %p2464_p2 = scmp.ne.s32.totalorder %s2331_s4, %s2463_s5  ;;  %p2468_p3 = scmp.lt.s32.totalorder %s2331_s4, %s2331_s4 }
  0x2a   :  { %v2544_v13 = vsub.s32 %v79_v3, %v81_v4  ;;  %v142_v21 = vcombine.low %v2540_v11, %v2542_v12  ;;  %v75_v22 = vcombine.low %v2556_v16, %v2562_v18  ;;  %v76_v23 = vcombine.high %v2556_v16, %v2562_v18  ;;  %p2469_p4 = scmp.lt.s32.totalorder %s2467_s6, %s2463_s5 }
  0x2b   :  { %v2580_v30 = vsub.s32 0, %v81_v4  ;;  %v2582_v36 = vsub.s32 1, %v81_v4  ;;  %v2584_v37 = vsub.s32 2, %v81_v4  ;;  %v2586_v38 = vsub.s32 3, %v81_v4 }
  0x2c   :  { %v149_v24 = vrot.slane %v141_v17, %v2544_v13  ;;  %v83_v25 = vrot.slane %v73_v19, %v2544_v13  ;;  %v90_v26 = vrot.slane %v74_v20, %v2544_v13  ;;  %v156_v27 = vrot.slane %v142_v21, %v2544_v13  ;;  %p2470_p5 = por %p2469_p4, %p2468_p3 }
  0x2d   :  { %v97_v28 = vrot.slane %v75_v22, %v2544_v13  ;;  %v104_v29 = vrot.slane %v76_v23, %v2544_v13  ;;  %vm2062_vm2 = vcmask 662528   ;;  %vm2232_vm3 = vcmask 1043456  }
  0x2e   :  { %v157_v31 = vcombine.low %v149_v24, %v156_v27  ;;  %p2471_p6 = pnand %p2470_p5, %p2464_p2 }
  0x2f   :  { %v105_v32 = vcombine.low %v83_v25, %v97_v28  ;;  %v106_v33 = vcombine.high %v83_v25, %v97_v28  ;;  %v107_v34 = vcombine.low %v90_v26, %v104_v29  ;;  %v108_v35 = vcombine.high %v90_v26, %v104_v29 }
  0x30   :  { %v164_v39 = vrot.slane %v157_v31, %v2544_v13 }
  0x31   :  { %v2590_v40 = vrot.slane %v105_v32, %v2544_v13  ;;  %v2593_v41 = vrot.slane %v106_v33, %v2544_v13  ;;  %v2596_v42 = vrot.slane %v107_v34, %v2544_v13  ;;  %v2599_v43 = vrot.slane %v108_v35, %v2544_v13 }
  0x32   :  { %v2602_v44 = vrot.slane %v164_v39, %v2580_v30  ;;  %v2605_v45 = vrot.slane %v164_v39, %v2582_v36  ;;  %v2608_v46 = vrot.slane %v164_v39, %v2584_v37  ;;  %v2611_v47 = vrot.slane %v164_v39, %v2586_v38 }
  0x33   :  { %v168_v48 = vrot.slane %v2590_v40, %v2580_v30  ;;  %v172_v49 = vrot.slane %v2590_v40, %v2582_v36  ;;  %v176_v50 = vrot.slane %v2590_v40, %v2584_v37  ;;  %v180_v51 = vrot.slane %v2590_v40, %v2586_v38 }
  0x34   :  { %v2623_v52 = vrot.slane %v2593_v41, %v2580_v30  ;;  %v2627_v53 = vrot.slane %v2593_v41, %v2582_v36  ;;  %v2631_v54 = vrot.slane %v2593_v41, %v2584_v37  ;;  %v2635_v55 = vrot.slane %v2593_v41, %v2586_v38 }
  0x35   :  { %v345_v56 = vmul.f32 %v168_v48, %v2548_v14  ;;  %v346_v57 = vmul.f32 %v172_v49, %v2552_v15  ;;  %v347_v58 = vmul.f32 %v176_v50, %v2556_v16  ;;  %v348_v59 = vmul.f32 %v180_v51, %v2562_v18 }
  0x36   :  { %v349_v60 = vmul.f32 %v168_v48, %v2536_v9  ;;  %v350_v61 = vmul.f32 %v172_v49, %v2538_v10  ;;  %v351_v62 = vmul.f32 %v176_v50, %v2540_v11  ;;  %v352_v63 = vmul.f32 %v180_v51, %v2542_v12 }
  0x37   :  { %v353_v0 = vmul.f32 %v2623_v52, %v2548_v14  ;;  %v354_v1 = vmul.f32 %v2627_v53, %v2552_v15  ;;  %v355_v2 = vmul.f32 %v2631_v54, %v2556_v16  ;;  %v356_v3 = vmul.f32 %v2635_v55, %v2562_v18 }
  0x38   :  { %v489_v4 = vcombine.low %v345_v56, %v346_v57  ;;  %v490_v5 = vcombine.high %v345_v56, %v346_v57  ;;  %v491_v6 = vcombine.low %v347_v58, %v348_v59  ;;  %v492_v7 = vcombine.high %v347_v58, %v348_v59 }
  0x39   :  { %v557_v8 = vcombine.low %v349_v60, %v350_v61  ;;  %v558_v17 = vcombine.low %v351_v62, %v352_v63  ;;  %v581_v19 = vcombine.low %v353_v0, %v354_v1  ;;  %v582_v20 = vcombine.high %v353_v0, %v354_v1 }
  0x3a   :  { %v499_v21 = vrot.slane %v489_v4, %v2544_v13  ;;  %v506_v22 = vrot.slane %v490_v5, %v2544_v13  ;;  %v513_v23 = vrot.slane %v491_v6, %v2544_v13  ;;  %v520_v24 = vrot.slane %v492_v7, %v2544_v13 }
  0x3b   :  { %v565_v25 = vrot.slane %v557_v8, %v2544_v13  ;;  %v572_v26 = vrot.slane %v558_v17, %v2544_v13  ;;  %v583_v27 = vcombine.low %v355_v2, %v356_v3  ;;  %v584_v28 = vcombine.high %v355_v2, %v356_v3 }
  0x3c   :  { %v521_v29 = vcombine.low %v499_v21, %v513_v23  ;;  %v522_v31 = vcombine.high %v499_v21, %v513_v23  ;;  %v523_v32 = vcombine.low %v506_v22, %v520_v24  ;;  %v524_v33 = vcombine.high %v506_v22, %v520_v24 }
  0x3d   :  { %v573_v34 = vcombine.low %v565_v25, %v572_v26  ;;  %v591_v35 = vrot.slane %v581_v19, %v2544_v13  ;;  %v598_v39 = vrot.slane %v582_v20, %v2544_v13  ;;  %v605_v48 = vrot.slane %v583_v27, %v2544_v13 }
  0x3e   :  { %v531_v49 = vrot.slane %v521_v29, %v2544_v13  ;;  %v538_v50 = vrot.slane %v523_v32, %v2544_v13  ;;  %v545_v51 = vrot.slane %v522_v31, %v2544_v13  ;;  %v552_v56 = vrot.slane %v524_v33, %v2544_v13 }
  0x3f   :  { %v580_v57 = vrot.slane %v573_v34, %v2544_v13  ;;  %v612_v58 = vrot.slane %v584_v28, %v2544_v13  ;;  %v613_v59 = vcombine.low %v591_v35, %v605_v48  ;;  %v614_v60 = vcombine.high %v591_v35, %v605_v48 }
  0x40   :  { %v1318_v61 = vcombine.low %v531_v49, %v545_v51  ;;  %v2340_v62 = vcombine.high %v531_v49, %v545_v51  ;;  %v1320_v63 = vcombine.low %v538_v50, %v552_v56  ;;  %v2341_v0 = vcombine.high %v538_v50, %v552_v56 }
  0x41   :  { %v615_v1 = vcombine.low %v598_v39, %v612_v58  ;;  %v616_v2 = vcombine.high %v598_v39, %v612_v58  ;;  %v623_v3 = vrot.slane %v613_v59, %v2544_v13  ;;  %v637_v4 = vrot.slane %v614_v60, %v2544_v13 }
  0x42   :  { %v1328_v5 = vrot.slane %v1318_v61, %v2544_v13  ;;  %v1335_v6 = vrot.slane %v2340_v62, %v2544_v13  ;;  %v1342_v7 = vrot.slane %v1320_v63, %v2544_v13  ;;  %v1349_v8 = vrot.slane %v2341_v0, %v2544_v13 }
  0x43   :  { %v630_v17 = vrot.slane %v615_v1, %v2544_v13  ;;  %v2676_v19 = vrot.slane %v616_v2, %v2544_v13  ;;  %v645_v20 = vcombine.high %v623_v3, %v623_v3  ;;  %v647_v21 = vcombine.high %v637_v4, %v637_v4 }
  0x44   :  { %v1351_v22 = vcombine.high %v1328_v5, %v1335_v6  ;;  %v1353_v23 = vcombine.high %v1342_v7, %v1349_v8  ;;  %v1386_v24 = vcombine.low %v580_v57, %v623_v3  ;;  %v1350_v25 = vcombine.low %v1328_v5, %v1335_v6 }
  0x45   :  { %v646_v26 = vcombine.high %v630_v17, %v630_v17  ;;  %v648_v27 = vcombine.high %v2676_v19, %v2676_v19  ;;  %v1387_v28 = vcombine.low %v637_v4, %v645_v20  ;;  %v1388_v29 = vcombine.low %v647_v21, %v630_v17 }
  0x46   :  { %v1367_v31 = vrot.slane %v1351_v22, %v2544_v13  ;;  %v1381_v32 = vrot.slane %v1353_v23, %v2544_v13  ;;  %v1396_v33 = vrot.slane %v1386_v24, %v2544_v13  ;;  %v1352_v34 = vcombine.low %v1342_v7, %v1349_v8 }
  0x47   :  { %v1389_v35 = vcombine.low %v2676_v19, %v646_v26  ;;  %v1403_v39 = vrot.slane %v1387_v28, %v2544_v13  ;;  %v1410_v48 = vrot.slane %v1388_v29, %v2544_v13  ;;  %v1360_v49 = vrot.slane %v1350_v25, %v2544_v13 }
  0x48   :  { %v1384_v50 = vcombine.low %v1367_v31, %v1381_v32  ;;  %v1385_v51 = vcombine.high %v1367_v31, %v1381_v32  ;;  %v1374_v56 = vrot.slane %v1352_v34, %v2544_v13  ;;  %v137_v57 = vcombine.high %v2590_v40, %v2590_v40 }
  0x49   :  { %v1417_v58 = vrot.slane %v1389_v35, %v2544_v13  ;;  %v1419_v59 = vcombine.high %v1396_v33, %v1403_v39  ;;  %v1418_v60 = vcombine.low %v1396_v33, %v1403_v39  ;;  %v139_v61 = vcombine.high %v2593_v41, %v2593_v41 }
  0x4a   :  { %v1382_v62 = vcombine.low %v1360_v49, %v1374_v56  ;;  %v1383_v63 = vcombine.high %v1360_v49, %v1374_v56  ;;  %v200_v0 = vrot.slane %v137_v57, %v2580_v30  ;;  %v204_v1 = vrot.slane %v137_v57, %v2582_v36 }
  0x4b   :  { %v1421_v2 = vcombine.high %v1410_v48, %v1417_v58  ;;  %v1435_v3 = vrot.slane %v1419_v59, %v2544_v13  ;;  %v1420_v4 = vcombine.low %v1410_v48, %v1417_v58  ;;  %v1428_v5 = vrot.slane %v1418_v60, %v2544_v13 }
  0x4c   :  { %v208_v40 = vrot.slane %v137_v57, %v2584_v37  ;;  %v212_v6 = vrot.slane %v137_v57, %v2586_v38  ;;  %v2700_v7 = vrot.slane %v139_v61, %v2580_v30  ;;  %v2703_v41 = vrot.slane %v139_v61, %v2582_v36 }
  0x4d   :  { %v1449_v8 = vrot.slane %v1421_v2, %v2544_v13  ;;  %v1442_v17 = vrot.slane %v1420_v4, %v2544_v13  ;;  %v2708_v20 = vrot.slane %v139_v61, %v2584_v37  ;;  %v2711_v21 = vrot.slane %v139_v61, %v2586_v38 }
  0x4e   :  { %v357_v22 = vmul.f32 %v2623_v52, %v2536_v9  ;;  %v358_v23 = vmul.f32 %v2627_v53, %v2538_v10  ;;  %v359_v24 = vmul.f32 %v2631_v54, %v2540_v11  ;;  %v360_v25 = vmul.f32 %v2635_v55, %v2542_v12 }
  0x4f   :  { %v1452_v26 = vcombine.low %v1435_v3, %v1449_v8  ;;  %v1453_v28 = vcombine.high %v1435_v3, %v1449_v8  ;;  %v1450_v29 = vcombine.low %v1428_v5, %v1442_v17  ;;  %v1451_v31 = vcombine.high %v1428_v5, %v1442_v17 }
  0x50   :  { %v361_v32 = vmul.f32 %v200_v0, %v2548_v14  ;;  %v362_v33 = vmul.f32 %v204_v1, %v2552_v15  ;;  %v363_v34 = vmul.f32 %v208_v40, %v2556_v16  ;;  %v364_v52 = vmul.f32 %v212_v6, %v2562_v18 }
  0x51   :  { %v2356_v35 = vpack.c.bf16 %v1452_v26, %v1384_v50  ;;  %v2376_v53 = vpack.c.bf16 %v1453_v28, %v1385_v51  ;;  %v2358_v39 = vpack.c.bf16 %v1450_v29, %v1382_v62  ;;  %v2378_v48 = vpack.c.bf16 %v1451_v31, %v1383_v63 }
  0x52   :  { %v365_v54 = vmul.f32 %v200_v0, %v2536_v9  ;;  %v366_v55 = vmul.f32 %v204_v1, %v2538_v10  ;;  %v367_v49 = vmul.f32 %v208_v40, %v2540_v11  ;;  %v368_v56 = vmul.f32 %v212_v6, %v2542_v12 }
  0x53   :  { %2357 = vmatprep.subr.bf16.mxu0 %v2356_v35  ;;  %2377 = vmatprep.subr.bf16.mxu1 %v2376_v53  ;;  %v369_v57 = vmul.f32 %v2700_v7, %v2548_v14  ;;  %v370_v58 = vmul.f32 %v2703_v41, %v2552_v15  ;;  %v371_v50 = vmul.f32 %v2708_v20, %v2556_v16  ;;  %v2494_v1 = vmov 0.0  }
  0x54   :  { %2359 = vmatpush1.bf16.msra.mxu0 %v2358_v39  ;;  %2379 = vmatpush1.bf16.msra.mxu1 %v2378_v48  ;;  %v372_v51 = vmul.f32 %v2711_v21, %v2562_v18  ;;  %v649_v59 = vcombine.low %v357_v22, %v358_v23  ;;  %v650_v60 = vcombine.low %v359_v24, %v360_v25 }
  0x55   :  { %v673_v61 = vcombine.low %v361_v32, %v362_v33  ;;  %v674_v62 = vcombine.high %v361_v32, %v362_v33  ;;  %v675_v63 = vcombine.low %v363_v34, %v364_v52  ;;  %v676_v0 = vcombine.high %v363_v34, %v364_v52  ;;  %47 = vst.msk [vmem:[#allocation7] sm:$0x1] %vm46_vm1, %v2494_v1 }
  0x56   :  { %2138 = vmatprep.mubr.f32.mxu0 %v2494_v1  ;;  %v657_v2 = vrot.slane %v649_v59, %v2544_v13  ;;  %v664_v3 = vrot.slane %v650_v60, %v2544_v13  ;;  %v741_v4 = vcombine.low %v365_v54, %v366_v55  ;;  %v742_v5 = vcombine.low %v367_v49, %v368_v56 }
  0x57   :  { %2209 = vmatprep.mubr.f32.mxu1 %v2494_v1  ;;  %v683_v40 = vrot.slane %v673_v61, %v2544_v13  ;;  %v690_v6 = vrot.slane %v674_v62, %v2544_v13  ;;  %v697_v8 = vrot.slane %v675_v63, %v2544_v13  ;;  %v704_v17 = vrot.slane %v676_v0, %v2544_v13 }
  0x58   :  { %v665_v22 = vcombine.low %v657_v2, %v664_v3  ;;  %v749_v23 = vrot.slane %v741_v4, %v2544_v13  ;;  %v756_v24 = vrot.slane %v742_v5, %v2544_v13  ;;  %v765_v25 = vcombine.low %v369_v57, %v370_v58 }
  0x59   :  { %v705_v26 = vcombine.low %v683_v40, %v697_v8  ;;  %v706_v28 = vcombine.high %v683_v40, %v697_v8  ;;  %v707_v29 = vcombine.low %v690_v6, %v704_v17  ;;  %v708_v31 = vcombine.high %v690_v6, %v704_v17 }
  0x5a   :  { %v672_v32 = vrot.slane %v665_v22, %v2544_v13  ;;  %v757_v33 = vcombine.low %v749_v23, %v756_v24  ;;  %v766_v34 = vcombine.high %v369_v57, %v370_v58  ;;  %v767_v52 = vcombine.low %v371_v50, %v372_v51 }
  0x5b   :  { %v715_v35 = vrot.slane %v705_v26, %v2544_v13  ;;  %v722_v53 = vrot.slane %v707_v29, %v2544_v13  ;;  %v729_v39 = vrot.slane %v706_v28, %v2544_v13  ;;  %v736_v48 = vrot.slane %v708_v31, %v2544_v13 }
  0x5c   :  { %v764_v54 = vrot.slane %v757_v33, %v2544_v13  ;;  %v768_v55 = vcombine.high %v371_v50, %v372_v51  ;;  %v775_v49 = vrot.slane %v765_v25, %v2544_v13  ;;  %v2754_v56 = vrot.slane %v766_v34, %v2544_v13 }
  0x5d   :  { %v789_v59 = vrot.slane %v767_v52, %v2544_v13  ;;  %v1454_v57 = vcombine.low %v648_v27, %v672_v32  ;;  %v1455_v58 = vcombine.low %v715_v35, %v729_v39  ;;  %v2342_v60 = vcombine.high %v715_v35, %v729_v39 }
  0x5e   :  { %v2761_v61 = vrot.slane %v768_v55, %v2544_v13  ;;  %v1457_v62 = vcombine.low %v722_v53, %v736_v48  ;;  %v2343_v63 = vcombine.high %v722_v53, %v736_v48  ;;  %v232_v50 = vrot.slane %v2596_v42, %v2580_v30 }
  0x5f   :  { %v797_v51 = vcombine.low %v775_v49, %v789_v59  ;;  %v798_v0 = vcombine.high %v775_v49, %v789_v59  ;;  %v1464_v1 = vrot.slane %v1454_v57, %v2544_v13  ;;  %v1471_v2 = vrot.slane %v1455_v58, %v2544_v13 }
  0x60   :  { %v799_v19 = vcombine.low %v2754_v56, %v2761_v61  ;;  %v1478_v27 = vrot.slane %v2342_v60, %v2544_v13  ;;  %v1485_v3 = vrot.slane %v1457_v62, %v2544_v13  ;;  %v1532_v4 = vrot.slane %v2343_v63, %v2544_v13 }
  0x61   :  { %v807_v5 = vrot.slane %v797_v51, %v2544_v13  ;;  %v821_v40 = vrot.slane %v798_v0, %v2544_v13  ;;  %v1487_v6 = vcombine.high %v1464_v1, %v1471_v2  ;;  %v1486_v8 = vcombine.low %v1464_v1, %v1471_v2 }
  0x62   :  { %v2775_v17 = vrot.slane %v799_v19, %v2544_v13  ;;  %v1489_v22 = vcombine.high %v1478_v27, %v1485_v3  ;;  %v1488_v23 = vcombine.low %v1478_v27, %v1485_v3  ;;  %v236_v24 = vrot.slane %v2596_v42, %v2582_v36 }
  0x63   :  { %v829_v25 = vcombine.high %v807_v5, %v807_v5  ;;  %v831_v26 = vcombine.high %v821_v40, %v821_v40  ;;  %v1503_v28 = vrot.slane %v1487_v6, %v2544_v13  ;;  %v1523_v29 = vcombine.low %v764_v54, %v807_v5 }
  0x64   :  { %v1517_v31 = vrot.slane %v1489_v22, %v2544_v13  ;;  %v1496_v32 = vrot.slane %v1486_v8, %v2544_v13  ;;  %v1510_v33 = vrot.slane %v1488_v23, %v2544_v13  ;;  %v240_v34 = vrot.slane %v2596_v42, %v2584_v37 }
  0x65   :  { %v1524_v52 = vcombine.low %v821_v40, %v829_v25  ;;  %v1525_v35 = vcombine.low %v831_v26, %v2775_v17  ;;  %v1539_v53 = vrot.slane %v1523_v29, %v2544_v13  ;;  %v244_v39 = vrot.slane %v2596_v42, %v2586_v38 }
  0x66   :  { %v1520_v48 = vcombine.low %v1503_v28, %v1517_v31  ;;  %v1521_v55 = vcombine.high %v1503_v28, %v1517_v31  ;;  %v1518_v54 = vcombine.low %v1496_v32, %v1510_v33  ;;  %v1519_v49 = vcombine.high %v1496_v32, %v1510_v33 }
  0x67   :  { %v1546_v59 = vrot.slane %v1524_v52, %v2544_v13  ;;  %v1553_v57 = vrot.slane %v1525_v35, %v2544_v13  ;;  %v1555_v58 = vcombine.high %v1532_v4, %v1539_v53  ;;  %v1554_v60 = vcombine.low %v1532_v4, %v1539_v53 }
  0x68   :  { %v2793_v62 = vrot.slane %v2599_v43, %v2580_v30  ;;  %v2797_v63 = vrot.slane %v2599_v43, %v2582_v36  ;;  %v2801_v51 = vrot.slane %v2599_v43, %v2584_v37  ;;  %v2805_v0 = vrot.slane %v2599_v43, %v2586_v38 }
  0x69   :  { %v1557_v1 = vcombine.high %v1546_v59, %v1553_v57  ;;  %v1571_v2 = vrot.slane %v1555_v58, %v2544_v13  ;;  %v1556_v19 = vcombine.low %v1546_v59, %v1553_v57  ;;  %v1564_v27 = vrot.slane %v1554_v60, %v2544_v13 }
  0x6a   :  { %v373_v3 = vmul.f32 %v2700_v7, %v2536_v9  ;;  %v374_v4 = vmul.f32 %v2703_v41, %v2538_v10  ;;  %v375_v5 = vmul.f32 %v2708_v20, %v2540_v11  ;;  %v376_v40 = vmul.f32 %v2711_v21, %v2542_v12 }
  0x6b   :  { %v1585_v6 = vrot.slane %v1557_v1, %v2544_v13  ;;  %v1578_v8 = vrot.slane %v1556_v19, %v2544_v13  ;;  %v377_v22 = vmul.f32 %v232_v50, %v2548_v14  ;;  %v378_v23 = vmul.f32 %v236_v24, %v2552_v15 }
  0x6c   :  { %v379_v25 = vmul.f32 %v240_v34, %v2556_v16  ;;  %v380_v7 = vmul.f32 %v244_v39, %v2562_v18  ;;  %v381_v41 = vmul.f32 %v232_v50, %v2536_v9  ;;  %v382_v26 = vmul.f32 %v236_v24, %v2538_v10 }
  0x6d   :  { %v1588_v20 = vcombine.low %v1571_v2, %v1585_v6  ;;  %v1589_v28 = vcombine.high %v1571_v2, %v1585_v6  ;;  %v1586_v29 = vcombine.low %v1564_v27, %v1578_v8  ;;  %v1587_v21 = vcombine.high %v1564_v27, %v1578_v8 }
  0x6e   :  { %v383_v31 = vmul.f32 %v240_v34, %v2540_v11  ;;  %v384_v32 = vmul.f32 %v244_v39, %v2542_v12  ;;  %v2829_v33 = vmul.f32 %v2793_v62, %v2548_v14  ;;  %v2833_v52 = vmul.f32 %v2797_v63, %v2552_v15 }
  0x6f   :  { %v2360_v35 = vpack.c.bf16 %v1588_v20, %v1520_v48  ;;  %v2380_v50 = vpack.c.bf16 %v1589_v28, %v1521_v55  ;;  %v2362_v53 = vpack.c.bf16 %v1586_v29, %v1518_v54  ;;  %v2382_v24 = vpack.c.bf16 %v1587_v21, %v1519_v49 }
  0x70   :  { %v2837_v59 = vmul.f32 %v2801_v51, %v2556_v16  ;;  %v2841_v34 = vmul.f32 %v2805_v0, %v2562_v18  ;;  %v800_v39 = vcombine.high %v2754_v56, %v2761_v61  ;;  %v830_v57 = vcombine.high %v2775_v17, %v2775_v17  ;;  %v2851_v61 = vld [vmem:[#allocation5] sm:$0xf] }
  0x71   :  { %2361 = vmatprep.subr.bf16.mxu0 %v2360_v35  ;;  %2381 = vmatprep.subr.bf16.mxu1 %v2380_v50  ;;  %v833_v48 = vcombine.low %v373_v3, %v374_v4  ;;  %v834_v55 = vcombine.low %v375_v5, %v376_v40  ;;  %v857_v54 = vcombine.low %v377_v22, %v378_v23  ;;  %v2495_v17 = vmov 81  }
  0x72   :  { %2363 = vmatpush1.bf16.msra.mxu0 %v2362_v53  ;;  %2383 = vmatpush1.bf16.msra.mxu1 %v2382_v24  ;;  %v828_v49 = vrot.slane %v800_v39, %v2544_v13  ;;  %v858_v58 = vcombine.high %v377_v22, %v378_v23  ;;  %v859_v60 = vcombine.low %v379_v25, %v380_v7 }
  0x73   :  { %v841_v1 = vrot.slane %v833_v48, %v2544_v13  ;;  %v848_v2 = vrot.slane %v834_v55, %v2544_v13  ;;  %v860_v19 = vcombine.high %v379_v25, %v380_v7  ;;  %v867_v56 = vrot.slane %v857_v54, %v2544_v13  ;;  %2402 = vset.pattern.permute.xlu0 %v2495_v17 }
  0x74   :  { %v832_v27 = vcombine.high %v828_v49, %v828_v49  ;;  %v874_v3 = vrot.slane %v858_v58, %v2544_v13  ;;  %v881_v4 = vrot.slane %v859_v60, %v2544_v13  ;;  %v925_v5 = vcombine.low %v381_v41, %v382_v26  ;;  %2225 = vperm.xlu0 %2402, %v2851_v61  }
  0x75   :  { %v849_v40 = vcombine.low %v841_v1, %v848_v2  ;;  %v888_v6 = vrot.slane %v860_v19, %v2544_v13  ;;  %v926_v8 = vcombine.low %v383_v31, %v384_v32  ;;  %v949_v22 = vcombine.low %v2829_v33, %v2833_v52 }
  0x76   :  { %v889_v23 = vcombine.low %v867_v56, %v881_v4  ;;  %v890_v25 = vcombine.high %v867_v56, %v881_v4  ;;  %v933_v7 = vrot.slane %v925_v5, %v2544_v13  ;;  %v951_v20 = vcombine.low %v2837_v59, %v2841_v34 }
  0x77   :  { %v856_v28 = vrot.slane %v849_v40, %v2544_v13  ;;  %v891_v29 = vcombine.low %v874_v3, %v888_v6  ;;  %v892_v41 = vcombine.high %v874_v3, %v888_v6  ;;  %v940_v26 = vrot.slane %v926_v8, %v2544_v13 }
  0x78   :  { %v899_v21 = vrot.slane %v889_v23, %v2544_v13  ;;  %v913_v31 = vrot.slane %v890_v25, %v2544_v13  ;;  %v959_v32 = vrot.slane %v949_v22, %v2544_v13  ;;  %v973_v35 = vrot.slane %v951_v20, %v2544_v13 }
  0x79   :  { %v906_v50 = vrot.slane %v891_v29, %v2544_v13  ;;  %v920_v53 = vrot.slane %v892_v41, %v2544_v13  ;;  %v941_v24 = vcombine.low %v933_v7, %v940_v26  ;;  %v1590_v39 = vcombine.low %v828_v49, %v830_v57 }
  0x7a   :  { %v981_v48 = vcombine.low %v959_v32, %v973_v35  ;;  %v982_v55 = vcombine.high %v959_v32, %v973_v35  ;;  %v1591_v54 = vcombine.low %v832_v27, %v856_v28  ;;  %v1592_v58 = vcombine.low %v899_v21, %v913_v31 }
  0x7b   :  { %v948_v60 = vrot.slane %v941_v24, %v2544_v13  ;;  %v2344_v1 = vcombine.high %v899_v21, %v913_v31  ;;  %v1600_v2 = vrot.slane %v1590_v39, %v2544_v13  ;;  %v1658_v19 = vcombine.low %v906_v50, %v920_v53 }
  0x7c   :  { %v991_v56 = vrot.slane %v981_v48, %v2544_v13  ;;  %v2874_v17 = vrot.slane %v982_v55, %v2544_v13  ;;  %v1607_v3 = vrot.slane %v1591_v54, %v2544_v13  ;;  %v1614_v4 = vrot.slane %v1592_v58, %v2544_v13 }
  0x7d   :  { %v1621_v57 = vrot.slane %v2344_v1, %v2544_v13  ;;  %v2345_v49 = vcombine.high %v906_v50, %v920_v53  ;;  %v1668_v27 = vrot.slane %v1658_v19, %v2544_v13  ;;  %v138_v5 = vcombine.high %v2596_v42, %v2596_v42 }
  0x7e   :  { %v1013_v40 = vcombine.high %v991_v56, %v991_v56  ;;  %v1623_v6 = vcombine.high %v1600_v2, %v1607_v3  ;;  %v1660_v8 = vcombine.low %v948_v60, %v991_v56  ;;  %v1622_v22 = vcombine.low %v1600_v2, %v1607_v3 }
  0x7f   :  { %v1625_v23 = vcombine.high %v1614_v4, %v1621_v57  ;;  %v1675_v25 = vrot.slane %v2345_v49, %v2544_v13  ;;  %v1624_v7 = vcombine.low %v1614_v4, %v1621_v57  ;;  %v140_v20 = vcombine.high %v2599_v43, %v2599_v43 }
  0x80   :  { %v1639_v28 = vrot.slane %v1623_v6, %v2544_v13  ;;  %v1661_v29 = vcombine.low %v2874_v17, %v1013_v40  ;;  %v1682_v41 = vrot.slane %v1660_v8, %v2544_v13  ;;  %v1632_v26 = vrot.slane %v1622_v22, %v2544_v13 }
  0x81   :  { %v1653_v42 = vrot.slane %v1625_v23, %v2544_v13  ;;  %v1691_v21 = vcombine.high %v1668_v27, %v1675_v25  ;;  %v1646_v31 = vrot.slane %v1624_v7, %v2544_v13  ;;  %v1690_v32 = vcombine.low %v1668_v27, %v1675_v25 }
  0x82   :  { %v1689_v35 = vrot.slane %v1661_v29, %v2544_v13  ;;  %v264_v50 = vrot.slane %v138_v5, %v2580_v30  ;;  %v268_v43 = vrot.slane %v138_v5, %v2582_v36  ;;  %v272_v53 = vrot.slane %v138_v5, %v2584_v37 }
  0x83   :  { %v1656_v24 = vcombine.low %v1639_v28, %v1653_v42  ;;  %v1707_v39 = vrot.slane %v1691_v21, %v2544_v13  ;;  %v1657_v48 = vcombine.high %v1639_v28, %v1653_v42  ;;  %v1654_v55 = vcombine.low %v1632_v26, %v1646_v31 }
  0x84   :  { %v1693_v54 = vcombine.high %v1682_v41, %v1689_v35  ;;  %v1692_v58 = vcombine.low %v1682_v41, %v1689_v35  ;;  %v1700_v60 = vrot.slane %v1690_v32, %v2544_v13  ;;  %v1655_v1 = vcombine.high %v1632_v26, %v1646_v31 }
  0x85   :  { %v276_v2 = vrot.slane %v138_v5, %v2586_v38  ;;  %v2899_v19 = vrot.slane %v140_v20, %v2580_v30  ;;  %v2902_v56 = vrot.slane %v140_v20, %v2582_v36  ;;  %v2905_v3 = vrot.slane %v140_v20, %v2584_v37 }
  0x86   :  { %v1721_v4 = vrot.slane %v1693_v54, %v2544_v13  ;;  %v1714_v57 = vrot.slane %v1692_v58, %v2544_v13  ;;  %v2910_v49 = vrot.slane %v140_v20, %v2586_v38  ;;  %v389_v27 = vmul.f32 %v2793_v62, %v2536_v9 }
  0x87   :  { %v390_v30 = vmul.f32 %v2797_v63, %v2538_v10  ;;  %v391_v36 = vmul.f32 %v2801_v51, %v2540_v11  ;;  %v392_v37 = vmul.f32 %v2805_v0, %v2542_v12  ;;  %v393_v5 = vmul.f32 %v264_v50, %v2548_v14 }
  0x88   :  { %v1724_v40 = vcombine.low %v1707_v39, %v1721_v4  ;;  %v1725_v6 = vcombine.high %v1707_v39, %v1721_v4  ;;  %v1722_v8 = vcombine.low %v1700_v60, %v1714_v57  ;;  %v1723_v22 = vcombine.high %v1700_v60, %v1714_v57 }
  0x89   :  { %v394_v38 = vmul.f32 %v268_v43, %v2552_v15  ;;  %v395_v23 = vmul.f32 %v272_v53, %v2556_v16  ;;  %v396_v62 = vmul.f32 %v276_v2, %v2562_v18  ;;  %v397_v63 = vmul.f32 %v264_v50, %v2536_v9 }
  0x8a   :  { %v2364_v25 = vpack.c.bf16 %v1724_v40, %v1656_v24  ;;  %v2384_v7 = vpack.c.bf16 %v1725_v6, %v1657_v48  ;;  %v2366_v51 = vpack.c.bf16 %v1722_v8, %v1654_v55  ;;  %v2386_v20 = vpack.c.bf16 %v1723_v22, %v1655_v1 }
  0x8b   :  { %v398_v0 = vmul.f32 %v268_v43, %v2538_v10  ;;  %v399_v28 = vmul.f32 %v272_v53, %v2540_v11  ;;  %v400_v29 = vmul.f32 %v276_v2, %v2542_v12  ;;  %v2930_v41 = vmul.f32 %v2899_v19, %v2548_v14 }
  0x8c   :  { %2365 = vmatprep.subr.bf16.mxu0 %v2364_v25  ;;  %2385 = vmatprep.subr.bf16.mxu1 %v2384_v7  ;;  %v2934_v26 = vmul.f32 %v2902_v56, %v2552_v15  ;;  %v2938_v42 = vmul.f32 %v2905_v3, %v2556_v16  ;;  %v2942_v21 = vmul.f32 %v2910_v49, %v2562_v18 }
  0x8d   :  { %2367 = vmatpush1.bf16.msra.mxu0 %v2366_v51  ;;  %2387 = vmatpush1.bf16.msra.mxu1 %v2386_v20  ;;  %v950_v31 = vcombine.high %v2829_v33, %v2833_v52  ;;  %v952_v32 = vcombine.high %v2837_v59, %v2841_v34  ;;  %v1015_v35 = vcombine.high %v2874_v17, %v2874_v17 }
  0x8e   :  { %v1017_v50 = vcombine.low %v389_v27, %v390_v30  ;;  %v1018_v43 = vcombine.low %v391_v36, %v392_v37  ;;  %v1041_v53 = vcombine.low %v393_v5, %v394_v38  ;;  %v1042_v24 = vcombine.high %v393_v5, %v394_v38 }
  0x8f   :  { %v966_v39 = vrot.slane %v950_v31, %v2544_v13  ;;  %v980_v48 = vrot.slane %v952_v32, %v2544_v13  ;;  %v1043_v55 = vcombine.low %v395_v23, %v396_v62  ;;  %v1044_v54 = vcombine.high %v395_v23, %v396_v62 }
  0x90   :  { %v1025_v58 = vrot.slane %v1017_v50, %v2544_v13  ;;  %v1032_v33 = vrot.slane %v1018_v43, %v2544_v13  ;;  %v1051_v52 = vrot.slane %v1041_v53, %v2544_v13  ;;  %v1058_v59 = vrot.slane %v1042_v24, %v2544_v13 }
  0x91   :  { %v983_v34 = vcombine.low %v966_v39, %v980_v48  ;;  %v984_v17 = vcombine.high %v966_v39, %v980_v48  ;;  %v1065_v60 = vrot.slane %v1043_v55, %v2544_v13  ;;  %v1072_v1 = vrot.slane %v1044_v54, %v2544_v13 }
  0x92   :  { %v1033_v2 = vcombine.low %v1025_v58, %v1032_v33  ;;  %v1109_v4 = vcombine.low %v397_v63, %v398_v0  ;;  %v1110_v57 = vcombine.low %v399_v28, %v400_v29  ;;  %v1133_v27 = vcombine.low %v2930_v41, %v2934_v26 }
  0x93   :  { %v998_v30 = vrot.slane %v983_v34, %v2544_v13  ;;  %v1012_v36 = vrot.slane %v984_v17, %v2544_v13  ;;  %v1073_v37 = vcombine.low %v1051_v52, %v1065_v60  ;;  %v1074_v5 = vcombine.high %v1051_v52, %v1065_v60 }
  0x94   :  { %v1040_v40 = vrot.slane %v1033_v2, %v2544_v13  ;;  %v1075_v6 = vcombine.low %v1058_v59, %v1072_v1  ;;  %v1076_v8 = vcombine.high %v1058_v59, %v1072_v1  ;;  %v1117_v22 = vrot.slane %v1109_v4, %v2544_v13 }
  0x95   :  { %v1014_v38 = vcombine.high %v998_v30, %v998_v30  ;;  %v1016_v23 = vcombine.high %v1012_v36, %v1012_v36  ;;  %v1083_v62 = vrot.slane %v1073_v37, %v2544_v13  ;;  %v1097_v63 = vrot.slane %v1074_v5, %v2544_v13 }
  0x96   :  { %v1090_v25 = vrot.slane %v1075_v6, %v2544_v13  ;;  %v1104_v7 = vrot.slane %v1076_v8, %v2544_v13  ;;  %v1124_v51 = vrot.slane %v1110_v57, %v2544_v13  ;;  %v1135_v20 = vcombine.low %v2938_v42, %v2942_v21 }
  0x97   :  { %v1143_v0 = vrot.slane %v1133_v27, %v2544_v13  ;;  %v1726_v28 = vcombine.low %v1015_v35, %v998_v30  ;;  %v1727_v29 = vcombine.low %v1012_v36, %v1014_v38  ;;  %v1728_v31 = vcombine.low %v1016_v23, %v1040_v40 }
  0x98   :  { %v1125_v32 = vcombine.low %v1117_v22, %v1124_v51  ;;  %v1157_v50 = vrot.slane %v1135_v20, %v2544_v13  ;;  %v1729_v43 = vcombine.low %v1083_v62, %v1097_v63  ;;  %v2346_v53 = vcombine.high %v1083_v62, %v1097_v63 }
  0x99   :  { %v1736_v24 = vrot.slane %v1726_v28, %v2544_v13  ;;  %v1743_v39 = vrot.slane %v1727_v29, %v2544_v13  ;;  %v1750_v48 = vrot.slane %v1728_v31, %v2544_v13  ;;  %v1795_v55 = vcombine.low %v1090_v25, %v1104_v7 }
  0x9a   :  { %v1132_v54 = vrot.slane %v1125_v32, %v2544_v13  ;;  %v1165_v58 = vcombine.low %v1143_v0, %v1157_v50  ;;  %v1757_v33 = vrot.slane %v1729_v43, %v2544_v13  ;;  %v2347_v35 = vcombine.high %v1090_v25, %v1104_v7 }
  0x9b   :  { %v1759_v52 = vcombine.high %v1736_v24, %v1743_v39  ;;  %v1804_v59 = vrot.slane %v2346_v53, %v2544_v13  ;;  %v1811_v34 = vrot.slane %v1795_v55, %v2544_v13  ;;  %v1758_v17 = vcombine.low %v1736_v24, %v1743_v39 }
  0x9c   :  { %v2981_v60 = vrot.slane %v1165_v58, %v2544_v13  ;;  %v1761_v1 = vcombine.high %v1750_v48, %v1757_v33  ;;  %v1818_v2 = vrot.slane %v2347_v35, %v2544_v13  ;;  %v1760_v4 = vcombine.low %v1750_v48, %v1757_v33 }
  0x9d   :  { %v1775_v57 = vrot.slane %v1759_v52, %v2544_v13  ;;  %v1827_v27 = vcombine.high %v1804_v59, %v1811_v34  ;;  %v1768_v30 = vrot.slane %v1758_v17, %v2544_v13  ;;  %v1826_v36 = vcombine.low %v1804_v59, %v1811_v34 }
  0x9e   :  { %v1789_v37 = vrot.slane %v1761_v1, %v2544_v13  ;;  %v1797_v5 = vcombine.low %v1132_v54, %v2981_v60  ;;  %v1782_v40 = vrot.slane %v1760_v4, %v2544_v13  ;;  %v405_v6 = vmul.f32 %v2899_v19, %v2536_v9 }
  0x9f   :  { %v1843_v8 = vrot.slane %v1827_v27, %v2544_v13  ;;  %v1836_v22 = vrot.slane %v1826_v36, %v2544_v13  ;;  %v406_v38 = vmul.f32 %v2902_v56, %v2538_v10  ;;  %v407_v23 = vmul.f32 %v2905_v3, %v2540_v11 }
  0xa0   :  { %v1792_v62 = vcombine.low %v1775_v57, %v1789_v37  ;;  %v1825_v63 = vrot.slane %v1797_v5, %v2544_v13  ;;  %v1793_v25 = vcombine.high %v1775_v57, %v1789_v37  ;;  %v1790_v7 = vcombine.low %v1768_v30, %v1782_v40 }
  0xa1   :  { %v1791_v51 = vcombine.high %v1768_v30, %v1782_v40  ;;  %v408_v20 = vmul.f32 %v2910_v49, %v2542_v12  ;;  %v409_v19 = vmul.f32 %v2602_v44, %v2548_v14  ;;  %v410_v28 = vmul.f32 %v2605_v45, %v2552_v15 }
  0xa2   :  { %v1829_v29 = vcombine.high %v1818_v2, %v1825_v63  ;;  %v1828_v56 = vcombine.low %v1818_v2, %v1825_v63  ;;  %v411_v3 = vmul.f32 %v2608_v46, %v2556_v16  ;;  %v412_v31 = vmul.f32 %v2611_v47, %v2562_v18 }
  0xa3   :  { %v1134_v32 = vcombine.high %v2930_v41, %v2934_v26  ;;  %v1136_v49 = vcombine.high %v2938_v42, %v2942_v21  ;;  %v1166_v43 = vcombine.high %v1143_v0, %v1157_v50  ;;  %v1197_v14 = vcombine.high %v2981_v60, %v2981_v60 }
  0xa4   :  { %v1857_v15 = vrot.slane %v1829_v29, %v2544_v13  ;;  %v1850_v53 = vrot.slane %v1828_v56, %v2544_v13  ;;  %v1201_v24 = vcombine.low %v405_v6, %v406_v38  ;;  %v1202_v39 = vcombine.low %v407_v23, %v408_v20 }
  0xa5   :  { %v1150_v16 = vrot.slane %v1134_v32, %v2544_v13  ;;  %v1164_v18 = vrot.slane %v1136_v49, %v2544_v13  ;;  %v1189_v48 = vrot.slane %v1166_v43, %v2544_v13  ;;  %v1225_v41 = vcombine.low %v409_v19, %v410_v28 }
  0xa6   :  { %v1860_v26 = vcombine.low %v1843_v8, %v1857_v15  ;;  %v1861_v55 = vcombine.high %v1843_v8, %v1857_v15  ;;  %v1858_v42 = vcombine.low %v1836_v22, %v1850_v53  ;;  %v1859_v21 = vcombine.high %v1836_v22, %v1850_v53 }
  0xa7   :  { %v1167_v0 = vcombine.low %v1150_v16, %v1164_v18  ;;  %v1168_v50 = vcombine.high %v1150_v16, %v1164_v18  ;;  %v1199_v54 = vcombine.high %v1189_v48, %v1189_v48  ;;  %v1209_v58 = vrot.slane %v1201_v24, %v2544_v13 }
  0xa8   :  { %v2368_v33 = vpack.c.bf16 %v1860_v26, %v1792_v62  ;;  %v2388_v35 = vpack.c.bf16 %v1861_v55, %v1793_v25  ;;  %v2370_v52 = vpack.c.bf16 %v1858_v42, %v1790_v7  ;;  %v2390_v59 = vpack.c.bf16 %v1859_v21, %v1791_v51 }
  0xa9   :  { %v1182_v34 = vrot.slane %v1167_v0, %v2544_v13  ;;  %v1196_v17 = vrot.slane %v1168_v50, %v2544_v13  ;;  %v1216_v60 = vrot.slane %v1202_v39, %v2544_v13  ;;  %v1226_v1 = vcombine.high %v409_v19, %v410_v28 }
  0xaa   :  { %2369 = vmatprep.subr.bf16.mxu0 %v2368_v33  ;;  %2389 = vmatprep.subr.bf16.mxu1 %v2388_v35  ;;  %v1227_v2 = vcombine.low %v411_v3, %v412_v31  ;;  %v1228_v4 = vcombine.high %v411_v3, %v412_v31  ;;  %v1235_v57 = vrot.slane %v1225_v41, %v2544_v13 }
  0xab   :  { %2371 = vmatpush1.bf16.msra.mxu0 %v2370_v52  ;;  %2391 = vmatpush1.bf16.msra.mxu1 %v2390_v59  ;;  %v1198_v27 = vcombine.high %v1182_v34, %v1182_v34  ;;  %v1200_v30 = vcombine.high %v1196_v17, %v1196_v17  ;;  %v1217_v36 = vcombine.low %v1209_v58, %v1216_v60 }
  0xac   :  { %v1242_v37 = vrot.slane %v1226_v1, %v2544_v13  ;;  %v1249_v5 = vrot.slane %v1227_v2, %v2544_v13  ;;  %v1256_v40 = vrot.slane %v1228_v4, %v2544_v13  ;;  %v1862_v6 = vcombine.low %v1189_v48, %v1197_v14 }
  0xad   :  { %v1224_v8 = vrot.slane %v1217_v36, %v2544_v13  ;;  %v1863_v22 = vcombine.low %v1199_v54, %v1182_v34  ;;  %v1864_v38 = vcombine.low %v1196_v17, %v1198_v27  ;;  %v413_v23 = vmul.f32 %v2602_v44, %v2536_v9 }
  0xae   :  { %v1257_v62 = vcombine.low %v1235_v57, %v1249_v5  ;;  %v1258_v63 = vcombine.high %v1235_v57, %v1249_v5  ;;  %v1259_v25 = vcombine.low %v1242_v37, %v1256_v40  ;;  %v1260_v7 = vcombine.high %v1242_v37, %v1256_v40 }
  0xaf   :  { %v1865_v51 = vcombine.low %v1200_v30, %v1224_v8  ;;  %v1872_v20 = vrot.slane %v1862_v6, %v2544_v13  ;;  %v1879_v19 = vrot.slane %v1863_v22, %v2544_v13  ;;  %v1886_v28 = vrot.slane %v1864_v38, %v2544_v13 }
  0xb0   :  { %v1267_v29 = vrot.slane %v1257_v62, %v2544_v13  ;;  %v1274_v56 = vrot.slane %v1259_v25, %v2544_v13  ;;  %v1281_v3 = vrot.slane %v1258_v63, %v2544_v13  ;;  %v1288_v31 = vrot.slane %v1260_v7, %v2544_v13 }
  0xb1   :  { %v1893_v9 = vrot.slane %v1865_v51, %v2544_v13  ;;  %v1895_v44 = vcombine.high %v1872_v20, %v1879_v19  ;;  %v1894_v32 = vcombine.low %v1872_v20, %v1879_v19  ;;  %v414_v49 = vmul.f32 %v2605_v45, %v2538_v10 }
  0xb2   :  { %v1930_v43 = vcombine.low %v1267_v29, %v1281_v3  ;;  %v2348_v14 = vcombine.high %v1267_v29, %v1281_v3  ;;  %v1932_v15 = vcombine.low %v1274_v56, %v1288_v31  ;;  %v2349_v53 = vcombine.high %v1274_v56, %v1288_v31 }
  0xb3   :  { %v1897_v24 = vcombine.high %v1886_v28, %v1893_v9  ;;  %v1911_v39 = vrot.slane %v1895_v44, %v2544_v13  ;;  %v1896_v16 = vcombine.low %v1886_v28, %v1893_v9  ;;  %v1904_v18 = vrot.slane %v1894_v32, %v2544_v13 }
  0xb4   :  { %v1940_v48 = vrot.slane %v1930_v43, %v2544_v13  ;;  %v1947_v41 = vrot.slane %v2348_v14, %v2544_v13  ;;  %v1954_v26 = vrot.slane %v1932_v15, %v2544_v13  ;;  %v1961_v55 = vrot.slane %v2349_v53, %v2544_v13 }
  0xb5   :  { %v1925_v10 = vrot.slane %v1897_v24, %v2544_v13  ;;  %v1918_v45 = vrot.slane %v1896_v16, %v2544_v13  ;;  %v415_v42 = vmul.f32 %v2608_v46, %v2540_v11  ;;  %v416_v21 = vmul.f32 %v2611_v47, %v2542_v12 }
  0xb6   :  { %v1963_v0 = vcombine.high %v1940_v48, %v1947_v41  ;;  %v1965_v50 = vcombine.high %v1954_v26, %v1961_v55  ;;  %v1962_v54 = vcombine.low %v1940_v48, %v1947_v41  ;;  %v1964_v58 = vcombine.low %v1954_v26, %v1961_v55 }
  0xb7   :  { %v1928_v33 = vcombine.low %v1911_v39, %v1925_v10  ;;  %v1929_v35 = vcombine.high %v1911_v39, %v1925_v10  ;;  %v1926_v52 = vcombine.low %v1904_v18, %v1918_v45  ;;  %v1927_v59 = vcombine.high %v1904_v18, %v1918_v45 }
  0xb8   :  { %v1979_v34 = vrot.slane %v1963_v0, %v2544_v13  ;;  %v1993_v17 = vrot.slane %v1965_v50, %v2544_v13  ;;  %v1972_v60 = vrot.slane %v1962_v54, %v2544_v13  ;;  %v1986_v1 = vrot.slane %v1964_v58, %v2544_v13 }
  0xb9   :  { %v1293_v11 = vcombine.low %v413_v23, %v414_v49  ;;  %v1294_v46 = vcombine.low %v415_v42, %v416_v21 }
  0xba   :  { %v1996_v2 = vcombine.low %v1979_v34, %v1993_v17  ;;  %v1997_v12 = vcombine.high %v1979_v34, %v1993_v17  ;;  %v1994_v47 = vcombine.low %v1972_v60, %v1986_v1  ;;  %v1995_v4 = vcombine.high %v1972_v60, %v1986_v1 }
  0xbb   :  { %v1301_v57 = vrot.slane %v1293_v11, %v2544_v13  ;;  %v1308_v27 = vrot.slane %v1294_v46, %v2544_v13 }
  0xbc   :  { %v2372_v30 = vpack.c.bf16 %v1996_v2, %v1928_v33  ;;  %v2392_v36 = vpack.c.bf16 %v1997_v12, %v1929_v35  ;;  %v2374_v37 = vpack.c.bf16 %v1994_v47, %v1926_v52  ;;  %v2394_v5 = vpack.c.bf16 %v1995_v4, %v1927_v59 }
  0xbd   :  { %v1309_v40 = vcombine.low %v1301_v57, %v1308_v27 }
  0xbe   :  { %2373 = vmatprep.subr.bf16.mxu0 %v2372_v30  ;;  %2393 = vmatprep.subr.bf16.mxu1 %v2392_v36 }
  0xbf   :  { %2375 = vmatpush1.bf16.msra.mxu0 %v2374_v37  ;;  %2395 = vmatpush1.bf16.msra.mxu1 %v2394_v5  ;;  %v1316_v6 = vrot.slane %v1309_v40, %v2544_v13 }
  0xc1   :  { %v2004_v8 = vrot.slane %v1316_v6, %v2544_v13 }
  0xc3   :  { %v2005_v22 = vcombine.high %v2004_v8, %v2004_v8  ;;  %v2012_v38 = vrot.slane %v2004_v8, %v2544_v13 }
  0xc5   :  { %v2019_v23 = vrot.slane %v2005_v22, %v2544_v13  ;;  %v2020_v62 = vcombine.high %v2012_v38, %v2012_v38 }
  0xc7   :  { %2350 = vmatprep.subr.msk.mxu0 %vm64_vm0, %v2019_v23  ;;  %v2021_v63 = vcombine.high %v2019_v23, %v2019_v23 }
  0xc8   :  { %2351 = vmatpush1.msk.msra.mxu0 %vm64_vm0, %v2012_v38 }
  0xc9   :  { %2353 = vmatprep.subr.msk.mxu1 %vm64_vm0, %v2021_v63  ;;  %2352 = vmatmul.mubr.msk.f32.vlgmr.msra.gmra.mrb[0].mxu0 %vm2062_vm2, %v2851_v61 }
  0xca   :  { %2354 = vmatpush1.msk.msra.mxu1 %vm64_vm0, %v2020_v62 }
  0xcb   :  { %2355 = vmatmul.mubr.msk.f32.vlgmr.msra.gmra.mrb[0].mxu1 %vm2062_vm2, %v2851_v61 }
  0xf3   :  { %v2226_v56 = vpop.permute.xlu0 %2225 }
 0x19c   :  { %v2140_v25 = vpop.f32.mrb[0].mxu0 }
 0x19d   :  { %v2216_v7 = vmul.f32 1.442695, %v2140_v25  ;;  %v2142_v51 = vpop.f32.mrb[1].mxu0  ;;  %v2285_v25 = vld [vmem:[#allocation7] sm:$0x1] }
 0x19e   :  { %v2211_v20 = vpop.f32.mrb[0].mxu1  ;;  %v2218_v13 = vmul.f32 1.442695, %v2142_v51 }
 0x19f   :  { %2403 = vpow2.f32 %v2216_v7  ;;  %v2220_v19 = vmul.f32 1.442695, %v2211_v20  ;;  %v2213_v28 = vpop.f32.mrb[1].mxu1 }
 0x1a0   :  { %2405 = vpow2.f32 %v2218_v13  ;;  %v2222_v29 = vmul.f32 1.442695, %v2213_v28 }
 0x1a1   :  { %2407 = vpow2.f32 %v2220_v19 }
 0x1a2   :  { %2409 = vpow2.f32 %v2222_v29 }
 0x1a9   :  { %v2404_v3 = vpop.eup %2403 }
 0x1aa   :  { %v2406_v31 = vpop.eup %2405  ;;  %v2228_v9 = vmul.f32 %v2404_v3, %v2226_v56 }
 0x1ab   :  { %v2408_v44 = vpop.eup %2407  ;;  %v2229_v32 = vmul.f32 %v2406_v31, %v2226_v56 }
 0x1ac   :  { %v2410_v61 = vpop.eup %2409  ;;  %v2230_v49 = vmul.f32 %v2408_v44, %v2226_v56  ;;  %v2233_v43 = vsel %vm2232_vm3, %v2228_v9, 0.0 }
 0x1ad   :  { %v2231_v14 = vmul.f32 %v2410_v61, %v2226_v56  ;;  %v2234_v15 = vrot.slane %v2233_v43, 4  ;;  %v2240_v53 = vsel %vm2232_vm3, %v2229_v32, 0.0 }
 0x1ae   :  { %v2241_v24 = vrot.slane %v2240_v53, 4  ;;  %v2247_v39 = vsel %vm2232_vm3, %v2230_v49, 0.0 }
 0x1af   :  { %v2235_v16 = vadd.f32 %v2234_v15, %v2233_v43  ;;  %v2248_v18 = vrot.slane %v2247_v39, 4  ;;  %v2254_v48 = vsel %vm2232_vm3, %v2231_v14, 0.0 }
 0x1b0   :  { %v2242_v41 = vadd.f32 %v2241_v24, %v2240_v53  ;;  %v2255_v26 = vrot.slane %v2254_v48, 4 }
 0x1b1   :  { %v2236_v55 = vrot.slane %v2235_v16, 2  ;;  %v2249_v10 = vadd.f32 %v2248_v18, %v2247_v39 }
 0x1b2   :  { %v2243_v45 = vrot.slane %v2242_v41, 2  ;;  %v2256_v42 = vadd.f32 %v2255_v26, %v2254_v48 }
 0x1b3   :  { %v2237_v21 = vadd.f32 %v2236_v55, %v2235_v16  ;;  %v2250_v0 = vrot.slane %v2249_v10, 2 }
 0x1b4   :  { %v2244_v50 = vadd.f32 %v2243_v45, %v2242_v41  ;;  %v2257_v54 = vrot.slane %v2256_v42, 2 }
 0x1b5   :  { %v2238_v58 = vrot.slane %v2237_v21, 1  ;;  %v2251_v33 = vadd.f32 %v2250_v0, %v2249_v10 }
 0x1b6   :  { %v2245_v35 = vrot.slane %v2244_v50, 1  ;;  %v2258_v52 = vadd.f32 %v2257_v54, %v2256_v42 }
 0x1b7   :  { %v2239_v59 = vadd.f32 %v2238_v58, %v2237_v21  ;;  %v2252_v34 = vrot.slane %v2251_v33, 1 }
 0x1b8   :  { %v2246_v17 = vadd.f32 %v2245_v35, %v2244_v50  ;;  %v2259_v60 = vrot.slane %v2258_v52, 1 }
 0x1b9   :  { %v2253_v1 = vadd.f32 %v2252_v34, %v2251_v33  ;;  %v2261_v11 = vadd.f32 1e-06, %v2239_v59 }
 0x1ba   :  { %v2260_v46 = vadd.f32 %v2259_v60, %v2258_v52  ;;  %v2262_v2 = vadd.f32 1e-06, %v2246_v17 }
 0x1bb   :  { %v2263_v12 = vadd.f32 1e-06, %v2253_v1  ;;  %2411 = vlog2.f32 %v2261_v11 }
 0x1bc   :  { %v2264_v47 = vadd.f32 1e-06, %v2260_v46  ;;  %2413 = vlog2.f32 %v2262_v2 }
 0x1bd   :  { %2415 = vlog2.f32 %v2263_v12 }
 0x1be   :  { %2417 = vlog2.f32 %v2264_v47 }
 0x1c5   :  { %v2412_v4 = vpop.eup %2411 }
 0x1c6   :  { %v2414_v57 = vpop.eup %2413  ;;  %v2266_v27 = vmul.f32 0.6931472, %v2412_v4 }
 0x1c7   :  { %v2416_v30 = vpop.eup %2415  ;;  %v2268_v36 = vmul.f32 0.6931472, %v2414_v57 }
 0x1c8   :  { %v2418_v37 = vpop.eup %2417  ;;  %v2270_v5 = vmul.f32 0.6931472, %v2416_v30  ;;  %v2273_v40 = vsub.f32 0.0, %v2266_v27 }
 0x1c9   :  { %v2272_v6 = vmul.f32 0.6931472, %v2418_v37  ;;  %v2274_v8 = vsub.f32 0.0, %v2268_v36 }
 0x1ca   :  { %v2275_v22 = vsub.f32 0.0, %v2270_v5 }
 0x1cb   :  { %v2286_v38 = vadd.f32 %v2274_v8, %v2273_v40  ;;  %v2276_v23 = vsub.f32 0.0, %v2272_v6 }
 0x1cd   :  { %v2287_v62 = vadd.f32 %v2286_v38, %v2275_v22 }
 0x1cf   :  { %v2288_v63 = vadd.f32 %v2287_v62, %v2276_v23 }
 0x1d1   :  { %2289 = vadd.xlane.f32.xlu0 %v2288_v63 }
 0x25e   :  { %v2290_v7 = vpop.xlane.xlu0 %2289 }
 0x25f   :  { %v2291_v51 = vadd.f32 %v2290_v7, %v2285_v25 }
 0x261   :  { %2293 = vst.msk [vmem:[#allocation7] sm:$0x1] %vm46_vm1, %v2291_v51 }
 0x262   :  { %2474 = shalt.err (!%p2471_p6)
}
 0x263   :  { %s2475_s9 = scalar_lea.hbm %s3083_s2, 16 }
 0x264   :  { %p2476_p7 = scmp.ne.s32.totalorder %s3083_s2, %s2475_s9  ;;  %p2479_p8 = scmp.lt.u32.totalorder %s2475_s9, %s3083_s2 }
 0x266   :  { %p2481_p9 = pnand %p2479_p8, %p2476_p7 }
 0x268   :  { %2484 = shalt.err (!%p2481_p9)
}
 0x269   :  { %2333 = dma.vmem_to_hbm [thread:$0]  %s2331_s4, 16, %s3083_s2, [#allocation4]  }
 0x26a   :  { %2489 = dma.done.wait [#allocation4], 16  }
 0x26b   :  { %2490 = vsyncadd [#allocation4], 4294967280 }
 0x26c   :  { %2337 = vsyncpa [#allocation3], 1 }
 0x26d   :  { %2338 = vsyncpa [#allocation6], 1 }
 0x26e   :  { %2339 = vsyncpa [#allocation4], 1 }

</bundles_post_ra>
